<compile_context>
chip_gen: v5e
topology: v5e:2x2
jax: 0.10.0
libtpu: 0.0.40
codegen_flags: <defaults>
</compile_context>

<pallas_src>
import jax
import jax.numpy as jnp
from jax import lax
from jax.experimental import pallas as pl
from jax.experimental.pallas import tpu as pltpu

HIDDEN = 128
BATCH_BLOCK = 8          # sublane width


def _lstm_kernel(x_ref,       # (T, Bb, Dp)  f32, time-major batch block
                 wih0_ref,    # (Dp, 4H)     bf16 (zero-padded input rows)
                 whh0_ref,    # (H, 4H)      bf16
                 b0_ref,      # (1, 4H)      f32 (b_ih + b_hh, layer 0)
                 wih1_ref,    # (H, 4H)      bf16
                 whh1_ref,    # (H, 4H)      bf16
                 b1_ref,      # (1, 4H)      f32 (b_ih + b_hh, layer 1)
                 out_ref,     # (Bb, H)      f32, h of layer 1 at final step
                 xproj_ref):  # VMEM scratch (T*Bb, 4H) f32
    H = HIDDEN
    T, Bb, Dp = x_ref.shape

    # ---- Hoisted layer-0 input projection: one big MXU call, bias folded in.
    x_bf = x_ref[...].reshape(T * Bb, Dp).astype(jnp.bfloat16)
    xproj_ref[...] = (
        jnp.dot(x_bf, wih0_ref[...], preferred_element_type=jnp.float32)
        + jnp.broadcast_to(b0_ref[...], (T * Bb, 4 * H)))

    # Layer-1 bias broadcast hoisted out of the time loop (4 vregs).
    b1 = jnp.broadcast_to(b1_ref[...], (Bb, 4 * H))

    def gates_to_hc(g, c_prev):
        # PyTorch gate order [i, f, g, o]; every slice is 128-lane aligned.
        # One sigmoid over the contiguous [i|f] 2H slice (fewer, wider EUP ops).
        i_f = jax.nn.sigmoid(g[:, 0:2 * H])
        i = i_f[:, 0:H]
        f = i_f[:, H:2 * H]
        gg = jnp.tanh(g[:, 2 * H:3 * H])
        o = jax.nn.sigmoid(g[:, 3 * H:4 * H])
        c_new = f * c_prev + i * gg
        h_new = o * jnp.tanh(c_new)
        return h_new, c_new

    def step(t, carry):
        h0, c0, h1, c1 = carry
        # ---- Layer 0: h0_prev @ Whh0 + (precomputed x_t @ Wih0 + b0) ------
        off = pl.multiple_of(t * Bb, Bb)
        g0 = (xproj_ref[pl.ds(off, Bb), :]
              + jnp.dot(h0.astype(jnp.bfloat16), whh0_ref[...],
                        preferred_element_type=jnp.float32))
        h0, c0 = gates_to_hc(g0, c0)
        # ---- Layer 1: h0_new @ Wih1 + h1_prev @ Whh1 + b1 -----------------
        g1 = (jnp.dot(h0.astype(jnp.bfloat16), wih1_ref[...],
                      preferred_element_type=jnp.float32)
              + jnp.dot(h1.astype(jnp.bfloat16), whh1_ref[...],
                        preferred_element_type=jnp.float32)
              + b1)
        h1, c1 = gates_to_hc(g1, c1)
        return (h0, c0, h1, c1)

    z = jnp.zeros((Bb, H), jnp.float32)
    _, _, h1, _ = lax.fori_loop(0, T, step, (z, z, z, z),
                                unroll=min(int(T), 8))

    # hn[-1]: lane-dense (Bb, 128) output; fc(128 -> 1) runs in the wrapper.
    out_ref[...] = h1


def lstm_covid_forward(x_btd, params):
    """x_btd: (B, T, D) float32, batch-first like the PyTorch module."""
    B, T, D = x_btd.shape
    H = HIDDEN
    Bb = BATCH_BLOCK
    (wih0, whh0, b0, wih1, whh1, b1, wfc, bfc) = params

    Bp = ((B + Bb - 1) // Bb) * Bb        # pad batch to sublane width
    Dp = ((D + 127) // 128) * 128         # pad features to lane width

    # Zero-padded, time-major input: (T, Bp, Dp).
    x_pad = jnp.zeros((Bp, T, Dp), jnp.float32).at[:B, :, :D].set(x_btd)
    x_tbd = jnp.transpose(x_pad, (1, 0, 2))

    # bf16 MXU operands (f32 accumulation / gate math inside the kernel).
    wih0_p = (jnp.zeros((Dp, 4 * H), jnp.float32).at[:D].set(wih0)
              .astype(jnp.bfloat16))
    whh0_b = whh0.astype(jnp.bfloat16)
    wih1_b = wih1.astype(jnp.bfloat16)
    whh1_b = whh1.astype(jnp.bfloat16)

    nb = Bp // Bb

    def full(shape):
        return pl.BlockSpec(shape, lambda i, _n=len(shape): (0,) * _n)

    h_last = pl.pallas_call(
        _lstm_kernel,
        out_shape=jax.ShapeDtypeStruct((Bp, H), jnp.float32),
        grid=(nb,),
        in_specs=[
            pl.BlockSpec((T, Bb, Dp), lambda i: (0, i, 0)),   # x (batch block)
            full((Dp, 4 * H)),                                # Wih0 (padded)
            full((H, 4 * H)),                                 # Whh0
            full((1, 4 * H)),                                 # b0
            full((H, 4 * H)),                                 # Wih1
            full((H, 4 * H)),                                 # Whh1
            full((1, 4 * H)),                                 # b1
        ],
        out_specs=pl.BlockSpec((Bb, H), lambda i: (i, 0)),
        scratch_shapes=[pltpu.VMEM((T * Bb, 4 * H), jnp.float32)],
        compiler_params=pltpu.CompilerParams(
            dimension_semantics=("parallel",),        # batch rows independent
            vmem_limit_bytes=32 * 1024 * 1024),       # safe on v5e/v6e/v7x
    )(x_tbd, wih0_p, whh0_b, b0, wih1_b, whh1_b, b1)

    # Final Linear(128 -> 1) outside the kernel (avoids a 1-lane masked store
    # and a degenerate N=1 MXU pass).
    return h_last[:B] @ wfc + bfc


def init_params(key, input_size):
    """Deterministic synthetic parameters (PyTorch-style uniform init)."""
    H = HIDDEN
    bound = 1.0 / jnp.sqrt(jnp.float32(H))
    ks = jax.random.split(key, 10)
    u = lambda k, shape: jax.random.uniform(k, shape, jnp.float32, -bound, bound)
    # Weights stored transposed: (in_dim, 4H); combined bias = b_ih + b_hh.
    wih0 = u(ks[0], (input_size, 4 * H))
    whh0 = u(ks[1], (H, 4 * H))
    b0 = u(ks[2], (1, 4 * H)) + u(ks[3], (1, 4 * H))
    wih1 = u(ks[4], (H, 4 * H))
    whh1 = u(ks[5], (H, 4 * H))
    b1 = u(ks[6], (1, 4 * H)) + u(ks[7], (1, 4 * H))
    wfc = u(ks[8], (H, 1))
    bfc = u(ks[9], (1, 1))
    return (wih0, whh0, b0, wih1, whh1, b1, wfc, bfc)


def reference_forward(x_btd, params):
    """Pure-JAX reference with the same bf16-operand / f32-accumulate math."""
    H = HIDDEN
    (wih0, whh0, b0, wih1, whh1, b1, wfc, bfc) = params
    B, T, D = x_btd.shape

    def bdot(a, b):
        return jnp.dot(a.astype(jnp.bfloat16), b.astype(jnp.bfloat16),
                       preferred_element_type=jnp.float32)

    def cell(x_in, h_prev, c_prev, wih, whh, b):
        g = bdot(x_in, wih) + bdot(h_prev, whh) + b
        i = jax.nn.sigmoid(g[:, 0:H])
        f = jax.nn.sigmoid(g[:, H:2 * H])
        gg = jnp.tanh(g[:, 2 * H:3 * H])
        o = jax.nn.sigmoid(g[:, 3 * H:4 * H])
        c_new = f * c_prev + i * gg
        return o * jnp.tanh(c_new), c_new

    def step(carry, x_t):
        h0, c0, h1, c1 = carry
        h0, c0 = cell(x_t, h0, c0, wih0, whh0, b0)
        h1, c1 = cell(h0, h1, c1, wih1, whh1, b1)
        return (h0, c0, h1, c1), None

    init = tuple(jnp.zeros((B, H), jnp.float32) for _ in range(4))
    (h0, c0, h1, c1), _ = lax.scan(step, init, jnp.transpose(x_btd, (1, 0, 2)))
    return h1 @ wfc + bfc


if __name__ == "__main__":
    key = jax.random.PRNGKey(0)
    k_x, k_p = jax.random.split(key)

    B, T, D = 4, 8, 16   # batch=4, seq=8, input_size=16
    x = jax.random.normal(k_x, (B, T, D), dtype=jnp.float32)
    params = init_params(k_p, D)

    out = lstm_covid_forward(x, params)
    out = jax.block_until_ready(out)

    ref = reference_forward(x, params)
    assert out.shape == (B, 1), out.shape
    assert jnp.allclose(out, ref, atol=1e-3, rtol=1e-3), (out, ref)

    print("KERNEL_OK")
</pallas_src>

<mosaic_0001>
module attributes {stable_mosaic.version = 11 : i64} {
  func.func @_lstm_kernel(%arg0: i32, %arg1: memref<8x8x128xf32, #tpu.memory_space<vmem>>, %arg2: memref<128x512xbf16, #tpu.memory_space<vmem>>, %arg3: memref<128x512xbf16, #tpu.memory_space<vmem>>, %arg4: memref<1x512xf32, #tpu.memory_space<vmem>>, %arg5: memref<128x512xbf16, #tpu.memory_space<vmem>>, %arg6: memref<128x512xbf16, #tpu.memory_space<vmem>>, %arg7: memref<1x512xf32, #tpu.memory_space<vmem>>, %arg8: memref<8x128xf32, #tpu.memory_space<vmem>>, %arg9: memref<64x512xf32, #tpu.memory_space<vmem>>) attributes {dimension_semantics = [#tpu.dimension_semantics<parallel>], iteration_bounds = array<i64: 1>, scalar_prefetch = 0 : i64, scratch_operands = 1 : i64, tpu.core_type = #tpu.core_type<tc>, window_params = [{transform_indices = @transform_0, window_bounds = array<i64: 8, 8, 128>}, {pipeline_mode = #tpu.pipeline_mode<synchronous>, transform_indices = @transform_1, window_bounds = array<i64: 128, 512>}, {pipeline_mode = #tpu.pipeline_mode<synchronous>, transform_indices = @transform_2, window_bounds = array<i64: 128, 512>}, {pipeline_mode = #tpu.pipeline_mode<synchronous>, transform_indices = @transform_3, window_bounds = array<i64: 1, 512>}, {pipeline_mode = #tpu.pipeline_mode<synchronous>, transform_indices = @transform_4, window_bounds = array<i64: 128, 512>}, {pipeline_mode = #tpu.pipeline_mode<synchronous>, transform_indices = @transform_5, window_bounds = array<i64: 128, 512>}, {pipeline_mode = #tpu.pipeline_mode<synchronous>, transform_indices = @transform_6, window_bounds = array<i64: 1, 512>}, {transform_indices = @transform_7, window_bounds = array<i64: 8, 128>}]} {
    %c0 = arith.constant 0 : index
    %c0_0 = arith.constant 0 : index
    %c0_1 = arith.constant 0 : index
    %0 = vector.load %arg1[%c0, %c0_0, %c0_1] : memref<8x8x128xf32, #tpu.memory_space<vmem>>, vector<8x8x128xf32>
    %1 = vector.shape_cast %0 : vector<8x8x128xf32> to vector<64x128xf32>
    %2 = arith.truncf %1 : vector<64x128xf32> to vector<64x128xbf16>
    %c0_2 = arith.constant 0 : index
    %c0_3 = arith.constant 0 : index
    %3 = vector.load %arg2[%c0_2, %c0_3] : memref<128x512xbf16, #tpu.memory_space<vmem>>, vector<128x512xbf16>
    %cst = arith.constant dense<0.000000e+00> : vector<64x512xf32>
    %4 = tpu.matmul %2, %3, %cst {dimension_numbers = #tpu.dot_dimension_numbers<[1], [0], [0], [1], [0, 0, 1, 1], [], []>} : vector<64x128xbf16>, vector<128x512xbf16>, vector<64x512xf32> -> vector<64x512xf32>
    %c0_4 = arith.constant 0 : index
    %c0_5 = arith.constant 0 : index
    %5 = vector.load %arg4[%c0_4, %c0_5] : memref<1x512xf32, #tpu.memory_space<vmem>>, vector<1x512xf32>
    %6 = vector.shape_cast %5 : vector<1x512xf32> to vector<1x512xf32>
    %7 = vector.broadcast %6 : vector<1x512xf32> to vector<64x512xf32>
    %8 = arith.addf %4, %7 : vector<64x512xf32>
    %c0_6 = arith.constant 0 : index
    %c0_7 = arith.constant 0 : index
    %9 = vector.load %arg9[%c0_6, %c0_7] : memref<64x512xf32, #tpu.memory_space<vmem>>, vector<64x512xf32>
    tpu.vector_store %arg9[%c0_6, %c0_7], %8 {strides = array<i32>} : memref<64x512xf32, #tpu.memory_space<vmem>>, vector<64x512xf32>,
    %c0_8 = arith.constant 0 : index
    %c0_9 = arith.constant 0 : index
    %10 = vector.load %arg7[%c0_8, %c0_9] : memref<1x512xf32, #tpu.memory_space<vmem>>, vector<1x512xf32>
    %11 = vector.shape_cast %10 : vector<1x512xf32> to vector<1x512xf32>
    %12 = vector.broadcast %11 : vector<1x512xf32> to vector<8x512xf32>
    %cst_10 = arith.constant 0.000000e+00 : f32
    %13 = vector.broadcast %cst_10 : f32 to vector<8x128xf32>
    %c0_i32 = arith.constant 0 : i32
    %c8_i32 = arith.constant 8 : i32
    %14 = arith.muli %c0_i32, %c8_i32 : i32
    %15 = tpu.assume_multiple %14, 8 : i32
    %16 = arith.index_cast %15 : i32 to index
    %c0_11 = arith.constant 0 : index
    %17 = vector.load %arg9[%16, %c0_11] : memref<64x512xf32, #tpu.memory_space<vmem>>, vector<8x512xf32>
    %18 = arith.truncf %13 : vector<8x128xf32> to vector<8x128xbf16>
    %c0_12 = arith.constant 0 : index
    %c0_13 = arith.constant 0 : index
    %19 = vector.load %arg3[%c0_12, %c0_13] : memref<128x512xbf16, #tpu.memory_space<vmem>>, vector<128x512xbf16>
    %cst_14 = arith.constant dense<0.000000e+00> : vector<8x512xf32>
    %20 = tpu.matmul %18, %19, %cst_14 {dimension_numbers = #tpu.dot_dimension_numbers<[1], [0], [0], [1], [0, 0, 1, 1], [], []>} : vector<8x128xbf16>, vector<128x512xbf16>, vector<8x512xf32> -> vector<8x512xf32>
    %21 = arith.addf %17, %20 : vector<8x512xf32>
    %22 = vector.extract_strided_slice %21 {offsets = [0, 0], sizes = [8, 256], strides = [1, 1]} : vector<8x512xf32> to vector<8x256xf32>
    %23 = arith.negf %22 : vector<8x256xf32>
    %24 = math.exp %23 : vector<8x256xf32>
    %cst_15 = arith.constant 1.000000e+00 : f32
    %25 = vector.broadcast %cst_15 : f32 to vector<8x256xf32>
    %26 = arith.addf %25, %24 : vector<8x256xf32>
    %27 = arith.divf %25, %26 : vector<8x256xf32>
    %28 = vector.extract_strided_slice %27 {offsets = [0, 0], sizes = [8, 128], strides = [1, 1]} : vector<8x256xf32> to vector<8x128xf32>
    %29 = vector.extract_strided_slice %27 {offsets = [0, 128], sizes = [8, 128], strides = [1, 1]} : vector<8x256xf32> to vector<8x128xf32>
    %30 = vector.extract_strided_slice %21 {offsets = [0, 256], sizes = [8, 128], strides = [1, 1]} : vector<8x512xf32> to vector<8x128xf32>
    %31 = math.tanh %30 : vector<8x128xf32>
    %32 = vector.extract_strided_slice %21 {offsets = [0, 384], sizes = [8, 128], strides = [1, 1]} : vector<8x512xf32> to vector<8x128xf32>
    %33 = arith.negf %32 : vector<8x128xf32>
    %34 = math.exp %33 : vector<8x128xf32>
    %cst_16 = arith.constant 1.000000e+00 : f32
    %35 = vector.broadcast %cst_16 : f32 to vector<8x128xf32>
    %36 = arith.addf %35, %34 : vector<8x128xf32>
    %37 = arith.divf %35, %36 : vector<8x128xf32>
    %38 = arith.mulf %29, %13 : vector<8x128xf32>
    %39 = arith.mulf %28, %31 : vector<8x128xf32>
    %40 = arith.addf %38, %39 : vector<8x128xf32>
    %41 = math.tanh %40 : vector<8x128xf32>
    %42 = arith.mulf %37, %41 : vector<8x128xf32>
    %43 = arith.truncf %42 : vector<8x128xf32> to vector<8x128xbf16>
    %c0_17 = arith.constant 0 : index
    %c0_18 = arith.constant 0 : index
    %44 = vector.load %arg5[%c0_17, %c0_18] : memref<128x512xbf16, #tpu.memory_space<vmem>>, vector<128x512xbf16>
    %cst_19 = arith.constant dense<0.000000e+00> : vector<8x512xf32>
    %45 = tpu.matmul %43, %44, %cst_19 {dimension_numbers = #tpu.dot_dimension_numbers<[1], [0], [0], [1], [0, 0, 1, 1], [], []>} : vector<8x128xbf16>, vector<128x512xbf16>, vector<8x512xf32> -> vector<8x512xf32>
    %46 = arith.truncf %13 : vector<8x128xf32> to vector<8x128xbf16>
    %c0_20 = arith.constant 0 : index
    %c0_21 = arith.constant 0 : index
    %47 = vector.load %arg6[%c0_20, %c0_21] : memref<128x512xbf16, #tpu.memory_space<vmem>>, vector<128x512xbf16>
    %cst_22 = arith.constant dense<0.000000e+00> : vector<8x512xf32>
    %48 = tpu.matmul %46, %47, %cst_22 {dimension_numbers = #tpu.dot_dimension_numbers<[1], [0], [0], [1], [0, 0, 1, 1], [], []>} : vector<8x128xbf16>, vector<128x512xbf16>, vector<8x512xf32> -> vector<8x512xf32>
    %49 = arith.addf %45, %48 : vector<8x512xf32>
    %50 = arith.addf %49, %12 : vector<8x512xf32>
    %51 = vector.extract_strided_slice %50 {offsets = [0, 0], sizes = [8, 256], strides = [1, 1]} : vector<8x512xf32> to vector<8x256xf32>
    %52 = arith.negf %51 : vector<8x256xf32>
    %53 = math.exp %52 : vector<8x256xf32>
    %cst_23 = arith.constant 1.000000e+00 : f32
    %54 = vector.broadcast %cst_23 : f32 to vector<8x256xf32>
    %55 = arith.addf %54, %53 : vector<8x256xf32>
    %56 = arith.divf %54, %55 : vector<8x256xf32>
    %57 = vector.extract_strided_slice %56 {offsets = [0, 0], sizes = [8, 128], strides = [1, 1]} : vector<8x256xf32> to vector<8x128xf32>
    %58 = vector.extract_strided_slice %56 {offsets = [0, 128], sizes = [8, 128], strides = [1, 1]} : vector<8x256xf32> to vector<8x128xf32>
    %59 = vector.extract_strided_slice %50 {offsets = [0, 256], sizes = [8, 128], strides = [1, 1]} : vector<8x512xf32> to vector<8x128xf32>
    %60 = math.tanh %59 : vector<8x128xf32>
    %61 = vector.extract_strided_slice %50 {offsets = [0, 384], sizes = [8, 128], strides = [1, 1]} : vector<8x512xf32> to vector<8x128xf32>
    %62 = arith.negf %61 : vector<8x128xf32>
    %63 = math.exp %62 : vector<8x128xf32>
    %cst_24 = arith.constant 1.000000e+00 : f32
    %64 = vector.broadcast %cst_24 : f32 to vector<8x128xf32>
    %65 = arith.addf %64, %63 : vector<8x128xf32>
    %66 = arith.divf %64, %65 : vector<8x128xf32>
    %67 = arith.mulf %58, %13 : vector<8x128xf32>
    %68 = arith.mulf %57, %60 : vector<8x128xf32>
    %69 = arith.addf %67, %68 : vector<8x128xf32>
    %70 = math.tanh %69 : vector<8x128xf32>
    %71 = arith.mulf %66, %70 : vector<8x128xf32>
    %c1_i32 = arith.constant 1 : i32
    %c8_i32_25 = arith.constant 8 : i32
    %72 = arith.muli %c1_i32, %c8_i32_25 : i32
    %73 = tpu.assume_multiple %72, 8 : i32
    %74 = arith.index_cast %73 : i32 to index
    %c0_26 = arith.constant 0 : index
    %75 = vector.load %arg9[%74, %c0_26] : memref<64x512xf32, #tpu.memory_space<vmem>>, vector<8x512xf32>
    %76 = arith.truncf %42 : vector<8x128xf32> to vector<8x128xbf16>
    %c0_27 = arith.constant 0 : index
    %c0_28 = arith.constant 0 : index
    %77 = vector.load %arg3[%c0_27, %c0_28] : memref<128x512xbf16, #tpu.memory_space<vmem>>, vector<128x512xbf16>
    %cst_29 = arith.constant dense<0.000000e+00> : vector<8x512xf32>
    %78 = tpu.matmul %76, %77, %cst_29 {dimension_numbers = #tpu.dot_dimension_numbers<[1], [0], [0], [1], [0, 0, 1, 1], [], []>} : vector<8x128xbf16>, vector<128x512xbf16>, vector<8x512xf32> -> vector<8x512xf32>
    %79 = arith.addf %75, %78 : vector<8x512xf32>
    %80 = vector.extract_strided_slice %79 {offsets = [0, 0], sizes = [8, 256], strides = [1, 1]} : vector<8x512xf32> to vector<8x256xf32>
    %81 = arith.negf %80 : vector<8x256xf32>
    %82 = math.exp %81 : vector<8x256xf32>
    %cst_30 = arith.constant 1.000000e+00 : f32
    %83 = vector.broadcast %cst_30 : f32 to vector<8x256xf32>
    %84 = arith.addf %83, %82 : vector<8x256xf32>
    %85 = arith.divf %83, %84 : vector<8x256xf32>
    %86 = vector.extract_strided_slice %85 {offsets = [0, 0], sizes = [8, 128], strides = [1, 1]} : vector<8x256xf32> to vector<8x128xf32>
    %87 = vector.extract_strided_slice %85 {offsets = [0, 128], sizes = [8, 128], strides = [1, 1]} : vector<8x256xf32> to vector<8x128xf32>
    %88 = vector.extract_strided_slice %79 {offsets = [0, 256], sizes = [8, 128], strides = [1, 1]} : vector<8x512xf32> to vector<8x128xf32>
    %89 = math.tanh %88 : vector<8x128xf32>
    %90 = vector.extract_strided_slice %79 {offsets = [0, 384], sizes = [8, 128], strides = [1, 1]} : vector<8x512xf32> to vector<8x128xf32>
    %91 = arith.negf %90 : vector<8x128xf32>
    %92 = math.exp %91 : vector<8x128xf32>
    %cst_31 = arith.constant 1.000000e+00 : f32
    %93 = vector.broadcast %cst_31 : f32 to vector<8x128xf32>
    %94 = arith.addf %93, %92 : vector<8x128xf32>
    %95 = arith.divf %93, %94 : vector<8x128xf32>
    %96 = arith.mulf %87, %40 : vector<8x128xf32>
    %97 = arith.mulf %86, %89 : vector<8x128xf32>
    %98 = arith.addf %96, %97 : vector<8x128xf32>
    %99 = math.tanh %98 : vector<8x128xf32>
    %100 = arith.mulf %95, %99 : vector<8x128xf32>
    %101 = arith.truncf %100 : vector<8x128xf32> to vector<8x128xbf16>
    %c0_32 = arith.constant 0 : index
    %c0_33 = arith.constant 0 : index
    %102 = vector.load %arg5[%c0_32, %c0_33] : memref<128x512xbf16, #tpu.memory_space<vmem>>, vector<128x512xbf16>
    %cst_34 = arith.constant dense<0.000000e+00> : vector<8x512xf32>
    %103 = tpu.matmul %101, %102, %cst_34 {dimension_numbers = #tpu.dot_dimension_numbers<[1], [0], [0], [1], [0, 0, 1, 1], [], []>} : vector<8x128xbf16>, vector<128x512xbf16>, vector<8x512xf32> -> vector<8x512xf32>
    %104 = arith.truncf %71 : vector<8x128xf32> to vector<8x128xbf16>
    %c0_35 = arith.constant 0 : index
    %c0_36 = arith.constant 0 : index
    %105 = vector.load %arg6[%c0_35, %c0_36] : memref<128x512xbf16, #tpu.memory_space<vmem>>, vector<128x512xbf16>
    %cst_37 = arith.constant dense<0.000000e+00> : vector<8x512xf32>
    %106 = tpu.matmul %104, %105, %cst_37 {dimension_numbers = #tpu.dot_dimension_numbers<[1], [0], [0], [1], [0, 0, 1, 1], [], []>} : vector<8x128xbf16>, vector<128x512xbf16>, vector<8x512xf32> -> vector<8x512xf32>
    %107 = arith.addf %103, %106 : vector<8x512xf32>
    %108 = arith.addf %107, %12 : vector<8x512xf32>
    %109 = vector.extract_strided_slice %108 {offsets = [0, 0], sizes = [8, 256], strides = [1, 1]} : vector<8x512xf32> to vector<8x256xf32>
    %110 = arith.negf %109 : vector<8x256xf32>
    %111 = math.exp %110 : vector<8x256xf32>
    %cst_38 = arith.constant 1.000000e+00 : f32
    %112 = vector.broadcast %cst_38 : f32 to vector<8x256xf32>
    %113 = arith.addf %112, %111 : vector<8x256xf32>
    %114 = arith.divf %112, %113 : vector<8x256xf32>
    %115 = vector.extract_strided_slice %114 {offsets = [0, 0], sizes = [8, 128], strides = [1, 1]} : vector<8x256xf32> to vector<8x128xf32>
    %116 = vector.extract_strided_slice %114 {offsets = [0, 128], sizes = [8, 128], strides = [1, 1]} : vector<8x256xf32> to vector<8x128xf32>
    %117 = vector.extract_strided_slice %108 {offsets = [0, 256], sizes = [8, 128], strides = [1, 1]} : vector<8x512xf32> to vector<8x128xf32>
    %118 = math.tanh %117 : vector<8x128xf32>
    %119 = vector.extract_strided_slice %108 {offsets = [0, 384], sizes = [8, 128], strides = [1, 1]} : vector<8x512xf32> to vector<8x128xf32>
    %120 = arith.negf %119 : vector<8x128xf32>
    %121 = math.exp %120 : vector<8x128xf32>
    %cst_39 = arith.constant 1.000000e+00 : f32
    %122 = vector.broadcast %cst_39 : f32 to vector<8x128xf32>
    %123 = arith.addf %122, %121 : vector<8x128xf32>
    %124 = arith.divf %122, %123 : vector<8x128xf32>
    %125 = arith.mulf %116, %69 : vector<8x128xf32>
    %126 = arith.mulf %115, %118 : vector<8x128xf32>
    %127 = arith.addf %125, %126 : vector<8x128xf32>
    %128 = math.tanh %127 : vector<8x128xf32>
    %129 = arith.mulf %124, %128 : vector<8x128xf32>
    %c2_i32 = arith.constant 2 : i32
    %c8_i32_40 = arith.constant 8 : i32
    %130 = arith.muli %c2_i32, %c8_i32_40 : i32
    %131 = tpu.assume_multiple %130, 8 : i32
    %132 = arith.index_cast %131 : i32 to index
    %c0_41 = arith.constant 0 : index
    %133 = vector.load %arg9[%132, %c0_41] : memref<64x512xf32, #tpu.memory_space<vmem>>, vector<8x512xf32>
    %134 = arith.truncf %100 : vector<8x128xf32> to vector<8x128xbf16>
    %c0_42 = arith.constant 0 : index
    %c0_43 = arith.constant 0 : index
    %135 = vector.load %arg3[%c0_42, %c0_43] : memref<128x512xbf16, #tpu.memory_space<vmem>>, vector<128x512xbf16>
    %cst_44 = arith.constant dense<0.000000e+00> : vector<8x512xf32>
    %136 = tpu.matmul %134, %135, %cst_44 {dimension_numbers = #tpu.dot_dimension_numbers<[1], [0], [0], [1], [0, 0, 1, 1], [], []>} : vector<8x128xbf16>, vector<128x512xbf16>, vector<8x512xf32> -> vector<8x512xf32>
    %137 = arith.addf %133, %136 : vector<8x512xf32>
    %138 = vector.extract_strided_slice %137 {offsets = [0, 0], sizes = [8, 256], strides = [1, 1]} : vector<8x512xf32> to vector<8x256xf32>
    %139 = arith.negf %138 : vector<8x256xf32>
    %140 = math.exp %139 : vector<8x256xf32>
    %cst_45 = arith.constant 1.000000e+00 : f32
    %141 = vector.broadcast %cst_45 : f32 to vector<8x256xf32>
    %142 = arith.addf %141, %140 : vector<8x256xf32>
    %143 = arith.divf %141, %142 : vector<8x256xf32>
    %144 = vector.extract_strided_slice %143 {offsets = [0, 0], sizes = [8, 128], strides = [1, 1]} : vector<8x256xf32> to vector<8x128xf32>
    %145 = vector.extract_strided_slice %143 {offsets = [0, 128], sizes = [8, 128], strides = [1, 1]} : vector<8x256xf32> to vector<8x128xf32>
    %146 = vector.extract_strided_slice %137 {offsets = [0, 256], sizes = [8, 128], strides = [1, 1]} : vector<8x512xf32> to vector<8x128xf32>
    %147 = math.tanh %146 : vector<8x128xf32>
    %148 = vector.extract_strided_slice %137 {offsets = [0, 384], sizes = [8, 128], strides = [1, 1]} : vector<8x512xf32> to vector<8x128xf32>
    %149 = arith.negf %148 : vector<8x128xf32>
    %150 = math.exp %149 : vector<8x128xf32>
    %cst_46 = arith.constant 1.000000e+00 : f32
    %151 = vector.broadcast %cst_46 : f32 to vector<8x128xf32>
    %152 = arith.addf %151, %150 : vector<8x128xf32>
    %153 = arith.divf %151, %152 : vector<8x128xf32>
    %154 = arith.mulf %145, %98 : vector<8x128xf32>
    %155 = arith.mulf %144, %147 : vector<8x128xf32>
    %156 = arith.addf %154, %155 : vector<8x128xf32>
    %157 = math.tanh %156 : vector<8x128xf32>
    %158 = arith.mulf %153, %157 : vector<8x128xf32>
    %159 = arith.truncf %158 : vector<8x128xf32> to vector<8x128xbf16>
    %c0_47 = arith.constant 0 : index
    %c0_48 = arith.constant 0 : index
    %160 = vector.load %arg5[%c0_47, %c0_48] : memref<128x512xbf16, #tpu.memory_space<vmem>>, vector<128x512xbf16>
    %cst_49 = arith.constant dense<0.000000e+00> : vector<8x512xf32>
    %161 = tpu.matmul %159, %160, %cst_49 {dimension_numbers = #tpu.dot_dimension_numbers<[1], [0], [0], [1], [0, 0, 1, 1], [], []>} : vector<8x128xbf16>, vector<128x512xbf16>, vector<8x512xf32> -> vector<8x512xf32>
    %162 = arith.truncf %129 : vector<8x128xf32> to vector<8x128xbf16>
    %c0_50 = arith.constant 0 : index
    %c0_51 = arith.constant 0 : index
    %163 = vector.load %arg6[%c0_50, %c0_51] : memref<128x512xbf16, #tpu.memory_space<vmem>>, vector<128x512xbf16>
    %cst_52 = arith.constant dense<0.000000e+00> : vector<8x512xf32>
    %164 = tpu.matmul %162, %163, %cst_52 {dimension_numbers = #tpu.dot_dimension_numbers<[1], [0], [0], [1], [0, 0, 1, 1], [], []>} : vector<8x128xbf16>, vector<128x512xbf16>, vector<8x512xf32> -> vector<8x512xf32>
    %165 = arith.addf %161, %164 : vector<8x512xf32>
    %166 = arith.addf %165, %12 : vector<8x512xf32>
    %167 = vector.extract_strided_slice %166 {offsets = [0, 0], sizes = [8, 256], strides = [1, 1]} : vector<8x512xf32> to vector<8x256xf32>
    %168 = arith.negf %167 : vector<8x256xf32>
    %169 = math.exp %168 : vector<8x256xf32>
    %cst_53 = arith.constant 1.000000e+00 : f32
    %170 = vector.broadcast %cst_53 : f32 to vector<8x256xf32>
    %171 = arith.addf %170, %169 : vector<8x256xf32>
    %172 = arith.divf %170, %171 : vector<8x256xf32>
    %173 = vector.extract_strided_slice %172 {offsets = [0, 0], sizes = [8, 128], strides = [1, 1]} : vector<8x256xf32> to vector<8x128xf32>
    %174 = vector.extract_strided_slice %172 {offsets = [0, 128], sizes = [8, 128], strides = [1, 1]} : vector<8x256xf32> to vector<8x128xf32>
    %175 = vector.extract_strided_slice %166 {offsets = [0, 256], sizes = [8, 128], strides = [1, 1]} : vector<8x512xf32> to vector<8x128xf32>
    %176 = math.tanh %175 : vector<8x128xf32>
    %177 = vector.extract_strided_slice %166 {offsets = [0, 384], sizes = [8, 128], strides = [1, 1]} : vector<8x512xf32> to vector<8x128xf32>
    %178 = arith.negf %177 : vector<8x128xf32>
    %179 = math.exp %178 : vector<8x128xf32>
    %cst_54 = arith.constant 1.000000e+00 : f32
    %180 = vector.broadcast %cst_54 : f32 to vector<8x128xf32>
    %181 = arith.addf %180, %179 : vector<8x128xf32>
    %182 = arith.divf %180, %181 : vector<8x128xf32>
    %183 = arith.mulf %174, %127 : vector<8x128xf32>
    %184 = arith.mulf %173, %176 : vector<8x128xf32>
    %185 = arith.addf %183, %184 : vector<8x128xf32>
    %186 = math.tanh %185 : vector<8x128xf32>
    %187 = arith.mulf %182, %186 : vector<8x128xf32>
    %c3_i32 = arith.constant 3 : i32
    %c8_i32_55 = arith.constant 8 : i32
    %188 = arith.muli %c3_i32, %c8_i32_55 : i32
    %189 = tpu.assume_multiple %188, 8 : i32
    %190 = arith.index_cast %189 : i32 to index
    %c0_56 = arith.constant 0 : index
    %191 = vector.load %arg9[%190, %c0_56] : memref<64x512xf32, #tpu.memory_space<vmem>>, vector<8x512xf32>
    %192 = arith.truncf %158 : vector<8x128xf32> to vector<8x128xbf16>
    %c0_57 = arith.constant 0 : index
    %c0_58 = arith.constant 0 : index
    %193 = vector.load %arg3[%c0_57, %c0_58] : memref<128x512xbf16, #tpu.memory_space<vmem>>, vector<128x512xbf16>
    %cst_59 = arith.constant dense<0.000000e+00> : vector<8x512xf32>
    %194 = tpu.matmul %192, %193, %cst_59 {dimension_numbers = #tpu.dot_dimension_numbers<[1], [0], [0], [1], [0, 0, 1, 1], [], []>} : vector<8x128xbf16>, vector<128x512xbf16>, vector<8x512xf32> -> vector<8x512xf32>
    %195 = arith.addf %191, %194 : vector<8x512xf32>
    %196 = vector.extract_strided_slice %195 {offsets = [0, 0], sizes = [8, 256], strides = [1, 1]} : vector<8x512xf32> to vector<8x256xf32>
    %197 = arith.negf %196 : vector<8x256xf32>
    %198 = math.exp %197 : vector<8x256xf32>
    %cst_60 = arith.constant 1.000000e+00 : f32
    %199 = vector.broadcast %cst_60 : f32 to vector<8x256xf32>
    %200 = arith.addf %199, %198 : vector<8x256xf32>
    %201 = arith.divf %199, %200 : vector<8x256xf32>
    %202 = vector.extract_strided_slice %201 {offsets = [0, 0], sizes = [8, 128], strides = [1, 1]} : vector<8x256xf32> to vector<8x128xf32>
    %203 = vector.extract_strided_slice %201 {offsets = [0, 128], sizes = [8, 128], strides = [1, 1]} : vector<8x256xf32> to vector<8x128xf32>
    %204 = vector.extract_strided_slice %195 {offsets = [0, 256], sizes = [8, 128], strides = [1, 1]} : vector<8x512xf32> to vector<8x128xf32>
    %205 = math.tanh %204 : vector<8x128xf32>
    %206 = vector.extract_strided_slice %195 {offsets = [0, 384], sizes = [8, 128], strides = [1, 1]} : vector<8x512xf32> to vector<8x128xf32>
    %207 = arith.negf %206 : vector<8x128xf32>
    %208 = math.exp %207 : vector<8x128xf32>
    %cst_61 = arith.constant 1.000000e+00 : f32
    %209 = vector.broadcast %cst_61 : f32 to vector<8x128xf32>
    %210 = arith.addf %209, %208 : vector<8x128xf32>
    %211 = arith.divf %209, %210 : vector<8x128xf32>
    %212 = arith.mulf %203, %156 : vector<8x128xf32>
    %213 = arith.mulf %202, %205 : vector<8x128xf32>
    %214 = arith.addf %212, %213 : vector<8x128xf32>
    %215 = math.tanh %214 : vector<8x128xf32>
    %216 = arith.mulf %211, %215 : vector<8x128xf32>
    %217 = arith.truncf %216 : vector<8x128xf32> to vector<8x128xbf16>
    %c0_62 = arith.constant 0 : index
    %c0_63 = arith.constant 0 : index
    %218 = vector.load %arg5[%c0_62, %c0_63] : memref<128x512xbf16, #tpu.memory_space<vmem>>, vector<128x512xbf16>
    %cst_64 = arith.constant dense<0.000000e+00> : vector<8x512xf32>
    %219 = tpu.matmul %217, %218, %cst_64 {dimension_numbers = #tpu.dot_dimension_numbers<[1], [0], [0], [1], [0, 0, 1, 1], [], []>} : vector<8x128xbf16>, vector<128x512xbf16>, vector<8x512xf32> -> vector<8x512xf32>
    %220 = arith.truncf %187 : vector<8x128xf32> to vector<8x128xbf16>
    %c0_65 = arith.constant 0 : index
    %c0_66 = arith.constant 0 : index
    %221 = vector.load %arg6[%c0_65, %c0_66] : memref<128x512xbf16, #tpu.memory_space<vmem>>, vector<128x512xbf16>
    %cst_67 = arith.constant dense<0.000000e+00> : vector<8x512xf32>
    %222 = tpu.matmul %220, %221, %cst_67 {dimension_numbers = #tpu.dot_dimension_numbers<[1], [0], [0], [1], [0, 0, 1, 1], [], []>} : vector<8x128xbf16>, vector<128x512xbf16>, vector<8x512xf32> -> vector<8x512xf32>
    %223 = arith.addf %219, %222 : vector<8x512xf32>
    %224 = arith.addf %223, %12 : vector<8x512xf32>
    %225 = vector.extract_strided_slice %224 {offsets = [0, 0], sizes = [8, 256], strides = [1, 1]} : vector<8x512xf32> to vector<8x256xf32>
    %226 = arith.negf %225 : vector<8x256xf32>
    %227 = math.exp %226 : vector<8x256xf32>
    %cst_68 = arith.constant 1.000000e+00 : f32
    %228 = vector.broadcast %cst_68 : f32 to vector<8x256xf32>
    %229 = arith.addf %228, %227 : vector<8x256xf32>
    %230 = arith.divf %228, %229 : vector<8x256xf32>
    %231 = vector.extract_strided_slice %230 {offsets = [0, 0], sizes = [8, 128], strides = [1, 1]} : vector<8x256xf32> to vector<8x128xf32>
    %232 = vector.extract_strided_slice %230 {offsets = [0, 128], sizes = [8, 128], strides = [1, 1]} : vector<8x256xf32> to vector<8x128xf32>
    %233 = vector.extract_strided_slice %224 {offsets = [0, 256], sizes = [8, 128], strides = [1, 1]} : vector<8x512xf32> to vector<8x128xf32>
    %234 = math.tanh %233 : vector<8x128xf32>
    %235 = vector.extract_strided_slice %224 {offsets = [0, 384], sizes = [8, 128], strides = [1, 1]} : vector<8x512xf32> to vector<8x128xf32>
    %236 = arith.negf %235 : vector<8x128xf32>
    %237 = math.exp %236 : vector<8x128xf32>
    %cst_69 = arith.constant 1.000000e+00 : f32
    %238 = vector.broadcast %cst_69 : f32 to vector<8x128xf32>
    %239 = arith.addf %238, %237 : vector<8x128xf32>
    %240 = arith.divf %238, %239 : vector<8x128xf32>
    %241 = arith.mulf %232, %185 : vector<8x128xf32>
    %242 = arith.mulf %231, %234 : vector<8x128xf32>
    %243 = arith.addf %241, %242 : vector<8x128xf32>
    %244 = math.tanh %243 : vector<8x128xf32>
    %245 = arith.mulf %240, %244 : vector<8x128xf32>
    %c4_i32 = arith.constant 4 : i32
    %c8_i32_70 = arith.constant 8 : i32
    %246 = arith.muli %c4_i32, %c8_i32_70 : i32
    %247 = tpu.assume_multiple %246, 8 : i32
    %248 = arith.index_cast %247 : i32 to index
    %c0_71 = arith.constant 0 : index
    %249 = vector.load %arg9[%248, %c0_71] : memref<64x512xf32, #tpu.memory_space<vmem>>, vector<8x512xf32>
    %250 = arith.truncf %216 : vector<8x128xf32> to vector<8x128xbf16>
    %c0_72 = arith.constant 0 : index
    %c0_73 = arith.constant 0 : index
    %251 = vector.load %arg3[%c0_72, %c0_73] : memref<128x512xbf16, #tpu.memory_space<vmem>>, vector<128x512xbf16>
    %cst_74 = arith.constant dense<0.000000e+00> : vector<8x512xf32>
    %252 = tpu.matmul %250, %251, %cst_74 {dimension_numbers = #tpu.dot_dimension_numbers<[1], [0], [0], [1], [0, 0, 1, 1], [], []>} : vector<8x128xbf16>, vector<128x512xbf16>, vector<8x512xf32> -> vector<8x512xf32>
    %253 = arith.addf %249, %252 : vector<8x512xf32>
    %254 = vector.extract_strided_slice %253 {offsets = [0, 0], sizes = [8, 256], strides = [1, 1]} : vector<8x512xf32> to vector<8x256xf32>
    %255 = arith.negf %254 : vector<8x256xf32>
    %256 = math.exp %255 : vector<8x256xf32>
    %cst_75 = arith.constant 1.000000e+00 : f32
    %257 = vector.broadcast %cst_75 : f32 to vector<8x256xf32>
    %258 = arith.addf %257, %256 : vector<8x256xf32>
    %259 = arith.divf %257, %258 : vector<8x256xf32>
    %260 = vector.extract_strided_slice %259 {offsets = [0, 0], sizes = [8, 128], strides = [1, 1]} : vector<8x256xf32> to vector<8x128xf32>
    %261 = vector.extract_strided_slice %259 {offsets = [0, 128], sizes = [8, 128], strides = [1, 1]} : vector<8x256xf32> to vector<8x128xf32>
    %262 = vector.extract_strided_slice %253 {offsets = [0, 256], sizes = [8, 128], strides = [1, 1]} : vector<8x512xf32> to vector<8x128xf32>
    %263 = math.tanh %262 : vector<8x128xf32>
    %264 = vector.extract_strided_slice %253 {offsets = [0, 384], sizes = [8, 128], strides = [1, 1]} : vector<8x512xf32> to vector<8x128xf32>
    %265 = arith.negf %264 : vector<8x128xf32>
    %266 = math.exp %265 : vector<8x128xf32>
    %cst_76 = arith.constant 1.000000e+00 : f32
    %267 = vector.broadcast %cst_76 : f32 to vector<8x128xf32>
    %268 = arith.addf %267, %266 : vector<8x128xf32>
    %269 = arith.divf %267, %268 : vector<8x128xf32>
    %270 = arith.mulf %261, %214 : vector<8x128xf32>
    %271 = arith.mulf %260, %263 : vector<8x128xf32>
    %272 = arith.addf %270, %271 : vector<8x128xf32>
    %273 = math.tanh %272 : vector<8x128xf32>
    %274 = arith.mulf %269, %273 : vector<8x128xf32>
    %275 = arith.truncf %274 : vector<8x128xf32> to vector<8x128xbf16>
    %c0_77 = arith.constant 0 : index
    %c0_78 = arith.constant 0 : index
    %276 = vector.load %arg5[%c0_77, %c0_78] : memref<128x512xbf16, #tpu.memory_space<vmem>>, vector<128x512xbf16>
    %cst_79 = arith.constant dense<0.000000e+00> : vector<8x512xf32>
    %277 = tpu.matmul %275, %276, %cst_79 {dimension_numbers = #tpu.dot_dimension_numbers<[1], [0], [0], [1], [0, 0, 1, 1], [], []>} : vector<8x128xbf16>, vector<128x512xbf16>, vector<8x512xf32> -> vector<8x512xf32>
    %278 = arith.truncf %245 : vector<8x128xf32> to vector<8x128xbf16>
    %c0_80 = arith.constant 0 : index
    %c0_81 = arith.constant 0 : index
    %279 = vector.load %arg6[%c0_80, %c0_81] : memref<128x512xbf16, #tpu.memory_space<vmem>>, vector<128x512xbf16>
    %cst_82 = arith.constant dense<0.000000e+00> : vector<8x512xf32>
    %280 = tpu.matmul %278, %279, %cst_82 {dimension_numbers = #tpu.dot_dimension_numbers<[1], [0], [0], [1], [0, 0, 1, 1], [], []>} : vector<8x128xbf16>, vector<128x512xbf16>, vector<8x512xf32> -> vector<8x512xf32>
    %281 = arith.addf %277, %280 : vector<8x512xf32>
    %282 = arith.addf %281, %12 : vector<8x512xf32>
    %283 = vector.extract_strided_slice %282 {offsets = [0, 0], sizes = [8, 256], strides = [1, 1]} : vector<8x512xf32> to vector<8x256xf32>
    %284 = arith.negf %283 : vector<8x256xf32>
    %285 = math.exp %284 : vector<8x256xf32>
    %cst_83 = arith.constant 1.000000e+00 : f32
    %286 = vector.broadcast %cst_83 : f32 to vector<8x256xf32>
    %287 = arith.addf %286, %285 : vector<8x256xf32>
    %288 = arith.divf %286, %287 : vector<8x256xf32>
    %289 = vector.extract_strided_slice %288 {offsets = [0, 0], sizes = [8, 128], strides = [1, 1]} : vector<8x256xf32> to vector<8x128xf32>
    %290 = vector.extract_strided_slice %288 {offsets = [0, 128], sizes = [8, 128], strides = [1, 1]} : vector<8x256xf32> to vector<8x128xf32>
    %291 = vector.extract_strided_slice %282 {offsets = [0, 256], sizes = [8, 128], strides = [1, 1]} : vector<8x512xf32> to vector<8x128xf32>
    %292 = math.tanh %291 : vector<8x128xf32>
    %293 = vector.extract_strided_slice %282 {offsets = [0, 384], sizes = [8, 128], strides = [1, 1]} : vector<8x512xf32> to vector<8x128xf32>
    %294 = arith.negf %293 : vector<8x128xf32>
    %295 = math.exp %294 : vector<8x128xf32>
    %cst_84 = arith.constant 1.000000e+00 : f32
    %296 = vector.broadcast %cst_84 : f32 to vector<8x128xf32>
    %297 = arith.addf %296, %295 : vector<8x128xf32>
    %298 = arith.divf %296, %297 : vector<8x128xf32>
    %299 = arith.mulf %290, %243 : vector<8x128xf32>
    %300 = arith.mulf %289, %292 : vector<8x128xf32>
    %301 = arith.addf %299, %300 : vector<8x128xf32>
    %302 = math.tanh %301 : vector<8x128xf32>
    %303 = arith.mulf %298, %302 : vector<8x128xf32>
    %c5_i32 = arith.constant 5 : i32
    %c8_i32_85 = arith.constant 8 : i32
    %304 = arith.muli %c5_i32, %c8_i32_85 : i32
    %305 = tpu.assume_multiple %304, 8 : i32
    %306 = arith.index_cast %305 : i32 to index
    %c0_86 = arith.constant 0 : index
    %307 = vector.load %arg9[%306, %c0_86] : memref<64x512xf32, #tpu.memory_space<vmem>>, vector<8x512xf32>
    %308 = arith.truncf %274 : vector<8x128xf32> to vector<8x128xbf16>
    %c0_87 = arith.constant 0 : index
    %c0_88 = arith.constant 0 : index
    %309 = vector.load %arg3[%c0_87, %c0_88] : memref<128x512xbf16, #tpu.memory_space<vmem>>, vector<128x512xbf16>
    %cst_89 = arith.constant dense<0.000000e+00> : vector<8x512xf32>
    %310 = tpu.matmul %308, %309, %cst_89 {dimension_numbers = #tpu.dot_dimension_numbers<[1], [0], [0], [1], [0, 0, 1, 1], [], []>} : vector<8x128xbf16>, vector<128x512xbf16>, vector<8x512xf32> -> vector<8x512xf32>
    %311 = arith.addf %307, %310 : vector<8x512xf32>
    %312 = vector.extract_strided_slice %311 {offsets = [0, 0], sizes = [8, 256], strides = [1, 1]} : vector<8x512xf32> to vector<8x256xf32>
    %313 = arith.negf %312 : vector<8x256xf32>
    %314 = math.exp %313 : vector<8x256xf32>
    %cst_90 = arith.constant 1.000000e+00 : f32
    %315 = vector.broadcast %cst_90 : f32 to vector<8x256xf32>
    %316 = arith.addf %315, %314 : vector<8x256xf32>
    %317 = arith.divf %315, %316 : vector<8x256xf32>
    %318 = vector.extract_strided_slice %317 {offsets = [0, 0], sizes = [8, 128], strides = [1, 1]} : vector<8x256xf32> to vector<8x128xf32>
    %319 = vector.extract_strided_slice %317 {offsets = [0, 128], sizes = [8, 128], strides = [1, 1]} : vector<8x256xf32> to vector<8x128xf32>
    %320 = vector.extract_strided_slice %311 {offsets = [0, 256], sizes = [8, 128], strides = [1, 1]} : vector<8x512xf32> to vector<8x128xf32>
    %321 = math.tanh %320 : vector<8x128xf32>
    %322 = vector.extract_strided_slice %311 {offsets = [0, 384], sizes = [8, 128], strides = [1, 1]} : vector<8x512xf32> to vector<8x128xf32>
    %323 = arith.negf %322 : vector<8x128xf32>
    %324 = math.exp %323 : vector<8x128xf32>
    %cst_91 = arith.constant 1.000000e+00 : f32
    %325 = vector.broadcast %cst_91 : f32 to vector<8x128xf32>
    %326 = arith.addf %325, %324 : vector<8x128xf32>
    %327 = arith.divf %325, %326 : vector<8x128xf32>
    %328 = arith.mulf %319, %272 : vector<8x128xf32>
    %329 = arith.mulf %318, %321 : vector<8x128xf32>
    %330 = arith.addf %328, %329 : vector<8x128xf32>
    %331 = math.tanh %330 : vector<8x128xf32>
    %332 = arith.mulf %327, %331 : vector<8x128xf32>
    %333 = arith.truncf %332 : vector<8x128xf32> to vector<8x128xbf16>
    %c0_92 = arith.constant 0 : index
    %c0_93 = arith.constant 0 : index
    %334 = vector.load %arg5[%c0_92, %c0_93] : memref<128x512xbf16, #tpu.memory_space<vmem>>, vector<128x512xbf16>
    %cst_94 = arith.constant dense<0.000000e+00> : vector<8x512xf32>
    %335 = tpu.matmul %333, %334, %cst_94 {dimension_numbers = #tpu.dot_dimension_numbers<[1], [0], [0], [1], [0, 0, 1, 1], [], []>} : vector<8x128xbf16>, vector<128x512xbf16>, vector<8x512xf32> -> vector<8x512xf32>
    %336 = arith.truncf %303 : vector<8x128xf32> to vector<8x128xbf16>
    %c0_95 = arith.constant 0 : index
    %c0_96 = arith.constant 0 : index
    %337 = vector.load %arg6[%c0_95, %c0_96] : memref<128x512xbf16, #tpu.memory_space<vmem>>, vector<128x512xbf16>
    %cst_97 = arith.constant dense<0.000000e+00> : vector<8x512xf32>
    %338 = tpu.matmul %336, %337, %cst_97 {dimension_numbers = #tpu.dot_dimension_numbers<[1], [0], [0], [1], [0, 0, 1, 1], [], []>} : vector<8x128xbf16>, vector<128x512xbf16>, vector<8x512xf32> -> vector<8x512xf32>
    %339 = arith.addf %335, %338 : vector<8x512xf32>
    %340 = arith.addf %339, %12 : vector<8x512xf32>
    %341 = vector.extract_strided_slice %340 {offsets = [0, 0], sizes = [8, 256], strides = [1, 1]} : vector<8x512xf32> to vector<8x256xf32>
    %342 = arith.negf %341 : vector<8x256xf32>
    %343 = math.exp %342 : vector<8x256xf32>
    %cst_98 = arith.constant 1.000000e+00 : f32
    %344 = vector.broadcast %cst_98 : f32 to vector<8x256xf32>
    %345 = arith.addf %344, %343 : vector<8x256xf32>
    %346 = arith.divf %344, %345 : vector<8x256xf32>
    %347 = vector.extract_strided_slice %346 {offsets = [0, 0], sizes = [8, 128], strides = [1, 1]} : vector<8x256xf32> to vector<8x128xf32>
    %348 = vector.extract_strided_slice %346 {offsets = [0, 128], sizes = [8, 128], strides = [1, 1]} : vector<8x256xf32> to vector<8x128xf32>
    %349 = vector.extract_strided_slice %340 {offsets = [0, 256], sizes = [8, 128], strides = [1, 1]} : vector<8x512xf32> to vector<8x128xf32>
    %350 = math.tanh %349 : vector<8x128xf32>
    %351 = vector.extract_strided_slice %340 {offsets = [0, 384], sizes = [8, 128], strides = [1, 1]} : vector<8x512xf32> to vector<8x128xf32>
    %352 = arith.negf %351 : vector<8x128xf32>
    %353 = math.exp %352 : vector<8x128xf32>
    %cst_99 = arith.constant 1.000000e+00 : f32
    %354 = vector.broadcast %cst_99 : f32 to vector<8x128xf32>
    %355 = arith.addf %354, %353 : vector<8x128xf32>
    %356 = arith.divf %354, %355 : vector<8x128xf32>
    %357 = arith.mulf %348, %301 : vector<8x128xf32>
    %358 = arith.mulf %347, %350 : vector<8x128xf32>
    %359 = arith.addf %357, %358 : vector<8x128xf32>
    %360 = math.tanh %359 : vector<8x128xf32>
    %361 = arith.mulf %356, %360 : vector<8x128xf32>
    %c6_i32 = arith.constant 6 : i32
    %c8_i32_100 = arith.constant 8 : i32
    %362 = arith.muli %c6_i32, %c8_i32_100 : i32
    %363 = tpu.assume_multiple %362, 8 : i32
    %364 = arith.index_cast %363 : i32 to index
    %c0_101 = arith.constant 0 : index
    %365 = vector.load %arg9[%364, %c0_101] : memref<64x512xf32, #tpu.memory_space<vmem>>, vector<8x512xf32>
    %366 = arith.truncf %332 : vector<8x128xf32> to vector<8x128xbf16>
    %c0_102 = arith.constant 0 : index
    %c0_103 = arith.constant 0 : index
    %367 = vector.load %arg3[%c0_102, %c0_103] : memref<128x512xbf16, #tpu.memory_space<vmem>>, vector<128x512xbf16>
    %cst_104 = arith.constant dense<0.000000e+00> : vector<8x512xf32>
    %368 = tpu.matmul %366, %367, %cst_104 {dimension_numbers = #tpu.dot_dimension_numbers<[1], [0], [0], [1], [0, 0, 1, 1], [], []>} : vector<8x128xbf16>, vector<128x512xbf16>, vector<8x512xf32> -> vector<8x512xf32>
    %369 = arith.addf %365, %368 : vector<8x512xf32>
    %370 = vector.extract_strided_slice %369 {offsets = [0, 0], sizes = [8, 256], strides = [1, 1]} : vector<8x512xf32> to vector<8x256xf32>
    %371 = arith.negf %370 : vector<8x256xf32>
    %372 = math.exp %371 : vector<8x256xf32>
    %cst_105 = arith.constant 1.000000e+00 : f32
    %373 = vector.broadcast %cst_105 : f32 to vector<8x256xf32>
    %374 = arith.addf %373, %372 : vector<8x256xf32>
    %375 = arith.divf %373, %374 : vector<8x256xf32>
    %376 = vector.extract_strided_slice %375 {offsets = [0, 0], sizes = [8, 128], strides = [1, 1]} : vector<8x256xf32> to vector<8x128xf32>
    %377 = vector.extract_strided_slice %375 {offsets = [0, 128], sizes = [8, 128], strides = [1, 1]} : vector<8x256xf32> to vector<8x128xf32>
    %378 = vector.extract_strided_slice %369 {offsets = [0, 256], sizes = [8, 128], strides = [1, 1]} : vector<8x512xf32> to vector<8x128xf32>
    %379 = math.tanh %378 : vector<8x128xf32>
    %380 = vector.extract_strided_slice %369 {offsets = [0, 384], sizes = [8, 128], strides = [1, 1]} : vector<8x512xf32> to vector<8x128xf32>
    %381 = arith.negf %380 : vector<8x128xf32>
    %382 = math.exp %381 : vector<8x128xf32>
    %cst_106 = arith.constant 1.000000e+00 : f32
    %383 = vector.broadcast %cst_106 : f32 to vector<8x128xf32>
    %384 = arith.addf %383, %382 : vector<8x128xf32>
    %385 = arith.divf %383, %384 : vector<8x128xf32>
    %386 = arith.mulf %377, %330 : vector<8x128xf32>
    %387 = arith.mulf %376, %379 : vector<8x128xf32>
    %388 = arith.addf %386, %387 : vector<8x128xf32>
    %389 = math.tanh %388 : vector<8x128xf32>
    %390 = arith.mulf %385, %389 : vector<8x128xf32>
    %391 = arith.truncf %390 : vector<8x128xf32> to vector<8x128xbf16>
    %c0_107 = arith.constant 0 : index
    %c0_108 = arith.constant 0 : index
    %392 = vector.load %arg5[%c0_107, %c0_108] : memref<128x512xbf16, #tpu.memory_space<vmem>>, vector<128x512xbf16>
    %cst_109 = arith.constant dense<0.000000e+00> : vector<8x512xf32>
    %393 = tpu.matmul %391, %392, %cst_109 {dimension_numbers = #tpu.dot_dimension_numbers<[1], [0], [0], [1], [0, 0, 1, 1], [], []>} : vector<8x128xbf16>, vector<128x512xbf16>, vector<8x512xf32> -> vector<8x512xf32>
    %394 = arith.truncf %361 : vector<8x128xf32> to vector<8x128xbf16>
    %c0_110 = arith.constant 0 : index
    %c0_111 = arith.constant 0 : index
    %395 = vector.load %arg6[%c0_110, %c0_111] : memref<128x512xbf16, #tpu.memory_space<vmem>>, vector<128x512xbf16>
    %cst_112 = arith.constant dense<0.000000e+00> : vector<8x512xf32>
    %396 = tpu.matmul %394, %395, %cst_112 {dimension_numbers = #tpu.dot_dimension_numbers<[1], [0], [0], [1], [0, 0, 1, 1], [], []>} : vector<8x128xbf16>, vector<128x512xbf16>, vector<8x512xf32> -> vector<8x512xf32>
    %397 = arith.addf %393, %396 : vector<8x512xf32>
    %398 = arith.addf %397, %12 : vector<8x512xf32>
    %399 = vector.extract_strided_slice %398 {offsets = [0, 0], sizes = [8, 256], strides = [1, 1]} : vector<8x512xf32> to vector<8x256xf32>
    %400 = arith.negf %399 : vector<8x256xf32>
    %401 = math.exp %400 : vector<8x256xf32>
    %cst_113 = arith.constant 1.000000e+00 : f32
    %402 = vector.broadcast %cst_113 : f32 to vector<8x256xf32>
    %403 = arith.addf %402, %401 : vector<8x256xf32>
    %404 = arith.divf %402, %403 : vector<8x256xf32>
    %405 = vector.extract_strided_slice %404 {offsets = [0, 0], sizes = [8, 128], strides = [1, 1]} : vector<8x256xf32> to vector<8x128xf32>
    %406 = vector.extract_strided_slice %404 {offsets = [0, 128], sizes = [8, 128], strides = [1, 1]} : vector<8x256xf32> to vector<8x128xf32>
    %407 = vector.extract_strided_slice %398 {offsets = [0, 256], sizes = [8, 128], strides = [1, 1]} : vector<8x512xf32> to vector<8x128xf32>
    %408 = math.tanh %407 : vector<8x128xf32>
    %409 = vector.extract_strided_slice %398 {offsets = [0, 384], sizes = [8, 128], strides = [1, 1]} : vector<8x512xf32> to vector<8x128xf32>
    %410 = arith.negf %409 : vector<8x128xf32>
    %411 = math.exp %410 : vector<8x128xf32>
    %cst_114 = arith.constant 1.000000e+00 : f32
    %412 = vector.broadcast %cst_114 : f32 to vector<8x128xf32>
    %413 = arith.addf %412, %411 : vector<8x128xf32>
    %414 = arith.divf %412, %413 : vector<8x128xf32>
    %415 = arith.mulf %406, %359 : vector<8x128xf32>
    %416 = arith.mulf %405, %408 : vector<8x128xf32>
    %417 = arith.addf %415, %416 : vector<8x128xf32>
    %418 = math.tanh %417 : vector<8x128xf32>
    %419 = arith.mulf %414, %418 : vector<8x128xf32>
    %c7_i32 = arith.constant 7 : i32
    %c8_i32_115 = arith.constant 8 : i32
    %420 = arith.muli %c7_i32, %c8_i32_115 : i32
    %421 = tpu.assume_multiple %420, 8 : i32
    %422 = arith.index_cast %421 : i32 to index
    %c0_116 = arith.constant 0 : index
    %423 = vector.load %arg9[%422, %c0_116] : memref<64x512xf32, #tpu.memory_space<vmem>>, vector<8x512xf32>
    %424 = arith.truncf %390 : vector<8x128xf32> to vector<8x128xbf16>
    %c0_117 = arith.constant 0 : index
    %c0_118 = arith.constant 0 : index
    %425 = vector.load %arg3[%c0_117, %c0_118] : memref<128x512xbf16, #tpu.memory_space<vmem>>, vector<128x512xbf16>
    %cst_119 = arith.constant dense<0.000000e+00> : vector<8x512xf32>
    %426 = tpu.matmul %424, %425, %cst_119 {dimension_numbers = #tpu.dot_dimension_numbers<[1], [0], [0], [1], [0, 0, 1, 1], [], []>} : vector<8x128xbf16>, vector<128x512xbf16>, vector<8x512xf32> -> vector<8x512xf32>
    %427 = arith.addf %423, %426 : vector<8x512xf32>
    %428 = vector.extract_strided_slice %427 {offsets = [0, 0], sizes = [8, 256], strides = [1, 1]} : vector<8x512xf32> to vector<8x256xf32>
    %429 = arith.negf %428 : vector<8x256xf32>
    %430 = math.exp %429 : vector<8x256xf32>
    %cst_120 = arith.constant 1.000000e+00 : f32
    %431 = vector.broadcast %cst_120 : f32 to vector<8x256xf32>
    %432 = arith.addf %431, %430 : vector<8x256xf32>
    %433 = arith.divf %431, %432 : vector<8x256xf32>
    %434 = vector.extract_strided_slice %433 {offsets = [0, 0], sizes = [8, 128], strides = [1, 1]} : vector<8x256xf32> to vector<8x128xf32>
    %435 = vector.extract_strided_slice %433 {offsets = [0, 128], sizes = [8, 128], strides = [1, 1]} : vector<8x256xf32> to vector<8x128xf32>
    %436 = vector.extract_strided_slice %427 {offsets = [0, 256], sizes = [8, 128], strides = [1, 1]} : vector<8x512xf32> to vector<8x128xf32>
    %437 = math.tanh %436 : vector<8x128xf32>
    %438 = vector.extract_strided_slice %427 {offsets = [0, 384], sizes = [8, 128], strides = [1, 1]} : vector<8x512xf32> to vector<8x128xf32>
    %439 = arith.negf %438 : vector<8x128xf32>
    %440 = math.exp %439 : vector<8x128xf32>
    %cst_121 = arith.constant 1.000000e+00 : f32
    %441 = vector.broadcast %cst_121 : f32 to vector<8x128xf32>
    %442 = arith.addf %441, %440 : vector<8x128xf32>
    %443 = arith.divf %441, %442 : vector<8x128xf32>
    %444 = arith.mulf %435, %388 : vector<8x128xf32>
    %445 = arith.mulf %434, %437 : vector<8x128xf32>
    %446 = arith.addf %444, %445 : vector<8x128xf32>
    %447 = math.tanh %446 : vector<8x128xf32>
    %448 = arith.mulf %443, %447 : vector<8x128xf32>
    %449 = arith.truncf %448 : vector<8x128xf32> to vector<8x128xbf16>
    %c0_122 = arith.constant 0 : index
    %c0_123 = arith.constant 0 : index
    %450 = vector.load %arg5[%c0_122, %c0_123] : memref<128x512xbf16, #tpu.memory_space<vmem>>, vector<128x512xbf16>
    %cst_124 = arith.constant dense<0.000000e+00> : vector<8x512xf32>
    %451 = tpu.matmul %449, %450, %cst_124 {dimension_numbers = #tpu.dot_dimension_numbers<[1], [0], [0], [1], [0, 0, 1, 1], [], []>} : vector<8x128xbf16>, vector<128x512xbf16>, vector<8x512xf32> -> vector<8x512xf32>
    %452 = arith.truncf %419 : vector<8x128xf32> to vector<8x128xbf16>
    %c0_125 = arith.constant 0 : index
    %c0_126 = arith.constant 0 : index
    %453 = vector.load %arg6[%c0_125, %c0_126] : memref<128x512xbf16, #tpu.memory_space<vmem>>, vector<128x512xbf16>
    %cst_127 = arith.constant dense<0.000000e+00> : vector<8x512xf32>
    %454 = tpu.matmul %452, %453, %cst_127 {dimension_numbers = #tpu.dot_dimension_numbers<[1], [0], [0], [1], [0, 0, 1, 1], [], []>} : vector<8x128xbf16>, vector<128x512xbf16>, vector<8x512xf32> -> vector<8x512xf32>
    %455 = arith.addf %451, %454 : vector<8x512xf32>
    %456 = arith.addf %455, %12 : vector<8x512xf32>
    %457 = vector.extract_strided_slice %456 {offsets = [0, 0], sizes = [8, 256], strides = [1, 1]} : vector<8x512xf32> to vector<8x256xf32>
    %458 = arith.negf %457 : vector<8x256xf32>
    %459 = math.exp %458 : vector<8x256xf32>
    %cst_128 = arith.constant 1.000000e+00 : f32
    %460 = vector.broadcast %cst_128 : f32 to vector<8x256xf32>
    %461 = arith.addf %460, %459 : vector<8x256xf32>
    %462 = arith.divf %460, %461 : vector<8x256xf32>
    %463 = vector.extract_strided_slice %462 {offsets = [0, 0], sizes = [8, 128], strides = [1, 1]} : vector<8x256xf32> to vector<8x128xf32>
    %464 = vector.extract_strided_slice %462 {offsets = [0, 128], sizes = [8, 128], strides = [1, 1]} : vector<8x256xf32> to vector<8x128xf32>
    %465 = vector.extract_strided_slice %456 {offsets = [0, 256], sizes = [8, 128], strides = [1, 1]} : vector<8x512xf32> to vector<8x128xf32>
    %466 = math.tanh %465 : vector<8x128xf32>
    %467 = vector.extract_strided_slice %456 {offsets = [0, 384], sizes = [8, 128], strides = [1, 1]} : vector<8x512xf32> to vector<8x128xf32>
    %468 = arith.negf %467 : vector<8x128xf32>
    %469 = math.exp %468 : vector<8x128xf32>
    %cst_129 = arith.constant 1.000000e+00 : f32
    %470 = vector.broadcast %cst_129 : f32 to vector<8x128xf32>
    %471 = arith.addf %470, %469 : vector<8x128xf32>
    %472 = arith.divf %470, %471 : vector<8x128xf32>
    %473 = arith.mulf %464, %417 : vector<8x128xf32>
    %474 = arith.mulf %463, %466 : vector<8x128xf32>
    %475 = arith.addf %473, %474 : vector<8x128xf32>
    %476 = math.tanh %475 : vector<8x128xf32>
    %477 = arith.mulf %472, %476 : vector<8x128xf32>
    %c8_i32_130 = arith.constant 8 : i32
    %c0_131 = arith.constant 0 : index
    %c0_132 = arith.constant 0 : index
    %478 = vector.load %arg8[%c0_131, %c0_132] : memref<8x128xf32, #tpu.memory_space<vmem>>, vector<8x128xf32>
    tpu.vector_store %arg8[%c0_131, %c0_132], %477 {strides = array<i32>} : memref<8x128xf32, #tpu.memory_space<vmem>>, vector<8x128xf32>,
    return
  }
  func.func @transform_0(%arg0: i32) -> (i32, i32, i32) {
    %c0_i32 = arith.constant 0 : i32
    %c0_i32_0 = arith.constant 0 : i32
    %c0_i32_1 = arith.constant 0 : i32
    return %c0_i32, %arg0, %c0_i32_0 : i32, i32, i32
  }
  func.func @transform_1(%arg0: i32) -> (i32, i32) {
    %c0_i32 = arith.constant 0 : i32
    %c0_i32_0 = arith.constant 0 : i32
    %c0_i32_1 = arith.constant 0 : i32
    return %c0_i32, %c0_i32_0 : i32, i32
  }
  func.func @transform_2(%arg0: i32) -> (i32, i32) {
    %c0_i32 = arith.constant 0 : i32
    %c0_i32_0 = arith.constant 0 : i32
    %c0_i32_1 = arith.constant 0 : i32
    return %c0_i32, %c0_i32_0 : i32, i32
  }
  func.func @transform_3(%arg0: i32) -> (i32, i32) {
    %c0_i32 = arith.constant 0 : i32
    %c0_i32_0 = arith.constant 0 : i32
    %c0_i32_1 = arith.constant 0 : i32
    return %c0_i32, %c0_i32_0 : i32, i32
  }
  func.func @transform_4(%arg0: i32) -> (i32, i32) {
    %c0_i32 = arith.constant 0 : i32
    %c0_i32_0 = arith.constant 0 : i32
    %c0_i32_1 = arith.constant 0 : i32
    return %c0_i32, %c0_i32_0 : i32, i32
  }
  func.func @transform_5(%arg0: i32) -> (i32, i32) {
    %c0_i32 = arith.constant 0 : i32
    %c0_i32_0 = arith.constant 0 : i32
    %c0_i32_1 = arith.constant 0 : i32
    return %c0_i32, %c0_i32_0 : i32, i32
  }
  func.func @transform_6(%arg0: i32) -> (i32, i32) {
    %c0_i32 = arith.constant 0 : i32
    %c0_i32_0 = arith.constant 0 : i32
    %c0_i32_1 = arith.constant 0 : i32
    return %c0_i32, %c0_i32_0 : i32, i32
  }
  func.func @transform_7(%arg0: i32) -> (i32, i32) {
    %c0_i32 = arith.constant 0 : i32
    %c0_i32_0 = arith.constant 0 : i32
    return %arg0, %c0_i32 : i32, i32
  }
}

</mosaic_0001>

<bundles_post_ra>
// kernel: tpu_custom_call.1
= control target key start
LH: loop header
LB: loop body
LE: loop exit
PB: predicated region body
PF: predicated region fallthrough
CT: control target
= control target key end

     0   :  { %12 = vsyncpa [#allocation4], 0  ;;  %s6231_s0 = inlined_call_operand.hbm [shape: f32[8,8,128], index: 0, kind: input, shape index: {}]   ;;  %s6232_s1 = inlined_call_operand.hbm [shape: bf16[128,512], index: 1, kind: input, shape index: {}]   ;;  %s6233_s2 = inlined_call_operand.hbm [shape: bf16[128,512], index: 2, kind: input, shape index: {}]   ;;  %s6234_s3 = inlined_call_operand.hbm [shape: f32[1,512], index: 3, kind: input, shape index: {}]   ;;  %s6235_s4 = inlined_call_operand.hbm [shape: bf16[128,512], index: 4, kind: input, shape index: {}]   ;;  %s6236_s5 = inlined_call_operand.hbm [shape: bf16[128,512], index: 5, kind: input, shape index: {}]   ;;  %s6237_s6 = inlined_call_operand.vmem [shape: f32[1,512], index: 6, kind: input, shape index: {}]   ;;  %s6238_s7 = inlined_call_operand.hbm [shape: f32[8,128], index: 7, kind: output, shape index: {}]  }
   0x1   :  { %13 = vsyncpa [#allocation7], 0 }
   0x2   :  { %14 = vsyncpa [#allocation10], 0 }
   0x3   :  { %15 = vsyncpa [#allocation13], 0  ;;  %s34_s26 = sshll.u32 %s6232_s1, 4  ;;  %s35_s26 = int_to_ptr.hbm [resolvable:$true] %s34_s26 }
   0x4   :  { %16 = vsyncpa [#allocation5], 0  ;;  %s4621_s27 = smov [#allocation6]   ;;  %s61_s8 = sshll.u32 %s6234_s3, 4  ;;  %s62_s8 = int_to_ptr.hbm [resolvable:$true] %s61_s8 }
   0x5   :  { %s36_s28 = sshll.u32 %s4621_s27, 4  ;;  %s4622_s9 = smov 256   ;;  %s37_s28 = int_to_ptr.vmem [resolvable:$true] %s36_s28 }
   0x6   :  { %s4623_s10 = smov 16   ;;  %s4624_s11 = smov [#allocation9]  }
   0x7   :  { %42 = dma.hbm_to_vmem [thread:$0]  %s35_s26, 4096, %s37_s28, [#allocation7], %s4622_s9, %s4622_s9, %s4623_s10  }
   0x8   :  { %s63_s12 = sshll.u32 %s4624_s11, 4  ;;  %s21_s14 = sshll.u32 %s6231_s0, 4  ;;  %s64_s12 = int_to_ptr.vmem [resolvable:$true] %s63_s12  ;;  %s22_s14 = int_to_ptr.hbm [resolvable:$true] %s21_s14 }
   0x9   :  { %66 = dma.hbm_to_vmem [thread:$0]  %s62_s8, 64, %s64_s12, [#allocation10]  }
   0xa   :  { %s4625_s15 = smov [#allocation3]   ;;  %s47_s18 = sshll.u32 %s6233_s2, 4  ;;  %s48_s18 = int_to_ptr.hbm [resolvable:$true] %s47_s18 }
   0xb   :  { %s23_s16 = sshll.u32 %s4625_s15, 4  ;;  %s4626_s19 = smov 128   ;;  %s24_s16 = int_to_ptr.vmem [resolvable:$true] %s23_s16 }
   0xc   :  { %s4627_s20 = smov 8   ;;  %s4628_s21 = smov [#allocation8]  }
   0xd   :  { %29 = dma.hbm_to_vmem [thread:$0]  %s22_s14, 1024, %s24_s16, [#allocation4], %s4626_s19, %s4626_s19, %s4627_s20  }
   0xe   :  { %s49_s22 = sshll.u32 %s4628_s21, 4  ;;  %s71_s0 = sshll.u32 %s6235_s4, 4  ;;  %s50_s22 = int_to_ptr.vmem [resolvable:$true] %s49_s22  ;;  %s72_s0 = int_to_ptr.hbm [resolvable:$true] %s71_s0 }
   0xf   :  { %55 = dma.hbm_to_vmem [thread:$0]  %s48_s18, 4096, %s50_s22, [#allocation7], %s4622_s9, %s4622_s9, %s4623_s10  }
  0x10   :  { %s84_s2 = sshll.u32 %s6236_s5, 4  ;;  %s4629_s27 = smov [#allocation11]   ;;  %s85_s2 = int_to_ptr.hbm [resolvable:$true] %s84_s2 }
  0x11   :  { %s73_s28 = sshll.u32 %s4629_s27, 4  ;;  %s4630_s29 = smov [#allocation12]   ;;  %s74_s28 = int_to_ptr.vmem [resolvable:$true] %s73_s28 }
  0x12   :  { %79 = dma.hbm_to_vmem [thread:$0]  %s72_s0, 4096, %s74_s28, [#allocation10], %s4622_s9, %s4622_s9, %s4623_s10  }
  0x13   :  { %s86_s4 = sshll.u32 %s4630_s29, 4  ;;  %s87_s4 = int_to_ptr.vmem [resolvable:$true] %s86_s4 }
  0x14   :  { %92 = dma.hbm_to_vmem [thread:$0]  %s85_s2, 4096, %s87_s4, [#allocation13], %s4622_s9, %s4622_s9, %s4623_s10  }
  0x15   :  { %4611 = dma.done.wait [#allocation4], 1024  }
  0x16   :  { %4612 = vsyncadd [#allocation4], 4294966272 }
  0x17   :  { %4613 = dma.done.wait [#allocation7], 8192  }
  0x18   :  { %4614 = vsyncadd [#allocation7], 4294959104 }
  0x19   :  { %4615 = dma.done.wait [#allocation10], 4160  }
  0x1a   :  { %4616 = vsyncadd [#allocation10], 4294963136 }
  0x1b   :  { %4617 = dma.done.wait [#allocation13], 4096  }
  0x1c   :  { %4618 = vsyncadd [#allocation13], 4294963200  ;;  %v3601_v0 = vld [vmem:[#allocation6 + $0xe0] sm:$0xf]  ;;  %v4077_v1 = vld [vmem:[#allocation6 + $0xec] sm:$0xf0] }
  0x1d   :  { %v4075_v2 = vld [vmem:[#allocation6 + $0xe4] sm:$0xf]  ;;  %v3602_v3 = vor.u32 %v4077_v1, %v3601_v0  ;;  %v3603_v4 = vld [vmem:[#allocation6 + $0xf0] sm:$0xf0]  ;;  %v3609_v5 = vld [vmem:[#allocation6 + $0xe8] sm:$0xf] }
  0x1e   :  { %v4078_v6 = vld [vmem:[#allocation6 + $0xf4] sm:$0xf0]  ;;  %v3606_v7 = vor.u32 %v4075_v2, %v3603_v4  ;;  %v4076_v9 = vld [vmem:[#allocation6 + $0xec] sm:$0xf]  ;;  %v3611_v10 = vld [vmem:[#allocation6 + $0xf8] sm:$0xf0] }
  0x1f   :  { %v3610_v8 = vor.u32 %v4078_v6, %v3609_v5  ;;  %v3585_v11 = vld [vmem:[#allocation6 + $0xc0] sm:$0xf]  ;;  %334 = vmatpush.bf16.msra.mxu0 %v3602_v3  ;;  %v3614_v12 = vor.u32 %v4076_v9, %v3611_v10  ;;  %v4073_v13 = vld [vmem:[#allocation6 + $0xcc] sm:$0xf0]  ;;  %v4071_v14 = vld [vmem:[#allocation6 + $0xc4] sm:$0xf] }
  0x20   :  { %v3587_v15 = vld [vmem:[#allocation6 + $0xd0] sm:$0xf0]  ;;  %363 = vmatpush.bf16.msra.mxu1 %v3606_v7  ;;  %v3586_v16 = vor.u32 %v4073_v13, %v3585_v11  ;;  %v3593_v18 = vld [vmem:[#allocation6 + $0xc8] sm:$0xf]  ;;  %v4074_v19 = vld [vmem:[#allocation6 + $0xd4] sm:$0xf0] }
  0x21   :  { %392 = vmatpush.bf16.msra.mxu2 %v3610_v8  ;;  %v3590_v17 = vor.u32 %v4071_v14, %v3587_v15  ;;  %v4072_v20 = vld [vmem:[#allocation6 + $0xcc] sm:$0xf]  ;;  %421 = vmatpush.bf16.msra.mxu3 %v3614_v12  ;;  %v3594_v21 = vor.u32 %v4074_v19, %v3593_v18  ;;  %v3595_v22 = vld [vmem:[#allocation6 + $0xd8] sm:$0xf0]  ;;  %v3569_v23 = vld [vmem:[#allocation6 + $0xa0] sm:$0xf] }
  0x22   :  { %v4069_v24 = vld [vmem:[#allocation6 + $0xac] sm:$0xf0]  ;;  %v3598_v25 = vor.u32 %v4072_v20, %v3595_v22  ;;  %v4067_v26 = vld [vmem:[#allocation6 + $0xa4] sm:$0xf]  ;;  %v3571_v27 = vld [vmem:[#allocation6 + $0xb0] sm:$0xf0] }
  0x23   :  { %v3577_v28 = vld [vmem:[#allocation6 + $0xa8] sm:$0xf]  ;;  %335 = vmatpush.bf16.msra.mxu0 %v3586_v16  ;;  %v3570_v29 = vor.u32 %v4069_v24, %v3569_v23  ;;  %v4070_v30 = vld [vmem:[#allocation6 + $0xb4] sm:$0xf0]  ;;  %v4068_v31 = vld [vmem:[#allocation6 + $0xac] sm:$0xf]  ;;  %v3574_v33 = vor.u32 %v4067_v26, %v3571_v27 }
  0x24   :  { %v3579_v32 = vld [vmem:[#allocation6 + $0xb8] sm:$0xf0]  ;;  %364 = vmatpush.bf16.msra.mxu1 %v3590_v17  ;;  %v3578_v34 = vor.u32 %v4070_v30, %v3577_v28  ;;  %v3553_v35 = vld [vmem:[#allocation6 + $0x80] sm:$0xf]  ;;  %v4065_v36 = vld [vmem:[#allocation6 + $0x8c] sm:$0xf0] }
  0x25   :  { %393 = vmatpush.bf16.msra.mxu2 %v3594_v21  ;;  %v4063_v37 = vld [vmem:[#allocation6 + $0x84] sm:$0xf]  ;;  %422 = vmatpush.bf16.msra.mxu3 %v3598_v25  ;;  %v3582_v38 = vor.u32 %v4068_v31, %v3579_v32  ;;  %v3555_v39 = vld [vmem:[#allocation6 + $0x90] sm:$0xf0]  ;;  %v3561_v40 = vld [vmem:[#allocation6 + $0x88] sm:$0xf]  ;;  %v3554_v44 = vor.u32 %v4065_v36, %v3553_v35 }
  0x26   :  { %v4066_v41 = vld [vmem:[#allocation6 + $0x94] sm:$0xf0]  ;;  %v4064_v42 = vld [vmem:[#allocation6 + $0x8c] sm:$0xf]  ;;  %v3563_v43 = vld [vmem:[#allocation6 + $0x98] sm:$0xf0]  ;;  %v3558_v45 = vor.u32 %v4063_v37, %v3555_v39 }
  0x27   :  { %336 = vmatpush.bf16.msra.mxu0 %v3570_v29  ;;  %v3562_v46 = vor.u32 %v4066_v41, %v3561_v40  ;;  %v3537_v47 = vld [vmem:[#allocation6 + $0x60] sm:$0xf]  ;;  %v4061_v48 = vld [vmem:[#allocation6 + $0x6c] sm:$0xf0]  ;;  %v4059_v49 = vld [vmem:[#allocation6 + $0x64] sm:$0xf]  ;;  %v3566_v50 = vor.u32 %v4064_v42, %v3563_v43 }
  0x28   :  { %365 = vmatpush.bf16.msra.mxu1 %v3574_v33  ;;  %v3539_v51 = vld [vmem:[#allocation6 + $0x70] sm:$0xf0]  ;;  %v3545_v52 = vld [vmem:[#allocation6 + $0x68] sm:$0xf]  ;;  %v4062_v53 = vld [vmem:[#allocation6 + $0x74] sm:$0xf0]  ;;  %v3538_v56 = vor.u32 %v4061_v48, %v3537_v47 }
  0x29   :  { %394 = vmatpush.bf16.msra.mxu2 %v3578_v34  ;;  %423 = vmatpush.bf16.msra.mxu3 %v3582_v38  ;;  %v4060_v54 = vld [vmem:[#allocation6 + $0x6c] sm:$0xf]  ;;  %v3547_v55 = vld [vmem:[#allocation6 + $0x78] sm:$0xf0]  ;;  %v3542_v57 = vor.u32 %v4059_v49, %v3539_v51  ;;  %v3546_v58 = vor.u32 %v4062_v53, %v3545_v52  ;;  %v3521_v59 = vld [vmem:[#allocation6 + $0x40] sm:$0xf] }
  0x2a   :  { %v4057_v60 = vld [vmem:[#allocation6 + $0x4c] sm:$0xf0]  ;;  %v4055_v61 = vld [vmem:[#allocation6 + $0x44] sm:$0xf]  ;;  %v3550_v62 = vor.u32 %v4060_v54, %v3547_v55  ;;  %v3523_v63 = vld [vmem:[#allocation6 + $0x50] sm:$0xf0] }
  0x2b   :  { %337 = vmatpush.bf16.msra.mxu0 %v3554_v44  ;;  %v3529_v0 = vld [vmem:[#allocation6 + $0x48] sm:$0xf]  ;;  %v4058_v1 = vld [vmem:[#allocation6 + $0x54] sm:$0xf0]  ;;  %v4056_v2 = vld [vmem:[#allocation6 + $0x4c] sm:$0xf]  ;;  %v3522_v4 = vor.u32 %v4057_v60, %v3521_v59  ;;  %v3526_v5 = vor.u32 %v4055_v61, %v3523_v63 }
  0x2c   :  { %366 = vmatpush.bf16.msra.mxu1 %v3558_v45  ;;  %v3531_v3 = vld [vmem:[#allocation6 + $0x58] sm:$0xf0]  ;;  %v3530_v6 = vor.u32 %v4058_v1, %v3529_v0  ;;  %v3505_v7 = vld [vmem:[#allocation6 + $0x20] sm:$0xf]  ;;  %v4053_v8 = vld [vmem:[#allocation6 + $0x2c] sm:$0xf0] }
  0x2d   :  { %395 = vmatpush.bf16.msra.mxu2 %v3562_v46  ;;  %424 = vmatpush.bf16.msra.mxu3 %v3566_v50  ;;  %v4051_v9 = vld [vmem:[#allocation6 + $0x24] sm:$0xf]  ;;  %v3534_v10 = vor.u32 %v4056_v2, %v3531_v3  ;;  %v3507_v11 = vld [vmem:[#allocation6 + $0x30] sm:$0xf0]  ;;  %v3513_v12 = vld [vmem:[#allocation6 + $0x28] sm:$0xf]  ;;  %v3506_v16 = vor.u32 %v4053_v8, %v3505_v7 }
  0x2e   :  { %v4054_v13 = vld [vmem:[#allocation6 + $0x34] sm:$0xf0]  ;;  %v4052_v14 = vld [vmem:[#allocation6 + $0x2c] sm:$0xf]  ;;  %v3515_v15 = vld [vmem:[#allocation6 + $0x38] sm:$0xf0]  ;;  %v3510_v19 = vor.u32 %v4051_v9, %v3507_v11 }
  0x2f   :  { %338 = vmatpush.bf16.msra.mxu0 %v3538_v56  ;;  %v3489_v17 = vld [vmem:[#allocation6] sm:$0xf]  ;;  %v4049_v18 = vld [vmem:[#allocation6 + $0xc] sm:$0xf0]  ;;  %v3514_v20 = vor.u32 %v4054_v13, %v3513_v12  ;;  %v4047_v21 = vld [vmem:[#allocation6 + $0x4] sm:$0xf]  ;;  %v3518_v24 = vor.u32 %v4052_v14, %v3515_v15 }
  0x30   :  { %367 = vmatpush.bf16.msra.mxu1 %v3542_v57  ;;  %v3491_v22 = vld [vmem:[#allocation6 + $0x10] sm:$0xf0]  ;;  %v3497_v23 = vld [vmem:[#allocation6 + $0x8] sm:$0xf]  ;;  %v4050_v25 = vld [vmem:[#allocation6 + $0x14] sm:$0xf0]  ;;  %v3490_v31 = vor.u32 %v4049_v18, %v3489_v17 }
  0x31   :  { %396 = vmatpush.bf16.msra.mxu2 %v3546_v58  ;;  %425 = vmatpush.bf16.msra.mxu3 %v3550_v62  ;;  %v4048_v26 = vld [vmem:[#allocation6 + $0xc] sm:$0xf]  ;;  %v3499_v27 = vld [vmem:[#allocation6 + $0x18] sm:$0xf0]  ;;  %v120_v28 = vld [vmem:[#allocation3] sm:$0xff]  ;;  %v3494_v35 = vor.u32 %v4047_v21, %v3491_v22  ;;  %v3498_v36 = vor.u32 %v4050_v25, %v3497_v23  ;;  %s3467_s11 = sshll.u32 %s6238_s7, 4  ;;  %s3468_s11 = int_to_ptr.hbm [resolvable:$true] %s3467_s11 }
  0x32   :  { %v3729_v29 = vld [vmem:[#allocation8 + $0xe0] sm:$0xf]  ;;  %v4109_v30 = vld [vmem:[#allocation8 + $0xec] sm:$0xf0]  ;;  %v121_v32 = vld [vmem:[#allocation3 + $0x8] sm:$0xff]  ;;  %v3502_v37 = vor.u32 %v4048_v26, %v3499_v27 }
  0x33   :  { %339 = vmatpush.bf16.msra.mxu0 %v3522_v4  ;;  %v4107_v33 = vld [vmem:[#allocation8 + $0xe4] sm:$0xf]  ;;  %v3731_v34 = vld [vmem:[#allocation8 + $0xf0] sm:$0xf0]  ;;  %v4703_v38 = vor.u32 %v4109_v30, %v3729_v29  ;;  %v4108_v39 = vld [vmem:[#allocation8 + $0xec] sm:$0xf]  ;;  %v128_v42 = vpack.c.bf16 %v121_v32, %v120_v28 }
  0x34   :  { %368 = vmatpush.bf16.msra.mxu1 %v3526_v5  ;;  %v3737_v40 = vld [vmem:[#allocation8 + $0xe8] sm:$0xf]  ;;  %v4110_v41 = vld [vmem:[#allocation8 + $0xf4] sm:$0xf0]  ;;  %v4705_v43 = vor.u32 %v4107_v33, %v3731_v34  ;;  %v3739_v44 = vld [vmem:[#allocation8 + $0xf8] sm:$0xf0] }
  0x35   :  { %397 = vmatpush.bf16.msra.mxu2 %v3530_v6  ;;  %426 = vmatpush.bf16.msra.mxu3 %v3534_v10  ;;  %v3713_v45 = vld [vmem:[#allocation8 + $0xc0] sm:$0xf]  ;;  %v4105_v46 = vld [vmem:[#allocation8 + $0xcc] sm:$0xf0]  ;;  %v4103_v47 = vld [vmem:[#allocation8 + $0xc4] sm:$0xf]  ;;  %v4707_v49 = vor.u32 %v4110_v41, %v3737_v40  ;;  %v4710_v50 = vor.u32 %v4108_v39, %v3739_v44 }
  0x36   :  { %v3715_v48 = vld [vmem:[#allocation8 + $0xd0] sm:$0xf0]  ;;  %v4712_v51 = vor.u32 %v4105_v46, %v3713_v45  ;;  %v4104_v52 = vld [vmem:[#allocation8 + $0xcc] sm:$0xf]  ;;  %v3721_v53 = vld [vmem:[#allocation8 + $0xc8] sm:$0xf] }
  0x37   :  { %340 = vmatpush.bf16.msra.mxu0 %v3506_v16  ;;  %v4106_v54 = vld [vmem:[#allocation8 + $0xd4] sm:$0xf0]  ;;  %v4715_v55 = vor.u32 %v4103_v47, %v3715_v48  ;;  %v3723_v56 = vld [vmem:[#allocation8 + $0xd8] sm:$0xf0]  ;;  %v3697_v57 = vld [vmem:[#allocation8 + $0xa0] sm:$0xf] }
  0x38   :  { %369 = vmatpush.bf16.msra.mxu1 %v3510_v19  ;;  %v4101_v58 = vld [vmem:[#allocation8 + $0xac] sm:$0xf0]  ;;  %v4099_v59 = vld [vmem:[#allocation8 + $0xa4] sm:$0xf]  ;;  %v3699_v60 = vld [vmem:[#allocation8 + $0xb0] sm:$0xf0]  ;;  %v4718_v61 = vor.u32 %v4106_v54, %v3721_v53  ;;  %v4722_v62 = vor.u32 %v4104_v52, %v3723_v56 }
  0x39   :  { %398 = vmatpush.bf16.msra.mxu2 %v3514_v20  ;;  %427 = vmatpush.bf16.msra.mxu3 %v3518_v24  ;;  %v4724_v63 = vor.u32 %v4101_v58, %v3697_v57  ;;  %v4100_v0 = vld [vmem:[#allocation8 + $0xac] sm:$0xf]  ;;  %v3705_v1 = vld [vmem:[#allocation8 + $0xa8] sm:$0xf]  ;;  %v4102_v2 = vld [vmem:[#allocation8 + $0xb4] sm:$0xf0]  ;;  %v4727_v3 = vor.u32 %v4099_v59, %v3699_v60 }
  0x3a   :  { %v3707_v4 = vld [vmem:[#allocation8 + $0xb8] sm:$0xf0]  ;;  %v3681_v5 = vld [vmem:[#allocation8 + $0x80] sm:$0xf]  ;;  %v4097_v6 = vld [vmem:[#allocation8 + $0x8c] sm:$0xf0]  ;;  %v4730_v9 = vor.u32 %v4102_v2, %v3705_v1 }
  0x3b   :  { %341 = vmatpush.bf16.msra.mxu0 %v3490_v31  ;;  %v4095_v7 = vld [vmem:[#allocation8 + $0x84] sm:$0xf]  ;;  %v3683_v8 = vld [vmem:[#allocation8 + $0x90] sm:$0xf0]  ;;  %v4734_v11 = vor.u32 %v4100_v0, %v3707_v4  ;;  %v4736_v12 = vor.u32 %v4097_v6, %v3681_v5  ;;  %v4096_v13 = vld [vmem:[#allocation8 + $0x8c] sm:$0xf] }
  0x3c   :  { %370 = vmatpush.bf16.msra.mxu1 %v3494_v35  ;;  %v122_v10 = vld [vmem:[#allocation3 + $0x10] sm:$0xff]  ;;  %v3689_v14 = vld [vmem:[#allocation8 + $0x88] sm:$0xf]  ;;  %v4098_v15 = vld [vmem:[#allocation8 + $0x94] sm:$0xf0]  ;;  %v4739_v16 = vor.u32 %v4095_v7, %v3683_v8 }
  0x3d   :  { %399 = vmatpush.bf16.msra.mxu2 %v3498_v36  ;;  %428 = vmatpush.bf16.msra.mxu3 %v3502_v37  ;;  %v3691_v17 = vld [vmem:[#allocation8 + $0x98] sm:$0xf0]  ;;  %v3665_v18 = vld [vmem:[#allocation8 + $0x60] sm:$0xf]  ;;  %v4093_v19 = vld [vmem:[#allocation8 + $0x6c] sm:$0xf0]  ;;  %v4742_v23 = vor.u32 %v4098_v15, %v3689_v14 }
  0x3e   :  { %342 = vmatmul.bf16.vlgmr.msra.gmra.mxu0 %v128_v42  ;;  %v123_v20 = vld [vmem:[#allocation3 + $0x18] sm:$0xff]  ;;  %v4091_v21 = vld [vmem:[#allocation8 + $0x64] sm:$0xf]  ;;  %v3667_v22 = vld [vmem:[#allocation8 + $0x70] sm:$0xf0]  ;;  %v4746_v24 = vor.u32 %v4096_v13, %v3691_v17  ;;  %v4748_v25 = vor.u32 %v4093_v19, %v3665_v18 }
  0x3f   :  { %691 = vmatpush.bf16.msrb.mxu0 %v4703_v38  ;;  %371 = vmatmul.bf16.vlgmr.msra.gmra.mxu1 %v128_v42  ;;  %v4092_v26 = vld [vmem:[#allocation8 + $0x6c] sm:$0xf]  ;;  %v3673_v27 = vld [vmem:[#allocation8 + $0x68] sm:$0xf]  ;;  %v4094_v28 = vld [vmem:[#allocation8 + $0x74] sm:$0xf0]  ;;  %v129_v29 = vpack.c.bf16 %v123_v20, %v122_v10  ;;  %v4751_v30 = vor.u32 %v4091_v21, %v3667_v22 }
  0x40   :  { %704 = vmatpush.bf16.msrb.mxu1 %v4705_v43  ;;  %400 = vmatmul.bf16.vlgmr.msra.gmra.mxu2 %v128_v42  ;;  %v3675_v31 = vld [vmem:[#allocation8 + $0x78] sm:$0xf0]  ;;  %v3649_v32 = vld [vmem:[#allocation8 + $0x40] sm:$0xf]  ;;  %v4089_v33 = vld [vmem:[#allocation8 + $0x4c] sm:$0xf0]  ;;  %v4754_v36 = vor.u32 %v4094_v28, %v3673_v27 }
  0x41   :  { %429 = vmatmul.bf16.vlgmr.msra.gmra.mxu3 %v128_v42  ;;  %717 = vmatpush.bf16.msrb.mxu2 %v4707_v49  ;;  %v4087_v34 = vld [vmem:[#allocation8 + $0x44] sm:$0xf]  ;;  %v3651_v35 = vld [vmem:[#allocation8 + $0x50] sm:$0xf0]  ;;  %v4758_v37 = vor.u32 %v4092_v26, %v3675_v31  ;;  %v4760_v39 = vor.u32 %v4089_v33, %v3649_v32  ;;  %v4088_v41 = vld [vmem:[#allocation8 + $0x4c] sm:$0xf] }
  0x42   :  { %730 = vmatpush.bf16.msrb.mxu3 %v4710_v50  ;;  %v4763_v40 = vor.u32 %v4087_v34, %v3651_v35  ;;  %v3659_v42 = vld [vmem:[#allocation8 + $0x58] sm:$0xf0]  ;;  %v3633_v44 = vld [vmem:[#allocation8 + $0x20] sm:$0xf]  ;;  %v4085_v45 = vld [vmem:[#allocation8 + $0x2c] sm:$0xf0] }
  0x43   :  { %692 = vmatpush.bf16.msrb.mxu0 %v4712_v51  ;;  %6392 = vst [vmem:[#allocation20_spill] sm:$0xff] %v4758_v37  ;;  %v4083_v46 = vld [vmem:[#allocation8 + $0x24] sm:$0xf]  ;;  %v4768_v47 = vor.u32 %v4088_v41, %v3659_v42  ;;  %v4770_v48 = vor.u32 %v4085_v45, %v3633_v44  ;;  %v3635_v52 = vld [vmem:[#allocation8 + $0x30] sm:$0xf0]  ;;  %v125_v19 = vld [vmem:[#allocation3 + $0x28] sm:$0xff] }
  0x44   :  { %705 = vmatpush.bf16.msrb.mxu1 %v4715_v55  ;;  %6393 = vst [vmem:[#allocation21_spill] sm:$0xff] %v4763_v40  ;;  %v3657_v53 = vld [vmem:[#allocation8 + $0x48] sm:$0xf]  ;;  %v4090_v54 = vld [vmem:[#allocation8 + $0x54] sm:$0xf0]  ;;  %v4773_v56 = vor.u32 %v4083_v46, %v3635_v52  ;;  %v124_v18 = vld [vmem:[#allocation3 + $0x20] sm:$0xff] }
  0x45   :  { %718 = vmatpush.bf16.msrb.mxu2 %v4718_v61  ;;  %6394 = vst [vmem:[#allocation22_spill] sm:$0xff] %v4768_v47  ;;  %v4775_v57 = vor.u32 %v4090_v54, %v3657_v53  ;;  %v4084_v58 = vld [vmem:[#allocation8 + $0x2c] sm:$0xf]  ;;  %v3643_v59 = vld [vmem:[#allocation8 + $0x38] sm:$0xf0]  ;;  %v130_v22 = vpack.c.bf16 %v125_v19, %v124_v18  ;;  %v126_v26 = vld [vmem:[#allocation3 + $0x30] sm:$0xff] }
  0x46   :  { %731 = vmatpush.bf16.msrb.mxu3 %v4722_v62  ;;  %6395 = vst [vmem:[#allocation23_spill] sm:$0xff] %v4770_v48  ;;  %v3617_v60 = vld [vmem:[#allocation8] sm:$0xf]  ;;  %v4081_v0 = vld [vmem:[#allocation8 + $0xc] sm:$0xf0]  ;;  %v4780_v6 = vor.u32 %v4084_v58, %v3643_v59  ;;  %v127_v27 = vld [vmem:[#allocation3 + $0x38] sm:$0xff] }
  0x47   :  { %693 = vmatpush.bf16.msrb.mxu0 %v4724_v63  ;;  %6396 = vst [vmem:[#allocation24_spill] sm:$0xff] %v4775_v57  ;;  %v4079_v1 = vld [vmem:[#allocation8 + $0x4] sm:$0xf]  ;;  %v3619_v2 = vld [vmem:[#allocation8 + $0x10] sm:$0xf0]  ;;  %v4782_v7 = vor.u32 %v4081_v0, %v3617_v60  ;;  %v131_v28 = vpack.c.bf16 %v127_v27, %v126_v26 }
  0x48   :  { %706 = vmatpush.bf16.msrb.mxu1 %v4727_v3  ;;  %v3641_v4 = vld [vmem:[#allocation8 + $0x28] sm:$0xf]  ;;  %v4086_v5 = vld [vmem:[#allocation8 + $0x34] sm:$0xf0]  ;;  %v4787_v14 = vor.u32 %v4079_v1, %v3619_v2  ;;  %v4080_v15 = vld [vmem:[#allocation8 + $0xc] sm:$0xf] }
  0x49   :  { %719 = vmatpush.bf16.msrb.mxu2 %v4730_v9  ;;  %v4784_v8 = vor.u32 %v4086_v5, %v3641_v4  ;;  %v3625_v10 = vld [vmem:[#allocation8 + $0x8] sm:$0xf]  ;;  %v4082_v13 = vld [vmem:[#allocation8 + $0x14] sm:$0xf0]  ;;  %v3627_v17 = vld [vmem:[#allocation8 + $0x18] sm:$0xf0] }
  0x4a   :  { %732 = vmatpush.bf16.msrb.mxu3 %v4734_v11  ;;  %v4790_v20 = vor.u32 %v4082_v13, %v3625_v10  ;;  %v4794_v21 = vor.u32 %v4080_v15, %v3627_v17  ;;  %v3860_v33 = vld [vmem:[#allocation12 + $0xe0] sm:$0xf]  ;;  %v4173_v34 = vld [vmem:[#allocation12 + $0xec] sm:$0xf0]  ;;  %v4171_v35 = vld [vmem:[#allocation12 + $0xe4] sm:$0xf] }
  0x4b   :  { %694 = vmatpush.bf16.msrb.mxu0 %v4736_v12  ;;  %v4807_v41 = vor.u32 %v4173_v34, %v3860_v33  ;;  %v3862_v42 = vld [vmem:[#allocation12 + $0xf0] sm:$0xf0]  ;;  %v3868_v44 = vld [vmem:[#allocation12 + $0xe8] sm:$0xf]  ;;  %v4174_v45 = vld [vmem:[#allocation12 + $0xf4] sm:$0xf0] }
  0x4c   :  { %707 = vmatpush.bf16.msrb.mxu1 %v4739_v16  ;;  %v4809_v46 = vor.u32 %v4171_v35, %v3862_v42  ;;  %v4811_v52 = vor.u32 %v4174_v45, %v3868_v44  ;;  %v4172_v53 = vld [vmem:[#allocation12 + $0xec] sm:$0xf]  ;;  %v3870_v54 = vld [vmem:[#allocation12 + $0xf8] sm:$0xf0]  ;;  %v3844_v1 = vld [vmem:[#allocation12 + $0xc0] sm:$0xf] }
  0x4d   :  { %720 = vmatpush.bf16.msrb.mxu2 %v4742_v23  ;;  %v4814_v58 = vor.u32 %v4172_v53, %v3870_v54  ;;  %v4169_v2 = vld [vmem:[#allocation12 + $0xcc] sm:$0xf0]  ;;  %v4167_v4 = vld [vmem:[#allocation12 + $0xc4] sm:$0xf]  ;;  %v3846_v13 = vld [vmem:[#allocation12 + $0xd0] sm:$0xf0] }
  0x4e   :  { %733 = vmatpush.bf16.msrb.mxu3 %v4746_v24  ;;  %347 = vmatmul.bf16.gmra.mxu0 %v129_v29  ;;  %v4827_v10 = vor.u32 %v4169_v2, %v3844_v1  ;;  %v3852_v15 = vld [vmem:[#allocation12 + $0xc8] sm:$0xf]  ;;  %v4170_v17 = vld [vmem:[#allocation12 + $0xd4] sm:$0xf0]  ;;  %v4829_v18 = vld [vmem:[#allocation9] sm:$0xf]  ;;  %v4831_v19 = vor.u32 %v4167_v4, %v3846_v13 }
  0x4f   :  { %695 = vmatpush.bf16.msrb.mxu0 %v4748_v25  ;;  %376 = vmatmul.bf16.gmra.mxu1 %v129_v29  ;;  %6397 = vst [vmem:[#allocation25_spill] sm:$0xff] %v4814_v58  ;;  %v4168_v26 = vld [vmem:[#allocation12 + $0xcc] sm:$0xf]  ;;  %v3854_v27 = vld [vmem:[#allocation12 + $0xd8] sm:$0xf0] }
  0x50   :  { %708 = vmatpush.bf16.msrb.mxu1 %v4751_v30  ;;  %405 = vmatmul.bf16.gmra.mxu2 %v129_v29  ;;  %6400 = vst [vmem:[#allocation28_spill] sm:$0xff] %v4827_v10  ;;  %v4836_v33 = vor.u32 %v4168_v26, %v3854_v27  ;;  %v4165_v34 = vld [vmem:[#allocation12 + $0xac] sm:$0xf0]  ;;  %v4163_v35 = vld [vmem:[#allocation12 + $0xa4] sm:$0xf] }
  0x51   :  { %434 = vmatmul.bf16.gmra.mxu3 %v129_v29  ;;  %721 = vmatpush.bf16.msrb.mxu2 %v4754_v36  ;;  %v6239_v29 = vmov 0   ;;  %6401 = vst [vmem:[#allocation29_spill] sm:$0xff] %v4831_v19  ;;  %v3830_v42 = vld [vmem:[#allocation12 + $0xb0] sm:$0xf0]  ;;  %v3836_v53 = vld [vmem:[#allocation12 + $0xa8] sm:$0xf] }
  0x52   :  { %734 = vmatpush.bf16.msrb.mxu3 %v4758_v37  ;;  %6403 = vst [vmem:[#allocation31_spill] sm:$0xff] %v4836_v33  ;;  %v4842_v45 = vor.u32 %v4163_v35, %v3830_v42  ;;  %v4166_v54 = vld [vmem:[#allocation12 + $0xb4] sm:$0xf0]  ;;  %v4164_v1 = vld [vmem:[#allocation12 + $0xac] sm:$0xf] }
  0x53   :  { %696 = vmatpush.bf16.msrb.mxu0 %v4760_v39  ;;  %v4845_v2 = vor.u32 %v4166_v54, %v3836_v53  ;;  %v3838_v4 = vld [vmem:[#allocation12 + $0xb8] sm:$0xf0]  ;;  %v4161_v35 = vld [vmem:[#allocation12 + $0x8c] sm:$0xf0]  ;;  %v4159_v42 = vld [vmem:[#allocation12 + $0x84] sm:$0xf] }
  0x54   :  { %709 = vmatpush.bf16.msrb.mxu1 %v4763_v40  ;;  %6405 = vst [vmem:[#allocation33_spill] sm:$0xff] %v4842_v45  ;;  %v4847_v13 = vor.u32 %v4164_v1, %v3838_v4  ;;  %v3814_v4 = vld [vmem:[#allocation12 + $0x90] sm:$0xf0] }
  0x55   :  { %722 = vmatpush.bf16.msrb.mxu2 %v4775_v57  ;;  %6406 = vst [vmem:[#allocation34_spill] sm:$0xff] %v4845_v2 }
  0x56   :  { %735 = vmatpush.bf16.msrb.mxu3 %v4768_v47  ;;  %6407 = vst [vmem:[#allocation35_spill] sm:$0xff] %v4847_v13 }
  0x57   :  { %697 = vmatpush.bf16.msrb.mxu0 %v4770_v48 }
  0x58   :  { %710 = vmatpush.bf16.msrb.mxu1 %v4773_v56 }
  0x59   :  { %723 = vmatpush.bf16.msrb.mxu2 %v4784_v8 }
  0x5a   :  { %736 = vmatpush.bf16.msrb.mxu3 %v4780_v6 }
  0x5b   :  { %698 = vmatpush.bf16.msrb.mxu0 %v4782_v7 }
  0x5c   :  { %711 = vmatpush.bf16.msrb.mxu1 %v4787_v14 }
  0x5d   :  { %724 = vmatpush.bf16.msrb.mxu2 %v4790_v20 }
  0x5e   :  { %737 = vmatpush.bf16.msrb.mxu3 %v4794_v21  ;;  %352 = vmatmul.bf16.gmra.mxu0 %v130_v22 }
  0x5f   :  { %381 = vmatmul.bf16.gmra.mxu1 %v130_v22  ;;  %1035 = vmatpush.bf16.msra.mxu0 %v4807_v41 }
  0x60   :  { %410 = vmatmul.bf16.gmra.mxu2 %v130_v22  ;;  %1048 = vmatpush.bf16.msra.mxu1 %v4809_v46 }
  0x61   :  { %439 = vmatmul.bf16.gmra.mxu3 %v130_v22  ;;  %1061 = vmatpush.bf16.msra.mxu2 %v4811_v52  ;;  %v4833_v22 = vor.u32 %v4170_v17, %v3852_v15  ;;  %v4850_v15 = vperm.slane %v4829_v18, 0  ;;  %v4853_v17 = vperm.slane %v4829_v18, 1 }
  0x62   :  { %1074 = vmatpush.bf16.msra.mxu3 %v4814_v58 }
  0x63   :  { %6402 = vst [vmem:[#allocation30_spill] sm:$0xff] %v4833_v22  ;;  %1036 = vmatpush.bf16.msra.mxu0 %v4827_v10 }
  0x64   :  { %1049 = vmatpush.bf16.msra.mxu1 %v4831_v19  ;;  %6408 = vst [vmem:[#allocation36_spill] sm:$0xff] %v4850_v15 }
  0x65   :  { %1062 = vmatpush.bf16.msra.mxu2 %v4833_v22  ;;  %6409 = vst [vmem:[#allocation37_spill] sm:$0xff] %v4853_v17 }
  0x66   :  { %1075 = vmatpush.bf16.msra.mxu3 %v4836_v33  ;;  %v3766_v33 = vld [vmem:[#allocation12 + $0x30] sm:$0xf0] }
  0x68   :  { %1050 = vmatpush.bf16.msra.mxu1 %v4842_v45  ;;  %v3822_v45 = vld [vmem:[#allocation12 + $0x98] sm:$0xf0] }
  0x69   :  { %1063 = vmatpush.bf16.msra.mxu2 %v4845_v2  ;;  %v4160_v2 = vld [vmem:[#allocation12 + $0x8c] sm:$0xf] }
  0x6a   :  { %1076 = vmatpush.bf16.msra.mxu3 %v4847_v13  ;;  %v3764_v13 = vld [vmem:[#allocation12 + $0x20] sm:$0xf] }
  0x6e   :  { %357 = vmatmul.bf16.gmra.mxu0 %v131_v28 }
  0x6f   :  { %386 = vmatmul.bf16.gmra.mxu1 %v131_v28 }
  0x70   :  { %415 = vmatmul.bf16.gmra.mxu2 %v131_v28 }
  0x71   :  { %444 = vmatmul.bf16.gmra.mxu3 %v131_v28  ;;  %v3828_v28 = vld [vmem:[#allocation12 + $0xa0] sm:$0xf] }
  0x72   :  { %v4840_v44 = vor.u32 %v4165_v34, %v3828_v28  ;;  %v3812_v34 = vld [vmem:[#allocation12 + $0x80] sm:$0xf] }
  0x73   :  { %v4866_v1 = vor.u32 %v4161_v35, %v3812_v34  ;;  %v4155_v34 = vld [vmem:[#allocation12 + $0x64] sm:$0xf]  ;;  %v3798_v35 = vld [vmem:[#allocation12 + $0x70] sm:$0xf0] }
  0x74   :  { %6404 = vst [vmem:[#allocation32_spill] sm:$0xff] %v4840_v44  ;;  %1037 = vmatpush.bf16.msra.mxu0 %v4840_v44  ;;  %v3796_v44 = vld [vmem:[#allocation12 + $0x60] sm:$0xf] }
  0x75   :  { %6413 = vst [vmem:[#allocation41_spill] sm:$0xff] %v4866_v1 }
  0x78   :  { %1038 = vmatpush.bf16.msra.mxu0 %v4866_v1 }
  0x7e   :  { %699 = vmatmul.bf16.vlgmr.msrb.gmra.mxu0 %v6239_v29 }
  0x7f   :  { %712 = vmatmul.bf16.vlgmr.msrb.gmra.mxu1 %v6239_v29 }
  0x80   :  { %725 = vmatmul.bf16.vlgmr.msrb.gmra.mxu2 %v6239_v29 }
  0x81   :  { %738 = vmatmul.bf16.vlgmr.msrb.gmra.mxu3 %v6239_v29  ;;  %v3820_v29 = vld [vmem:[#allocation12 + $0x88] sm:$0xf] }
  0xbb   :  { %v4803_v31 = vpop.f32.mrf.mxu0 }
  0xbc   :  { %v4805_v32 = vpop.f32.mrf.mxu1 }
  0xc3   :  { %v4818_v59 = vpop.f32.mrf.mxu2  ;;  %v4823_v0 = vpop.f32.mrf.mxu0 }
  0xc4   :  { %v4821_v60 = vpop.f32.mrf.mxu3  ;;  %6398 = vst [vmem:[#allocation26_spill] sm:$0xff] %v4823_v0  ;;  %v4825_v5 = vpop.f32.mrf.mxu1 }
  0xc5   :  { %6399 = vst [vmem:[#allocation27_spill] sm:$0xff] %v4825_v5  ;;  %v4871_v5 = vor.u32 %v4159_v42, %v3814_v4  ;;  %v4882_v42 = vor.u32 %v4155_v34, %v3798_v35  ;;  %v4156_v4 = vld [vmem:[#allocation12 + $0x6c] sm:$0xf] }
  0xc7   :  { %6415 = vst [vmem:[#allocation43_spill] sm:$0xff] %v4871_v5  ;;  %1051 = vmatpush.bf16.msra.mxu1 %v4871_v5  ;;  %v4893_v5 = vperm.slane %v4829_v18, 3 }
  0xc8   :  { %6419 = vst [vmem:[#allocation47_spill] sm:$0xff] %v4882_v42 }
  0xc9   :  { %6423 = vst [vmem:[#allocation51_spill] sm:$0xff] %v4893_v5 }
  0xcb   :  { %v4855_v26 = vpop.f32.mrf.mxu2  ;;  %v348_v28 = vpop.f32.mrf.mxu0  ;;  %1052 = vmatpush.bf16.msra.mxu1 %v4882_v42 }
  0xcc   :  { %6410 = vst [vmem:[#allocation38_spill] sm:$0xff] %v4855_v26  ;;  %v4858_v27 = vpop.f32.mrf.mxu3  ;;  %v4863_v53 = vadd.f32 %v348_v28, %v4850_v15  ;;  %v377_v54 = vpop.f32.mrf.mxu1  ;;  %v4162_v26 = vld [vmem:[#allocation12 + $0x94] sm:$0xf0]  ;;  %v4876_v28 = vor.u32 %v4160_v2, %v3822_v45  ;;  %v3806_v45 = vld [vmem:[#allocation12 + $0x78] sm:$0xf0]  ;;  %v4888_v2 = vperm.slane %v4829_v18, 2 }
  0xcd   :  { %6411 = vst [vmem:[#allocation39_spill] sm:$0xff] %v4858_v27  ;;  %v4869_v27 = vadd.f32 %v377_v54, %v4853_v17  ;;  %v4873_v0 = vor.u32 %v4162_v26, %v3820_v29  ;;  %v3804_v29 = vld [vmem:[#allocation12 + $0x68] sm:$0xf]  ;;  %v4158_v26 = vld [vmem:[#allocation12 + $0x74] sm:$0xf0]  ;;  %v4890_v1 = vor.u32 %v4156_v4, %v3806_v45 }
  0xce   :  { %6412 = vst [vmem:[#allocation40_spill] sm:$0xff] %v4863_v53  ;;  %v4157_v53 = vld [vmem:[#allocation12 + $0x6c] sm:$0xf0]  ;;  %1077 = vmatpush.bf16.msra.mxu3 %v4876_v28  ;;  %v4151_v4 = vld [vmem:[#allocation12 + $0x44] sm:$0xf] }
  0xcf   :  { %6414 = vst [vmem:[#allocation42_spill] sm:$0xff] %v4869_v27  ;;  %1064 = vmatpush.bf16.msra.mxu2 %v4873_v0  ;;  %v4880_v54 = vor.u32 %v4157_v53, %v3796_v44  ;;  %v4885_v27 = vor.u32 %v4158_v26, %v3804_v29  ;;  %v3780_v29 = vld [vmem:[#allocation12 + $0x40] sm:$0xf]  ;;  %v4153_v26 = vld [vmem:[#allocation12 + $0x4c] sm:$0xf0] }
  0xd0   :  { %6416 = vst [vmem:[#allocation44_spill] sm:$0xff] %v4873_v0  ;;  %v3790_v0 = vld [vmem:[#allocation12 + $0x58] sm:$0xf0] }
  0xd1   :  { %6417 = vst [vmem:[#allocation45_spill] sm:$0xff] %v4876_v28  ;;  %1039 = vmatpush.bf16.msra.mxu0 %v4880_v54  ;;  %v4154_v28 = vld [vmem:[#allocation12 + $0x54] sm:$0xf0] }
  0xd2   :  { %6418 = vst [vmem:[#allocation46_spill] sm:$0xff] %v4880_v54  ;;  %1078 = vmatpush.bf16.msra.mxu3 %v4890_v1  ;;  %v4909_v54 = vor.u32 %v4153_v26, %v3780_v29 }
  0xd3   :  { %6420 = vst [vmem:[#allocation48_spill] sm:$0xff] %v4885_v27  ;;  %v406_v44 = vpop.f32.mrf.mxu2  ;;  %v4899_v35 = vpop.f32.mrf.mxu0  ;;  %1065 = vmatpush.bf16.msra.mxu2 %v4885_v27  ;;  %v4152_v27 = vld [vmem:[#allocation12 + $0x4c] sm:$0xf] }
  0xd4   :  { %6421 = vst [vmem:[#allocation49_spill] sm:$0xff] %v4888_v2  ;;  %v4897_v53 = vadd.f32 %v406_v44, %v4888_v2  ;;  %v435_v34 = vpop.f32.mrf.mxu3  ;;  %v4906_v18 = vpop.f32.mrf.mxu1  ;;  %v3782_v44 = vld [vmem:[#allocation12 + $0x50] sm:$0xf0] }
  0xd5   :  { %6422 = vst [vmem:[#allocation50_spill] sm:$0xff] %v4890_v1  ;;  %v4904_v45 = vadd.f32 %v435_v34, %v4893_v5  ;;  %1040 = vmatpush.bf16.msra.mxu0 %v4909_v54  ;;  %v4916_v34 = vor.u32 %v4152_v27, %v3790_v0  ;;  %v3774_v0 = vld [vmem:[#allocation12 + $0x38] sm:$0xf0]  ;;  %v3988_v1 = vld [vmem:[#allocation11 + $0xe0] sm:$0xf] }
  0xd6   :  { %6424 = vst [vmem:[#allocation52_spill] sm:$0xff] %v4897_v53  ;;  %v3788_v53 = vld [vmem:[#allocation12 + $0x48] sm:$0xf] }
  0xd7   :  { %6425 = vst [vmem:[#allocation53_spill] sm:$0xff] %v4899_v35  ;;  %v4911_v35 = vor.u32 %v4151_v4, %v3782_v44  ;;  %v4913_v42 = vor.u32 %v4154_v28, %v3788_v53  ;;  %v3772_v28 = vld [vmem:[#allocation12 + $0x28] sm:$0xf]  ;;  %v4150_v53 = vld [vmem:[#allocation12 + $0x34] sm:$0xf0]  ;;  %1079 = vmatpush.bf16.msra.mxu3 %v4916_v34 }
  0xd8   :  { %6426 = vst [vmem:[#allocation54_spill] sm:$0xff] %v4904_v45  ;;  %v4149_v45 = vld [vmem:[#allocation12 + $0x2c] sm:$0xf0]  ;;  %v4148_v4 = vld [vmem:[#allocation12 + $0x2c] sm:$0xf]  ;;  %v4925_v44 = vor.u32 %v4150_v53, %v3772_v28 }
  0xd9   :  { %6427 = vst [vmem:[#allocation55_spill] sm:$0xff] %v4906_v18  ;;  %v4147_v18 = vld [vmem:[#allocation12 + $0x24] sm:$0xf]  ;;  %1053 = vmatpush.bf16.msra.mxu1 %v4911_v35  ;;  %1066 = vmatpush.bf16.msra.mxu2 %v4913_v42  ;;  %v4920_v29 = vor.u32 %v4149_v45, %v3764_v13  ;;  %v4927_v27 = vor.u32 %v4148_v4, %v3774_v0  ;;  %v4145_v45 = vld [vmem:[#allocation12 + $0xc] sm:$0xf0] }
  0xda   :  { %6428 = vst [vmem:[#allocation56_spill] sm:$0xff] %v4909_v54  ;;  %v4922_v26 = vor.u32 %v4147_v18, %v3766_v33  ;;  %v3748_v33 = vld [vmem:[#allocation12] sm:$0xf]  ;;  %v4143_v18 = vld [vmem:[#allocation12 + $0x4] sm:$0xf] }
  0xdb   :  { %6429 = vst [vmem:[#allocation57_spill] sm:$0xff] %v4911_v35  ;;  %v4929_v54 = vpop.f32.mrf.mxu2  ;;  %1041 = vmatpush.bf16.msra.mxu0 %v4920_v29  ;;  %v353_v13 = vpop.f32.mrf.mxu0  ;;  %1080 = vmatpush.bf16.msra.mxu3 %v4927_v27  ;;  %v4940_v4 = vor.u32 %v4145_v45, %v3748_v33  ;;  %v3750_v0 = vld [vmem:[#allocation12 + $0x10] sm:$0xf0]  ;;  %v4139_v33 = vld [vmem:[#allocation11 + $0xe4] sm:$0xf] }
  0xdc   :  { %6430 = vst [vmem:[#allocation58_spill] sm:$0xff] %v4913_v42  ;;  %v4932_v35 = vpop.f32.mrf.mxu3  ;;  %v4937_v28 = vadd.f32 %v353_v13, %v4850_v15  ;;  %v382_v53 = vpop.f32.mrf.mxu1  ;;  %v3758_v42 = vld [vmem:[#allocation12 + $0x18] sm:$0xf0]  ;;  %v3990_v45 = vld [vmem:[#allocation11 + $0xf0] sm:$0xf0] }
  0xdd   :  { %6431 = vst [vmem:[#allocation59_spill] sm:$0xff] %v4916_v34  ;;  %1054 = vmatpush.bf16.msra.mxu1 %v4922_v26  ;;  %1067 = vmatpush.bf16.msra.mxu2 %v4925_v44  ;;  %v4144_v34 = vld [vmem:[#allocation12 + $0xc] sm:$0xf] }
  0xde   :  { %6432 = vst [vmem:[#allocation60_spill] sm:$0xff] %v4920_v29  ;;  %v4146_v29 = vld [vmem:[#allocation12 + $0x14] sm:$0xf0]  ;;  %v4950_v13 = vor.u32 %v4144_v34, %v3758_v42  ;;  %v3998_v42 = vld [vmem:[#allocation11 + $0xf8] sm:$0xf0] }
  0xdf   :  { %6433 = vst [vmem:[#allocation61_spill] sm:$0xff] %v4922_v26  ;;  %v4945_v26 = vor.u32 %v4143_v18, %v3750_v0  ;;  %1042 = vmatpush.bf16.msra.mxu0 %v4940_v4  ;;  %v4956_v18 = vor.u32 %v4139_v33, %v3990_v45  ;;  %v4140_v0 = vld [vmem:[#allocation11 + $0xec] sm:$0xf]  ;;  %v3974_v45 = vld [vmem:[#allocation11 + $0xd0] sm:$0xf0] }
  0xe0   :  { %6434 = vst [vmem:[#allocation62_spill] sm:$0xff] %v4925_v44  ;;  %1081 = vmatpush.bf16.msra.mxu3 %v4950_v13  ;;  %v4963_v34 = vor.u32 %v4140_v0, %v3998_v42 }
  0xe1   :  { %6435 = vst [vmem:[#allocation63_spill] sm:$0xff] %v4927_v27  ;;  %1055 = vmatpush.bf16.msra.mxu1 %v4945_v26 }
  0xe2   :  { %6436 = vst [vmem:[#allocation64_spill] sm:$0xff] %v4929_v54  ;;  %v3756_v54 = vld [vmem:[#allocation12 + $0x8] sm:$0xf] }
  0xe3   :  { %6437 = vst [vmem:[#allocation65_spill] sm:$0xff] %v4932_v35  ;;  %v4943_v35 = vadd.f32 %v382_v53, %v4853_v17  ;;  %v4947_v44 = vor.u32 %v4146_v29, %v3756_v54  ;;  %v3996_v54 = vld [vmem:[#allocation11 + $0xe8] sm:$0xf]  ;;  %v4142_v29 = vld [vmem:[#allocation11 + $0xf4] sm:$0xf0] }
  0xe4   :  { %6438 = vst [vmem:[#allocation66_spill] sm:$0xff] %v4937_v28  ;;  %v4141_v28 = vld [vmem:[#allocation11 + $0xec] sm:$0xf0]  ;;  %1286 = vmatpush.bf16.msrb.mxu3 %v4963_v34  ;;  %v4983_v27 = vpop.f32.mrf.mxu1 }
  0xe5   :  { %6439 = vst [vmem:[#allocation67_spill] sm:$0xff] %v4940_v4  ;;  %1068 = vmatpush.bf16.msra.mxu2 %v4947_v44  ;;  %v4954_v53 = vor.u32 %v4141_v28, %v3988_v1  ;;  %1260 = vmatpush.bf16.msrb.mxu1 %v4956_v18  ;;  %v4135_v1 = vld [vmem:[#allocation11 + $0xc4] sm:$0xf]  ;;  %v411_v28 = vpop.f32.mrf.mxu2  ;;  %v3980_v4 = vld [vmem:[#allocation11 + $0xc8] sm:$0xf] }
  0xe6   :  { %6440 = vst [vmem:[#allocation68_spill] sm:$0xff] %v4943_v35  ;;  %v4959_v35 = vor.u32 %v4142_v29, %v3996_v54  ;;  %v6449_v54 = vmov 0   ;;  %v4970_v29 = vadd.f32 %v411_v28, %v4888_v2  ;;  %v4975_v0 = vor.u32 %v4135_v1, %v3974_v45  ;;  %v4131_v1 = vld [vmem:[#allocation11 + $0xa4] sm:$0xf] }
  0xe7   :  { %6441 = vst [vmem:[#allocation69_spill] sm:$0xff] %v4945_v26  ;;  %1247 = vmatpush.bf16.msrb.mxu0 %v4954_v53  ;;  %v3972_v26 = vld [vmem:[#allocation11 + $0xc0] sm:$0xf]  ;;  %1056 = vmatmul.bf16.vlgmr.msra.gmra.mxu1 %v6449_v54 }
  0xe8   :  { %6442 = vst [vmem:[#allocation70_spill] sm:$0xff] %v4947_v44  ;;  %v4137_v44 = vld [vmem:[#allocation11 + $0xcc] sm:$0xf0]  ;;  %1043 = vmatmul.bf16.vlgmr.msra.gmra.mxu0 %v6449_v54  ;;  %1082 = vmatmul.bf16.vlgmr.msra.gmra.mxu3 %v6449_v54 }
  0xe9   :  { %6443 = vst [vmem:[#allocation71_spill] sm:$0xff] %v4950_v13  ;;  %1273 = vmatpush.bf16.msrb.mxu2 %v4959_v35  ;;  %v4966_v33 = vor.u32 %v4137_v44, %v3972_v26  ;;  %v4138_v13 = vld [vmem:[#allocation11 + $0xd4] sm:$0xf0]  ;;  %v3982_v26 = vld [vmem:[#allocation11 + $0xd8] sm:$0xf0]  ;;  %1261 = vmatpush.bf16.msrb.mxu1 %v4975_v0 }
  0xea   :  { %6444 = vst [vmem:[#allocation72_spill] sm:$0xff] %v4954_v53  ;;  %v440_v53 = vpop.f32.mrf.mxu3  ;;  %v4977_v42 = vor.u32 %v4138_v13, %v3980_v4  ;;  %1069 = vmatmul.bf16.vlgmr.msra.gmra.mxu2 %v6449_v54  ;;  %v3956_v4 = vld [vmem:[#allocation11 + $0xa0] sm:$0xf]  ;;  %v4133_v13 = vld [vmem:[#allocation11 + $0xac] sm:$0xf0] }
  0xeb   :  { %6445 = vst [vmem:[#allocation73_spill] sm:$0xff] %v4956_v18  ;;  %v4972_v18 = vpop.f32.mrf.mxu0  ;;  %v4981_v44 = vadd.f32 %v440_v53, %v4893_v5  ;;  %1248 = vmatpush.bf16.msrb.mxu0 %v4966_v33  ;;  %v4992_v45 = vor.u32 %v4133_v13, %v3956_v4  ;;  %v3958_v53 = vld [vmem:[#allocation11 + $0xb0] sm:$0xf0]  ;;  %v4132_v54 = vld [vmem:[#allocation11 + $0xac] sm:$0xf] }
  0xec   :  { %6446 = vst [vmem:[#allocation74_spill] sm:$0xff] %v4959_v35  ;;  %v4136_v35 = vld [vmem:[#allocation11 + $0xcc] sm:$0xf]  ;;  %v4129_v4 = vld [vmem:[#allocation11 + $0x8c] sm:$0xf0] }
  0xed   :  { %6447 = vst [vmem:[#allocation75_spill] sm:$0xff] %v4963_v34  ;;  %v4985_v28 = vor.u32 %v4136_v35, %v3982_v26  ;;  %1274 = vmatpush.bf16.msrb.mxu2 %v4977_v42  ;;  %v4995_v35 = vor.u32 %v4131_v1, %v3958_v53  ;;  %v4127_v13 = vld [vmem:[#allocation11 + $0x84] sm:$0xf]  ;;  %v3942_v1 = vld [vmem:[#allocation11 + $0x90] sm:$0xf0] }
  0xee   :  { %6448 = vst [vmem:[#allocation76_spill] sm:$0xff] %v4966_v33  ;;  %v3950_v33 = vld [vmem:[#allocation11 + $0x98] sm:$0xf0] }
  0xef   :  { %6450 = vst [vmem:[#allocation77_spill] sm:$0xff] %v4970_v29  ;;  %1287 = vmatpush.bf16.msrb.mxu3 %v4985_v28  ;;  %v3966_v29 = vld [vmem:[#allocation11 + $0xb8] sm:$0xf0]  ;;  %1249 = vmatpush.bf16.msrb.mxu0 %v4992_v45 }
  0xf0   :  { %6451 = vst [vmem:[#allocation78_spill] sm:$0xff] %v4972_v18  ;;  %v3964_v18 = vld [vmem:[#allocation11 + $0xa8] sm:$0xf]  ;;  %1262 = vmatpush.bf16.msrb.mxu1 %v4995_v35  ;;  %v3918_v34 = vld [vmem:[#allocation11 + $0x58] sm:$0xf0] }
  0xf1   :  { %6452 = vst [vmem:[#allocation79_spill] sm:$0xff] %v4975_v0  ;;  %v5003_v0 = vpop.f32.mrf.mxu2 }
  0xf2   :  { %6453 = vst [vmem:[#allocation80_spill] sm:$0xff] %v4977_v42  ;;  %v3940_v42 = vld [vmem:[#allocation11 + $0x80] sm:$0xf]  ;;  %v5008_v53 = vpop.f32.mrf.mxu3 }
  0xf3   :  { %6454 = vst [vmem:[#allocation81_spill] sm:$0xff] %v4981_v44  ;;  %v4999_v44 = vor.u32 %v4132_v54, %v3966_v29  ;;  %v358_v29 = vpop.f32.mrf.mxu0  ;;  %v5011_v54 = vor.u32 %v4127_v13, %v3942_v1  ;;  %v4125_v13 = vld [vmem:[#allocation11 + $0x6c] sm:$0xf0]  ;;  %v4123_v1 = vld [vmem:[#allocation11 + $0x64] sm:$0xf] }
  0xf4   :  { %6455 = vst [vmem:[#allocation82_spill] sm:$0xff] %v4983_v27  ;;  %v4134_v27 = vld [vmem:[#allocation11 + $0xb4] sm:$0xf0] }
  0xf5   :  { %6456 = vst [vmem:[#allocation83_spill] sm:$0xff] %v4985_v28  ;;  %v4997_v26 = vor.u32 %v4134_v27, %v3964_v18  ;;  %v5006_v28 = vor.u32 %v4129_v4, %v3940_v42  ;;  %v3948_v27 = vld [vmem:[#allocation11 + $0x88] sm:$0xf]  ;;  %v4130_v18 = vld [vmem:[#allocation11 + $0x94] sm:$0xf0]  ;;  %1288 = vmatpush.bf16.msrb.mxu3 %v4999_v44  ;;  %1263 = vmatpush.bf16.msrb.mxu1 %v5011_v54 }
  0xf6   :  { %6457 = vst [vmem:[#allocation84_spill] sm:$0xff] %v4992_v45  ;;  %v4128_v45 = vld [vmem:[#allocation11 + $0x8c] sm:$0xf] }
  0xf7   :  { %6458 = vst [vmem:[#allocation85_spill] sm:$0xff] %v4995_v35  ;;  %1275 = vmatpush.bf16.msrb.mxu2 %v4997_v26  ;;  %v5013_v35 = vor.u32 %v4130_v18, %v3948_v27  ;;  %v5018_v42 = vor.u32 %v4128_v45, %v3950_v33  ;;  %1250 = vmatpush.bf16.msrb.mxu0 %v5006_v28  ;;  %v3926_v18 = vld [vmem:[#allocation11 + $0x70] sm:$0xf0] }
  0xf8   :  { %6459 = vst [vmem:[#allocation86_spill] sm:$0xff] %v4997_v26  ;;  %v387_v26 = vpop.f32.mrf.mxu1  ;;  %v5029_v33 = vor.u32 %v4123_v1, %v3926_v18  ;;  %v3910_v1 = vld [vmem:[#allocation11 + $0x50] sm:$0xf0]  ;;  %v3916_v18 = vld [vmem:[#allocation11 + $0x48] sm:$0xf] }
  0xf9   :  { %6460 = vst [vmem:[#allocation87_spill] sm:$0xff] %v4999_v44  ;;  %v5021_v4 = vadd.f32 %v387_v26, %v4853_v17  ;;  %1289 = vmatpush.bf16.msrb.mxu3 %v5018_v42  ;;  %v4124_v26 = vld [vmem:[#allocation11 + $0x6c] sm:$0xf] }
  0xfa   :  { %6461 = vst [vmem:[#allocation88_spill] sm:$0xff] %v5003_v0  ;;  %v5016_v0 = vadd.f32 %v358_v29, %v4850_v15  ;;  %v3932_v29 = vld [vmem:[#allocation11 + $0x68] sm:$0xf]  ;;  %1264 = vmatpush.bf16.msrb.mxu1 %v5029_v33 }
  0xfb   :  { %6462 = vst [vmem:[#allocation89_spill] sm:$0xff] %v5006_v28  ;;  %1276 = vmatpush.bf16.msrb.mxu2 %v5013_v35 }
  0xfc   :  { %6463 = vst [vmem:[#allocation90_spill] sm:$0xff] %v5008_v53  ;;  %v3924_v53 = vld [vmem:[#allocation11 + $0x60] sm:$0xf] }
  0xfd   :  { %6464 = vst [vmem:[#allocation91_spill] sm:$0xff] %v5011_v54  ;;  %v5026_v27 = vor.u32 %v4125_v13, %v3924_v53  ;;  %v4121_v53 = vld [vmem:[#allocation11 + $0x4c] sm:$0xf0]  ;;  %v4119_v13 = vld [vmem:[#allocation11 + $0x44] sm:$0xf]  ;;  %v416_v54 = vpop.f32.mrf.mxu2 }
  0xfe   :  { %6465 = vst [vmem:[#allocation92_spill] sm:$0xff] %v5013_v35  ;;  %v3908_v35 = vld [vmem:[#allocation11 + $0x40] sm:$0xf] }
  0xff   :  { %6466 = vst [vmem:[#allocation93_spill] sm:$0xff] %v5016_v0  ;;  %v4126_v0 = vld [vmem:[#allocation11 + $0x74] sm:$0xf0]  ;;  %1251 = vmatpush.bf16.msrb.mxu0 %v5026_v27  ;;  %v5038_v44 = vor.u32 %v4121_v53, %v3908_v35 }
 0x100   :  { %6467 = vst [vmem:[#allocation94_spill] sm:$0xff] %v5018_v42  ;;  %v5031_v45 = vor.u32 %v4126_v0, %v3932_v29  ;;  %v4122_v0 = vld [vmem:[#allocation11 + $0x54] sm:$0xf0]  ;;  %v5041_v29 = vadd.f32 %v416_v54, %v4888_v2  ;;  %v4120_v42 = vld [vmem:[#allocation11 + $0x4c] sm:$0xf]  ;;  %v5053_v53 = vpop.f32.mrf.mxu1 }
 0x101   :  { %6468 = vst [vmem:[#allocation95_spill] sm:$0xff] %v5021_v4  ;;  %v3934_v4 = vld [vmem:[#allocation11 + $0x78] sm:$0xf0]  ;;  %v3892_v54 = vld [vmem:[#allocation11 + $0x20] sm:$0xf] }
 0x102   :  { %6469 = vst [vmem:[#allocation96_spill] sm:$0xff] %v5026_v27  ;;  %v5033_v28 = vor.u32 %v4124_v26, %v3934_v4  ;;  %1277 = vmatpush.bf16.msrb.mxu2 %v5031_v45  ;;  %v445_v4 = vpop.f32.mrf.mxu3  ;;  %v5043_v26 = vpop.f32.mrf.mxu0  ;;  %v5048_v27 = vor.u32 %v4122_v0, %v3916_v18  ;;  %v3900_v18 = vld [vmem:[#allocation11 + $0x28] sm:$0xf]  ;;  %v4118_v0 = vld [vmem:[#allocation11 + $0x34] sm:$0xf0] }
 0x103   :  { %6470 = vst [vmem:[#allocation97_spill] sm:$0xff] %v5029_v33  ;;  %v5046_v33 = vor.u32 %v4119_v13, %v3910_v1  ;;  %v5051_v35 = vadd.f32 %v445_v4, %v4893_v5  ;;  %1252 = vmatpush.bf16.msrb.mxu0 %v5038_v44  ;;  %v3894_v1 = vld [vmem:[#allocation11 + $0x30] sm:$0xf0] }
 0x104   :  { %6471 = vst [vmem:[#allocation98_spill] sm:$0xff] %v5031_v45  ;;  %1290 = vmatpush.bf16.msrb.mxu3 %v5033_v28  ;;  %v5055_v45 = vor.u32 %v4120_v42, %v3918_v34  ;;  %v5065_v34 = vor.u32 %v4118_v0, %v3900_v18  ;;  %v4116_v42 = vld [vmem:[#allocation11 + $0x2c] sm:$0xf]  ;;  %v3884_v18 = vld [vmem:[#allocation11 + $0x8] sm:$0xf]  ;;  %v373_v0 = vadd.f32 %v4805_v32, %v4853_v17 }
 0x105   :  { %6472 = vst [vmem:[#allocation99_spill] sm:$0xff] %v5033_v28  ;;  %1265 = vmatpush.bf16.msrb.mxu1 %v5046_v33 }
 0x106   :  { %6473 = vst [vmem:[#allocation100_spill] sm:$0xff] %v5038_v44  ;;  %1278 = vmatpush.bf16.msrb.mxu2 %v5048_v27  ;;  %v5073_v44 = vpop.f32.mrf.mxu2 }
 0x107   :  { %6474 = vst [vmem:[#allocation101_spill] sm:$0xff] %v5041_v29  ;;  %v4115_v29 = vld [vmem:[#allocation11 + $0x24] sm:$0xf] }
 0x108   :  { %6475 = vst [vmem:[#allocation102_spill] sm:$0xff] %v5043_v26  ;;  %v4117_v26 = vld [vmem:[#allocation11 + $0x2c] sm:$0xf0]  ;;  %1291 = vmatpush.bf16.msrb.mxu3 %v5055_v45  ;;  %v5063_v4 = vor.u32 %v4115_v29, %v3894_v1  ;;  %v3878_v1 = vld [vmem:[#allocation11 + $0x10] sm:$0xf0] }
 0x109   :  { %6476 = vst [vmem:[#allocation103_spill] sm:$0xff] %v5046_v33  ;;  %v5060_v13 = vor.u32 %v4117_v26, %v3892_v54  ;;  %v4113_v26 = vld [vmem:[#allocation11 + $0xc] sm:$0xf0]  ;;  %v4111_v54 = vld [vmem:[#allocation11 + $0x4] sm:$0xf]  ;;  %v344_v33 = vadd.f32 %v4803_v31, %v4850_v15 }
 0x10a   :  { %6477 = vst [vmem:[#allocation104_spill] sm:$0xff] %v5048_v27  ;;  %1266 = vmatpush.bf16.msrb.mxu1 %v5063_v4  ;;  %v3876_v27 = vld [vmem:[#allocation11] sm:$0xf]  ;;  %1279 = vmatpush.bf16.msrb.mxu2 %v5065_v34  ;;  %v3886_v15 = vld [vmem:[#allocation11 + $0x18] sm:$0xf0] }
 0x10b   :  { %6478 = vst [vmem:[#allocation105_spill] sm:$0xff] %v5051_v35  ;;  %1253 = vmatpush.bf16.msrb.mxu0 %v5060_v13  ;;  %v5076_v29 = vor.u32 %v4113_v26, %v3876_v27  ;;  %v713_v27 = vpop.f32.mrf.mxu1 }
 0x10c   :  { %6479 = vst [vmem:[#allocation106_spill] sm:$0xff] %v5053_v53  ;;  %v3902_v53 = vld [vmem:[#allocation11 + $0x38] sm:$0xf0] }
 0x10d   :  { %6480 = vst [vmem:[#allocation107_spill] sm:$0xff] %v5055_v45  ;;  %v5067_v35 = vor.u32 %v4116_v42, %v3902_v53  ;;  %v4114_v53 = vld [vmem:[#allocation11 + $0x14] sm:$0xf0]  ;;  %v5080_v42 = vpop.f32.mrf.mxu3  ;;  %v744_v45 = vadd.f32 %v713_v27, %v373_v0 }
 0x10e   :  { %6481 = vst [vmem:[#allocation108_spill] sm:$0xff] %v5060_v13  ;;  %v5083_v13 = vor.u32 %v4111_v54, %v3878_v1  ;;  %v5085_v31 = vor.u32 %v4114_v53, %v3884_v18 }
 0x10f   :  { %6482 = vst [vmem:[#allocation109_spill] sm:$0xff] %v5063_v4  ;;  %v700_v4 = vpop.f32.mrf.mxu0  ;;  %1292 = vmatpush.bf16.msrb.mxu3 %v5067_v35  ;;  %1254 = vmatpush.bf16.msrb.mxu0 %v5076_v29  ;;  %v3744_v54 = vmul.f32 -1.442695, %v744_v45 }
 0x110   :  { %6483 = vst [vmem:[#allocation110_spill] sm:$0xff] %v5065_v34  ;;  %v743_v34 = vadd.f32 %v700_v4, %v344_v33  ;;  %1267 = vmatpush.bf16.msrb.mxu1 %v5083_v13  ;;  %1280 = vmatpush.bf16.msrb.mxu2 %v5085_v31 }
 0x111   :  { %6484 = vst [vmem:[#allocation111_spill] sm:$0xff] %v5067_v35 }
 0x112   :  { %6485 = vst [vmem:[#allocation112_spill] sm:$0xff] %v5073_v44  ;;  %v4112_v44 = vld [vmem:[#allocation11 + $0xc] sm:$0xf]  ;;  %v3743_v32 = vmul.f32 -1.442695, %v743_v34 }
 0x113   :  { %6486 = vst [vmem:[#allocation113_spill] sm:$0xff] %v5076_v29  ;;  %v5087_v26 = vor.u32 %v4112_v44, %v3886_v15  ;;  %1373 = vmatpush.bf16.msra.mxu0 %v4703_v38  ;;  %v431_v15 = vadd.f32 %v4821_v60, %v4893_v5  ;;  %v726_v44 = vpop.f32.mrf.mxu2  ;;  %v715_v34 = vpop.f32.mrf.mxu1 }
 0x114   :  { %6487 = vst [vmem:[#allocation114_spill] sm:$0xff] %v5080_v42  ;;  %1386 = vmatpush.bf16.msra.mxu1 %v4705_v43  ;;  %4187 = vpow2.f32 %v3743_v32  ;;  %1399 = vmatpush.bf16.msra.mxu2 %v4707_v49 }
 0x115   :  { %6488 = vst [vmem:[#allocation115_spill] sm:$0xff] %v5083_v13  ;;  %1293 = vmatpush.bf16.msrb.mxu3 %v5087_v26  ;;  %4189 = vpow2.f32 %v3744_v54  ;;  %v739_v33 = vpop.f32.mrf.mxu3  ;;  %v402_v54 = vadd.f32 %v4818_v59, %v4888_v2 }
 0x116   :  { %6489 = vst [vmem:[#allocation116_spill] sm:$0xff] %v5085_v31  ;;  %v746_v45 = vadd.f32 %v739_v33, %v431_v15 }
 0x117   :  { %6490 = vst [vmem:[#allocation117_spill] sm:$0xff] %v5087_v26  ;;  %1374 = vmatpush.bf16.msra.mxu0 %v4712_v51  ;;  %v702_v4 = vpop.f32.mrf.mxu0 }
 0x118   :  { %1387 = vmatpush.bf16.msra.mxu1 %v4715_v55  ;;  %1400 = vmatpush.bf16.msra.mxu2 %v4718_v61  ;;  %v3745_v18 = vmul.f32 -1.442695, %v746_v45  ;;  %v745_v4 = vadd.f32 %v726_v44, %v402_v54 }
 0x119   :  { %1412 = vmatpush.bf16.msra.mxu3 %v4710_v50 }
 0x11a   :  { %v4188_v1 = vpop.eup %4187  ;;  %4191 = vpow2.f32 %v3745_v18 }
 0x11b   :  { %1375 = vmatpush.bf16.msra.mxu0 %v4724_v63  ;;  %v4190_v53 = vpop.eup %4189  ;;  %v753_v0 = vadd.f32 1.0, %v4188_v1  ;;  %v728_v27 = vpop.f32.mrf.mxu2 }
 0x11c   :  { %1388 = vmatpush.bf16.msra.mxu1 %v4727_v3  ;;  %v754_v60 = vadd.f32 1.0, %v4190_v53  ;;  %1401 = vmatpush.bf16.msra.mxu2 %v4730_v9 }
 0x11d   :  { %1413 = vmatpush.bf16.msra.mxu3 %v4722_v62  ;;  %4193 = vrcp.f32 %v753_v0  ;;  %v741_v32 = vpop.f32.mrf.mxu3  ;;  %v766_v27 = vand.u32 2147483648, %v753_v0  ;;  %v764_v54 = vand.u32 2147483647, %v753_v0  ;;  %vm760_vm2 = vweird.f32 %v753_v0 }
 0x11e   :  { %4195 = vrcp.f32 %v754_v60  ;;  %v781_v44 = vand.u32 2147483648, %v754_v60  ;;  %v779_v42 = vand.u32 2147483647, %v754_v60  ;;  %vm775_vm3 = vweird.f32 %v754_v60 }
 0x11f   :  { %1376 = vmatpush.bf16.msra.mxu0 %v4736_v12  ;;  %vm765_vm5 = vcmp.eq.f32.partialorder %v764_v54, 8.507059e+37 }
 0x120   :  { %1389 = vmatpush.bf16.msra.mxu1 %v4739_v16  ;;  %1402 = vmatpush.bf16.msra.mxu2 %v4742_v23  ;;  %v4192_v15 = vpop.eup %4191  ;;  %vm780_vm7 = vcmp.eq.f32.partialorder %v779_v42, 8.507059e+37 }
 0x121   :  { %1414 = vmatpush.bf16.msra.mxu3 %v4734_v11  ;;  %v789_v45 = vadd.f32 1.0, %v4192_v15 }
 0x123   :  { %1377 = vmatpush.bf16.msra.mxu0 %v4748_v25  ;;  %v4194_v33 = vpop.eup %4193  ;;  %4197 = vrcp.f32 %v789_v45  ;;  %vm795_vm9 = vweird.f32 %v789_v45  ;;  %v799_v42 = vand.u32 2147483647, %v789_v45 }
 0x124   :  { %1390 = vmatpush.bf16.msra.mxu1 %v4751_v30  ;;  %v4196_v34 = vpop.eup %4195  ;;  %v756_v1 = vmul.f32 %v4194_v33, %v753_v0  ;;  %1403 = vmatpush.bf16.msra.mxu2 %v4754_v36  ;;  %4199 = vtanh.f32 %v745_v4  ;;  %vm761_vm0 = vweird.f32 %v4194_v33  ;;  %v767_v4 = vor.u32 1.1754944e-38, %v766_v27 }
 0x125   :  { %1415 = vmatpush.bf16.msra.mxu3 %v4746_v24  ;;  %v771_v18 = vmul.f32 %v4196_v34, %v754_v60  ;;  %vm776_vm1 = vweird.f32 %v4196_v34  ;;  %vm762_vm4 = vmor %vm760_vm2, %vm761_vm0  ;;  %vm800_vm11 = vcmp.eq.f32.partialorder %v799_v42, 8.507059e+37  ;;  %v6504_v42 = vld [vmem:[#allocation56_spill] sm:$0xff] }
 0x126   :  { %v757_v53 = vsub.f32 1.0, %v756_v1  ;;  %vm777_vm6 = vmor %vm775_vm3, %vm776_vm1 }
 0x127   :  { %1378 = vmatpush.bf16.msra.mxu0 %v4760_v39  ;;  %v772_v59 = vsub.f32 1.0, %v771_v18 }
 0x128   :  { %1391 = vmatpush.bf16.msra.mxu1 %v4763_v40  ;;  %v758_v32 = vmul.f32 %v4194_v33, %v757_v53  ;;  %1404 = vmatpush.bf16.msra.mxu2 %v4775_v57  ;;  %v782_v53 = vor.u32 1.1754944e-38, %v781_v44 }
 0x129   :  { %1416 = vmatpush.bf16.msra.mxu3 %v4758_v37  ;;  %v773_v15 = vmul.f32 %v4196_v34, %v772_v59  ;;  %v4198_v1 = vpop.eup %4197 }
 0x12a   :  { %v759_v37 = vadd.f32 %v4194_v33, %v758_v32  ;;  %v791_v57 = vmul.f32 %v4198_v1, %v789_v45  ;;  %v4200_v59 = vpop.eup %4199  ;;  %vm796_vm8 = vweird.f32 %v4198_v1 }
 0x12b   :  { %1379 = vmatpush.bf16.msra.mxu0 %v4770_v48  ;;  %v774_v18 = vadd.f32 %v4196_v34, %v773_v15  ;;  %vm797_vm10 = vmor %vm795_vm9, %vm796_vm8 }
 0x12c   :  { %1392 = vmatpush.bf16.msra.mxu1 %v4773_v56  ;;  %v763_v40 = vsel %vm762_vm4, %v4194_v33, %v759_v37  ;;  %1405 = vmatpush.bf16.msra.mxu2 %v4784_v8 }
 0x12d   :  { %1417 = vmatpush.bf16.msra.mxu3 %v4768_v47  ;;  %v768_v0 = vsel %vm765_vm5, %v767_v4, %v763_v40  ;;  %v778_v32 = vsel %vm777_vm6, %v4196_v34, %v774_v18  ;;  %v792_v47 = vsub.f32 1.0, %v791_v57  ;;  %v801_v40 = vand.u32 2147483648, %v789_v45  ;;  %v6491_v45 = vld [vmem:[#allocation31_spill] sm:$0xff]  ;;  %v6493_v4 = vld [vmem:[#allocation33_spill] sm:$0xff]  ;;  %v6494_v18 = vld [vmem:[#allocation34_spill] sm:$0xff] }
 0x12e   :  { %v783_v48 = vsel %vm780_vm7, %v782_v53, %v778_v32  ;;  %v806_v60 = vmul.f32 %v4200_v59, %v768_v0  ;;  %v6495_v53 = vld [vmem:[#allocation35_spill] sm:$0xff]  ;;  %v6496_v59 = vld [vmem:[#allocation41_spill] sm:$0xff]  ;;  %v6498_v32 = vld [vmem:[#allocation44_spill] sm:$0xff] }
 0x12f   :  { %1380 = vmatpush.bf16.msra.mxu0 %v4782_v7  ;;  %v805_v27 = vmul.f32 0.0, %v783_v48  ;;  %v793_v37 = vmul.f32 %v4198_v1, %v792_v47  ;;  %v802_v34 = vor.u32 1.1754944e-38, %v801_v40  ;;  %v6497_v0 = vld [vmem:[#allocation43_spill] sm:$0xff]  ;;  %v6503_v40 = vld [vmem:[#allocation50_spill] sm:$0xff] }
 0x130   :  { %1393 = vmatpush.bf16.msra.mxu1 %v4787_v14  ;;  %1406 = vmatpush.bf16.msra.mxu2 %v4790_v20 }
 0x131   :  { %1418 = vmatpush.bf16.msra.mxu3 %v4780_v6  ;;  %v5129_v33 = vadd.f32 %v806_v60, %v805_v27  ;;  %v794_v44 = vadd.f32 %v4198_v1, %v793_v37  ;;  %v6499_v60 = vld [vmem:[#allocation45_spill] sm:$0xff]  ;;  %v6500_v27 = vld [vmem:[#allocation46_spill] sm:$0xff]  ;;  %v6501_v37 = vld [vmem:[#allocation47_spill] sm:$0xff] }
 0x133   :  { %4201 = vtanh.f32 %v5129_v33  ;;  %v798_v57 = vsel %vm797_vm10, %v4198_v1, %v794_v44  ;;  %v6492_v1 = vld [vmem:[#allocation32_spill] sm:$0xff] }
 0x134   :  { %v803_v54 = vsel %vm800_vm11, %v802_v34, %v798_v57  ;;  %v6502_v44 = vld [vmem:[#allocation48_spill] sm:$0xff]  ;;  %v6505_v57 = vld [vmem:[#allocation57_spill] sm:$0xff]  ;;  %v6506_v34 = vld [vmem:[#allocation58_spill] sm:$0xff] }
 0x135   :  { %1419 = vmatpush.bf16.msra.mxu3 %v4794_v21 }
 0x139   :  { %v4202_v48 = vpop.eup %4201 }
 0x13a   :  { %v809_v47 = vmul.f32 %v4202_v48, %v803_v54  ;;  %v6507_v48 = vld [vmem:[#allocation59_spill] sm:$0xff]  ;;  %v6508_v54 = vld [vmem:[#allocation60_spill] sm:$0xff] }
 0x13c   :  { %v810_v15 = vpack.c.bf16 %v809_v47, %v809_v47  ;;  %v6509_v47 = vld [vmem:[#allocation61_spill] sm:$0xff] }
 0x13e   :  { %1255 = vmatmul.bf16.vlgmr.msrb.gmra.mxu0 %v810_v15  ;;  %1268 = vmatmul.bf16.vlgmr.msrb.gmra.mxu1 %v810_v15 }
 0x13f   :  { %1281 = vmatmul.bf16.vlgmr.msrb.gmra.mxu2 %v810_v15  ;;  %1294 = vmatmul.bf16.vlgmr.msrb.gmra.mxu3 %v810_v15 }
 0x140   :  { %1494 = vmatpush.bf16.msrb.mxu0 %v4807_v41  ;;  %1507 = vmatpush.bf16.msrb.mxu1 %v4809_v46 }
 0x141   :  { %1520 = vmatpush.bf16.msrb.mxu2 %v4811_v52  ;;  %1533 = vmatpush.bf16.msrb.mxu3 %v4814_v58 }
 0x144   :  { %1495 = vmatpush.bf16.msrb.mxu0 %v4827_v10  ;;  %1508 = vmatpush.bf16.msrb.mxu1 %v4831_v19 }
 0x145   :  { %1521 = vmatpush.bf16.msrb.mxu2 %v4833_v22  ;;  %1534 = vmatpush.bf16.msrb.mxu3 %v6491_v45 }
 0x148   :  { %1496 = vmatpush.bf16.msrb.mxu0 %v6492_v1  ;;  %1509 = vmatpush.bf16.msrb.mxu1 %v6493_v4 }
 0x149   :  { %1522 = vmatpush.bf16.msrb.mxu2 %v6494_v18  ;;  %1535 = vmatpush.bf16.msrb.mxu3 %v6495_v53 }
 0x14c   :  { %1497 = vmatpush.bf16.msrb.mxu0 %v6496_v59  ;;  %1510 = vmatpush.bf16.msrb.mxu1 %v6497_v0 }
 0x14d   :  { %1523 = vmatpush.bf16.msrb.mxu2 %v6498_v32  ;;  %1536 = vmatpush.bf16.msrb.mxu3 %v6499_v60 }
 0x14e   :  { %1381 = vmatmul.bf16.vlgmr.msra.gmra.mxu0 %v810_v15  ;;  %1394 = vmatmul.bf16.vlgmr.msra.gmra.mxu1 %v810_v15 }
 0x14f   :  { %1407 = vmatmul.bf16.vlgmr.msra.gmra.mxu2 %v810_v15  ;;  %1420 = vmatmul.bf16.vlgmr.msra.gmra.mxu3 %v810_v15  ;;  %v6510_v15 = vld [vmem:[#allocation62_spill] sm:$0xff] }
 0x150   :  { %1498 = vmatpush.bf16.msrb.mxu0 %v6500_v27  ;;  %1511 = vmatpush.bf16.msrb.mxu1 %v6501_v37  ;;  %v6511_v27 = vld [vmem:[#allocation63_spill] sm:$0xff] }
 0x151   :  { %1524 = vmatpush.bf16.msrb.mxu2 %v6502_v44  ;;  %1537 = vmatpush.bf16.msrb.mxu3 %v6503_v40  ;;  %v6512_v37 = vld [vmem:[#allocation67_spill] sm:$0xff]  ;;  %v6513_v44 = vld [vmem:[#allocation69_spill] sm:$0xff]  ;;  %v6514_v40 = vld [vmem:[#allocation70_spill] sm:$0xff] }
 0x154   :  { %1499 = vmatpush.bf16.msrb.mxu0 %v6504_v42  ;;  %1512 = vmatpush.bf16.msrb.mxu1 %v6505_v57  ;;  %v6515_v42 = vld [vmem:[#allocation71_spill] sm:$0xff]  ;;  %v6516_v57 = vld [vmem:[#allocation72_spill] sm:$0xff] }
 0x155   :  { %1525 = vmatpush.bf16.msrb.mxu2 %v6506_v34  ;;  %1538 = vmatpush.bf16.msrb.mxu3 %v6507_v48  ;;  %v6517_v34 = vld [vmem:[#allocation73_spill] sm:$0xff]  ;;  %v6518_v48 = vld [vmem:[#allocation74_spill] sm:$0xff] }
 0x158   :  { %1500 = vmatpush.bf16.msrb.mxu0 %v6508_v54  ;;  %1513 = vmatpush.bf16.msrb.mxu1 %v6509_v47  ;;  %v6519_v54 = vld [vmem:[#allocation75_spill] sm:$0xff]  ;;  %v6520_v47 = vld [vmem:[#allocation76_spill] sm:$0xff] }
 0x159   :  { %1526 = vmatpush.bf16.msrb.mxu2 %v6510_v15  ;;  %1539 = vmatpush.bf16.msrb.mxu3 %v6511_v27  ;;  %v6521_v15 = vld [vmem:[#allocation79_spill] sm:$0xff]  ;;  %v6522_v27 = vld [vmem:[#allocation80_spill] sm:$0xff] }
 0x15c   :  { %1501 = vmatpush.bf16.msrb.mxu0 %v6512_v37  ;;  %1514 = vmatpush.bf16.msrb.mxu1 %v6513_v44  ;;  %v6523_v37 = vld [vmem:[#allocation83_spill] sm:$0xff]  ;;  %v6524_v44 = vld [vmem:[#allocation84_spill] sm:$0xff] }
 0x15d   :  { %1527 = vmatpush.bf16.msrb.mxu2 %v6514_v40  ;;  %1540 = vmatpush.bf16.msrb.mxu3 %v6515_v42  ;;  %v6525_v40 = vld [vmem:[#allocation85_spill] sm:$0xff]  ;;  %v6526_v42 = vld [vmem:[#allocation86_spill] sm:$0xff] }
 0x160   :  { %1546 = vmatpush.bf16.msra.mxu0 %v6516_v57  ;;  %1559 = vmatpush.bf16.msra.mxu1 %v6517_v34  ;;  %v6527_v57 = vld [vmem:[#allocation87_spill] sm:$0xff]  ;;  %v6528_v34 = vld [vmem:[#allocation89_spill] sm:$0xff] }
 0x161   :  { %1572 = vmatpush.bf16.msra.mxu2 %v6518_v48  ;;  %1585 = vmatpush.bf16.msra.mxu3 %v6519_v54  ;;  %v6529_v48 = vld [vmem:[#allocation91_spill] sm:$0xff]  ;;  %v6530_v54 = vld [vmem:[#allocation92_spill] sm:$0xff] }
 0x164   :  { %1547 = vmatpush.bf16.msra.mxu0 %v6520_v47  ;;  %1560 = vmatpush.bf16.msra.mxu1 %v6521_v15  ;;  %v6531_v47 = vld [vmem:[#allocation94_spill] sm:$0xff]  ;;  %v6532_v15 = vld [vmem:[#allocation96_spill] sm:$0xff] }
 0x165   :  { %1573 = vmatpush.bf16.msra.mxu2 %v6522_v27  ;;  %1586 = vmatpush.bf16.msra.mxu3 %v6523_v37  ;;  %v6533_v27 = vld [vmem:[#allocation97_spill] sm:$0xff]  ;;  %v6534_v37 = vld [vmem:[#allocation98_spill] sm:$0xff] }
 0x168   :  { %1548 = vmatpush.bf16.msra.mxu0 %v6524_v44  ;;  %1561 = vmatpush.bf16.msra.mxu1 %v6525_v40  ;;  %v6535_v40 = vld [vmem:[#allocation100_spill] sm:$0xff] }
 0x169   :  { %1574 = vmatpush.bf16.msra.mxu2 %v6526_v42  ;;  %1587 = vmatpush.bf16.msra.mxu3 %v6527_v57  ;;  %v6536_v42 = vld [vmem:[#allocation103_spill] sm:$0xff]  ;;  %v1044_v57 = vpop.f32.mrf.mxu0  ;;  %v6539_v44 = vld [vmem:[#allocation108_spill] sm:$0xff] }
 0x16c   :  { %1549 = vmatpush.bf16.msra.mxu0 %v6528_v34  ;;  %1562 = vmatpush.bf16.msra.mxu1 %v6529_v48  ;;  %v6537_v34 = vld [vmem:[#allocation104_spill] sm:$0xff]  ;;  %v6538_v48 = vld [vmem:[#allocation107_spill] sm:$0xff] }
 0x16d   :  { %1575 = vmatpush.bf16.msra.mxu2 %v6530_v54  ;;  %1588 = vmatpush.bf16.msra.mxu3 %v6531_v47  ;;  %v1057_v54 = vpop.f32.mrf.mxu1  ;;  %v6540_v47 = vld [vmem:[#allocation109_spill] sm:$0xff] }
 0x170   :  { %1550 = vmatpush.bf16.msra.mxu0 %v6532_v15  ;;  %1563 = vmatpush.bf16.msra.mxu1 %v6533_v27  ;;  %v6541_v15 = vld [vmem:[#allocation110_spill] sm:$0xff] }
 0x171   :  { %1576 = vmatpush.bf16.msra.mxu2 %v6534_v37  ;;  %1589 = vmatpush.bf16.msra.mxu3 %v5033_v28 }
 0x174   :  { %1551 = vmatpush.bf16.msra.mxu0 %v6535_v40  ;;  %1564 = vmatpush.bf16.msra.mxu1 %v6536_v42  ;;  %v1046_v40 = vpop.f32.mrf.mxu0  ;;  %v1083_v42 = vpop.f32.mrf.mxu3 }
 0x175   :  { %1577 = vmatpush.bf16.msra.mxu2 %v6537_v34  ;;  %1590 = vmatpush.bf16.msra.mxu3 %v6538_v48  ;;  %v1059_v48 = vpop.f32.mrf.mxu1  ;;  %v1070_v34 = vpop.f32.mrf.mxu2 }
 0x178   :  { %1552 = vmatpush.bf16.msra.mxu0 %v6539_v44  ;;  %1565 = vmatpush.bf16.msra.mxu1 %v6540_v47 }
 0x179   :  { %1578 = vmatpush.bf16.msra.mxu2 %v6541_v15  ;;  %1591 = vmatpush.bf16.msra.mxu3 %v5067_v35  ;;  %v482_v15 = vld [vmem:[%s6237_s6] sm:$0xf]  ;;  %s4632_s6 = smov [#allocation14]  }
 0x17a   :  { %v5199_v47 = vperm.slane %v482_v15, 0  ;;  %v5201_v35 = vperm.slane %v482_v15, 1  ;;  %s3465_s8 = sshll.u32 %s4632_s6, 4  ;;  %s3466_s8 = int_to_ptr.vmem [resolvable:$true] %s3465_s8 }
 0x17c   :  { %1553 = vmatpush.bf16.msra.mxu0 %v5076_v29  ;;  %1566 = vmatpush.bf16.msra.mxu1 %v5083_v13  ;;  %v1085_v28 = vpop.f32.mrf.mxu3  ;;  %6542 = vst [vmem:[#allocation118_spill] sm:$0xff] %v5199_v47 }
 0x17d   :  { %1579 = vmatpush.bf16.msra.mxu2 %v5085_v31  ;;  %1592 = vmatpush.bf16.msra.mxu3 %v5087_v26  ;;  %v1072_v44 = vpop.f32.mrf.mxu2  ;;  %6543 = vst [vmem:[#allocation119_spill] sm:$0xff] %v5201_v35  ;;  %v5205_v28 = vperm.slane %v482_v15, 3 }
 0x17f   :  { %6544 = vst [vmem:[#allocation120_spill] sm:$0xff] %v5205_v28 }
 0x1bb   :  { %v1256_v29 = vpop.f32.mrf.mxu0  ;;  %v1269_v13 = vpop.f32.mrf.mxu1 }
 0x1bc   :  { %v1257_v40 = vadd.f32 %v1256_v29, %v1044_v57  ;;  %v1270_v37 = vadd.f32 %v1269_v13, %v1057_v54 }
 0x1be   :  { %v1299_v31 = vadd.f32 %v1257_v40, %v5199_v47  ;;  %v1300_v26 = vadd.f32 %v1270_v37, %v5201_v35  ;;  %v6545_v37 = vld [vmem:[#allocation36_spill] sm:$0xff]  ;;  %v6546_v40 = vld [vmem:[#allocation26_spill] sm:$0xff]  ;;  %v6547_v35 = vld [vmem:[#allocation27_spill] sm:$0xff] }
 0x1c0   :  { %v4002_v48 = vmul.f32 -1.442695, %v1299_v31  ;;  %v4003_v27 = vmul.f32 -1.442695, %v1300_v26 }
 0x1c2   :  { %4203 = vpow2.f32 %v4002_v48  ;;  %v1282_v44 = vpop.f32.mrf.mxu2  ;;  %v1295_v60 = vpop.f32.mrf.mxu3  ;;  %v346_v48 = vadd.f32 %v6546_v40, %v6545_v37 }
 0x1c3   :  { %4205 = vpow2.f32 %v4003_v27  ;;  %v1296_v32 = vadd.f32 %v1295_v60, %v1083_v42  ;;  %v1258_v0 = vpop.f32.mrf.mxu0  ;;  %v1271_v59 = vpop.f32.mrf.mxu1  ;;  %v375_v27 = vadd.f32 %v6547_v35, %v4853_v17  ;;  %v6549_v17 = vld [vmem:[#allocation39_spill] sm:$0xff] }
 0x1c4   :  { %v433_v37 = vadd.f32 %v6549_v17, %v4893_v5 }
 0x1c5   :  { %v1302_v53 = vadd.f32 %v1296_v32, %v5205_v28  ;;  %v1283_v32 = vadd.f32 %v1282_v44, %v1070_v34 }
 0x1c7   :  { %v4004_v18 = vmul.f32 -1.442695, %v1302_v53  ;;  %v5215_v53 = vperm.slane %v482_v15, 2 }
 0x1c8   :  { %v4204_v29 = vpop.eup %4203 }
 0x1c9   :  { %v4206_v13 = vpop.eup %4205  ;;  %v1309_v57 = vadd.f32 1.0, %v4204_v29  ;;  %4207 = vpow2.f32 %v4004_v18  ;;  %6548 = vst [vmem:[#allocation26_spill] sm:$0xff] %v5215_v53  ;;  %v1301_v40 = vadd.f32 %v1283_v32, %v5215_v53 }
 0x1ca   :  { %v5208_v54 = vadd.f32 1.0, %v4206_v13  ;;  %v1284_v31 = vpop.f32.mrf.mxu2  ;;  %v1297_v26 = vpop.f32.mrf.mxu3 }
 0x1cb   :  { %4209 = vrcp.f32 %v1309_v57  ;;  %v1382_v0 = vpop.f32.mrf.mxu0  ;;  %v1395_v59 = vpop.f32.mrf.mxu1  ;;  %v1322_v32 = vand.u32 2147483648, %v1309_v57  ;;  %vm1316_vm13 = vweird.f32 %v1309_v57 }
 0x1cc   :  { %4211 = vrcp.f32 %v5208_v54  ;;  %v1425_v60 = vadd.f32 %v1382_v0, %v346_v48  ;;  %v1426_v18 = vadd.f32 %v1395_v59, %v375_v27  ;;  %v1335_v47 = vand.u32 2147483647, %v5208_v54 }
 0x1cd   :  { %vm1331_vm15 = vweird.f32 %v5208_v54 }
 0x1ce   :  { %v4005_v29 = vmul.f32 -1.442695, %v1425_v60  ;;  %v4006_v13 = vmul.f32 -1.442695, %v1426_v18  ;;  %v1320_v18 = vand.u32 2147483647, %v1309_v57 }
 0x1cf   :  { %v4208_v42 = vpop.eup %4207  ;;  %vm1336_vm3 = vcmp.eq.f32.partialorder %v1335_v47, 8.507059e+37 }
 0x1d0   :  { %v5217_v31 = vadd.f32 1.0, %v4208_v42  ;;  %4213 = vpow2.f32 %v4005_v29  ;;  %v1337_v42 = vand.u32 2147483648, %v5208_v54  ;;  %vm1321_vm1 = vcmp.eq.f32.partialorder %v1320_v18, 8.507059e+37 }
 0x1d1   :  { %v4210_v26 = vpop.eup %4209 }
 0x1d2   :  { %v4212_v35 = vpop.eup %4211  ;;  %v1312_v28 = vmul.f32 %v4210_v26, %v1309_v57  ;;  %4215 = vrcp.f32 %v5217_v31  ;;  %v1408_v15 = vpop.f32.mrf.mxu2  ;;  %vm1317_vm12 = vweird.f32 %v4210_v26  ;;  %v1338_v57 = vor.u32 1.1754944e-38, %v1337_v42 }
 0x1d3   :  { %v1421_v34 = vpop.f32.mrf.mxu3  ;;  %v1327_v44 = vmul.f32 %v4212_v35, %v5208_v54  ;;  %4217 = vpow2.f32 %v4006_v13  ;;  %v1384_v48 = vpop.f32.mrf.mxu0  ;;  %vm1332_vm14 = vweird.f32 %v4212_v35  ;;  %vm1318_vm0 = vmor %vm1316_vm13, %vm1317_vm12  ;;  %vm1351_vm5 = vweird.f32 %v5217_v31 }
 0x1d4   :  { %v1397_v27 = vpop.f32.mrf.mxu1  ;;  %v1313_v0 = vsub.f32 1.0, %v1312_v28  ;;  %v1428_v59 = vadd.f32 %v1421_v34, %v433_v37  ;;  %4219 = vtanh.f32 %v1301_v40  ;;  %v1323_v34 = vor.u32 1.1754944e-38, %v1322_v32  ;;  %vm1333_vm2 = vmor %vm1331_vm15, %vm1332_vm14 }
 0x1d5   :  { %v1328_v60 = vsub.f32 1.0, %v1327_v44 }
 0x1d6   :  { %v1314_v29 = vmul.f32 %v4210_v26, %v1313_v0  ;;  %v4007_v17 = vmul.f32 -1.442695, %v1428_v59  ;;  %v4214_v5 = vpop.eup %4213 }
 0x1d7   :  { %v1329_v53 = vmul.f32 %v4212_v35, %v1328_v60  ;;  %v5229_v37 = vadd.f32 1.0, %v4214_v5 }
 0x1d8   :  { %v5226_v13 = vpop.eup %4215  ;;  %v1315_v28 = vadd.f32 %v4210_v26, %v1314_v29  ;;  %4221 = vpow2.f32 %v4007_v17 }
 0x1d9   :  { %v4218_v40 = vpop.eup %4217  ;;  %v1330_v44 = vadd.f32 %v4212_v35, %v1329_v53  ;;  %v1347_v48 = vmul.f32 %v5226_v13, %v5217_v31  ;;  %4223 = vrcp.f32 %v5229_v37  ;;  %vm1352_vm4 = vweird.f32 %v5226_v13 }
 0x1da   :  { %v1319_v27 = vsel %vm1318_vm0, %v4210_v26, %v1315_v28  ;;  %v5235_v0 = vadd.f32 1.0, %v4218_v40  ;;  %v1410_v54 = vpop.f32.mrf.mxu2  ;;  %v4220_v59 = vpop.eup %4219  ;;  %v6550_v26 = vld [vmem:[#allocation38_spill] sm:$0xff]  ;;  %vm5254_vm6 = vmor %vm1351_vm5, %vm1352_vm4  ;;  %vm1442_vm8 = vweird.f32 %v5229_v37 }
 0x1db   :  { %v1423_v5 = vpop.f32.mrf.mxu3  ;;  %v1324_v60 = vsel %vm1321_vm1, %v1323_v34, %v1319_v27  ;;  %v1334_v29 = vsel %vm1333_vm2, %v4212_v35, %v1330_v44  ;;  %v1348_v18 = vsub.f32 1.0, %v1347_v48  ;;  %v404_v28 = vadd.f32 %v6550_v26, %v4888_v2 }
 0x1dc   :  { %v1339_v32 = vsel %vm1336_vm3, %v1338_v57, %v1334_v29  ;;  %v1362_v53 = vmul.f32 %v4220_v59, %v1324_v60  ;;  %4225 = vrcp.f32 %v5235_v0  ;;  %v1357_v35 = vand.u32 2147483648, %v5217_v31 }
 0x1dd   :  { %v1361_v17 = vmul.f32 0.0, %v1339_v32  ;;  %v1349_v4 = vmul.f32 %v5226_v13, %v1348_v18  ;;  %v1427_v34 = vadd.f32 %v1408_v15, %v404_v28  ;;  %v1355_v57 = vand.u32 2147483647, %v5217_v31 }
 0x1de   :  { %v4222_v42 = vpop.eup %4221  ;;  %v1448_v59 = vand.u32 2147483648, %v5229_v37  ;;  %v1358_v29 = vor.u32 1.1754944e-38, %v1357_v35  ;;  %v1446_v31 = vand.u32 2147483647, %v5229_v37  ;;  %vm1457_vm11 = vweird.f32 %v5235_v0 }
 0x1df   :  { %v5241_v40 = vadd.f32 %v1362_v53, %v1361_v17  ;;  %v5243_v54 = vadd.f32 1.0, %v4222_v42  ;;  %v4224_v5 = vpop.eup %4223  ;;  %v1350_v47 = vadd.f32 %v5226_v13, %v1349_v4  ;;  %v1463_v53 = vand.u32 2147483648, %v5235_v0 }
 0x1e0   :  { %v1438_v44 = vmul.f32 %v4224_v5, %v5229_v37  ;;  %vm1443_vm7 = vweird.f32 %v4224_v5  ;;  %v1461_v17 = vand.u32 2147483647, %v5235_v0  ;;  %vm1356_vm9 = vcmp.eq.f32.partialorder %v1355_v57, 8.507059e+37 }
 0x1e1   :  { %4227 = vtanh.f32 %v5241_v40  ;;  %v1354_v60 = vsel %vm5254_vm6, %v5226_v13, %v1350_v47  ;;  %vm1444_vm12 = vmor %vm1442_vm8, %vm1443_vm7  ;;  %v1449_v13 = vor.u32 1.1754944e-38, %v1448_v59  ;;  %vm1447_vm13 = vcmp.eq.f32.partialorder %v1446_v31, 8.507059e+37 }
 0x1e2   :  { %v4226_v48 = vpop.eup %4225  ;;  %4229 = vrcp.f32 %v5243_v54  ;;  %v1439_v27 = vsub.f32 1.0, %v1438_v44  ;;  %v1464_v4 = vor.u32 1.1754944e-38, %v1463_v53  ;;  %vm1462_vm15 = vcmp.eq.f32.partialorder %v1461_v17, 8.507059e+37 }
 0x1e3   :  { %v1453_v15 = vmul.f32 %v4226_v48, %v5235_v0  ;;  %4231 = vtanh.f32 %v1427_v34  ;;  %vm1458_vm10 = vweird.f32 %v4226_v48  ;;  %v1359_v34 = vsel %vm1356_vm9, %v1358_v29, %v1354_v60 }
 0x1e4   :  { %v1440_v32 = vmul.f32 %v4224_v5, %v1439_v27  ;;  %vm1459_vm14 = vmor %vm1457_vm11, %vm1458_vm10  ;;  %v1483_v31 = vand.u32 2147483648, %v5243_v54  ;;  %vm1477_vm1 = vweird.f32 %v5243_v54 }
 0x1e5   :  { %v1454_v18 = vsub.f32 1.0, %v1453_v15 }
 0x1e6   :  { %v1441_v28 = vadd.f32 %v4224_v5, %v1440_v32  ;;  %v1484_v53 = vor.u32 1.1754944e-38, %v1483_v31  ;;  %v6571_v31 = vld [vmem:[#allocation58_spill] sm:$0xff] }
 0x1e7   :  { %v4228_v42 = vpop.eup %4227  ;;  %v1455_v26 = vmul.f32 %v4226_v48, %v1454_v18 }
 0x1e8   :  { %v4230_v44 = vpop.eup %4229  ;;  %v1365_v47 = vmul.f32 %v4228_v42, %v1359_v34  ;;  %v1445_v35 = vsel %vm1444_vm12, %v4224_v5, %v1441_v28  ;;  %v6553_v28 = vld [vmem:[#allocation20_spill] sm:$0xff]  ;;  %v6554_v34 = vld [vmem:[#allocation21_spill] sm:$0xff] }
 0x1e9   :  { %v1456_v27 = vadd.f32 %v4226_v48, %v1455_v26  ;;  %v1473_v15 = vmul.f32 %v4230_v44, %v5243_v54  ;;  %v4232_v37 = vpop.eup %4231  ;;  %v1450_v57 = vsel %vm1447_vm13, %v1449_v13, %v1445_v35  ;;  %vm1478_vm0 = vweird.f32 %v4230_v44  ;;  %v6556_v13 = vld [vmem:[#allocation22_spill] sm:$0xff]  ;;  %v6558_v35 = vld [vmem:[#allocation33_spill] sm:$0xff] }
 0x1ea   :  { %v1493_v2 = vpack.c.bf16 %v1365_v47, %v1365_v47  ;;  %v1488_v32 = vmul.f32 %v4232_v37, %v1450_v57  ;;  %vm1479_vm2 = vmor %vm1477_vm1, %vm1478_vm0  ;;  %v6557_v47 = vld [vmem:[#allocation23_spill] sm:$0xff]  ;;  %v6561_v37 = vld [vmem:[#allocation41_spill] sm:$0xff] }
 0x1eb   :  { %v1460_v18 = vsel %vm1459_vm14, %v4226_v48, %v1456_v27  ;;  %v1474_v60 = vsub.f32 1.0, %v1473_v15  ;;  %v6559_v27 = vld [vmem:[#allocation34_spill] sm:$0xff]  ;;  %v6560_v15 = vld [vmem:[#allocation35_spill] sm:$0xff]  ;;  %v6563_v57 = vld [vmem:[#allocation44_spill] sm:$0xff] }
 0x1ec   :  { %v1465_v29 = vsel %vm1462_vm15, %v1464_v4, %v1460_v18  ;;  %1502 = vmatmul.bf16.vlgmr.msrb.gmra.mxu0 %v1493_v2  ;;  %1515 = vmatmul.bf16.vlgmr.msrb.gmra.mxu1 %v1493_v2  ;;  %v6562_v4 = vld [vmem:[#allocation43_spill] sm:$0xff]  ;;  %v6564_v18 = vld [vmem:[#allocation45_spill] sm:$0xff] }
 0x1ed   :  { %v1487_v0 = vmul.f32 %v1465_v29, %v5129_v33  ;;  %v1475_v59 = vmul.f32 %v4230_v44, %v1474_v60  ;;  %1528 = vmatmul.bf16.vlgmr.msrb.gmra.mxu2 %v1493_v2  ;;  %1541 = vmatmul.bf16.vlgmr.msrb.gmra.mxu3 %v1493_v2  ;;  %v1481_v2 = vand.u32 2147483647, %v5243_v54  ;;  %v6566_v60 = vld [vmem:[#allocation47_spill] sm:$0xff]  ;;  %v6567_v29 = vld [vmem:[#allocation48_spill] sm:$0xff] }
 0x1ee   :  { %1672 = vmatpush.bf16.msrb.mxu0 %v4703_v38  ;;  %1685 = vmatpush.bf16.msrb.mxu1 %v4705_v43 }
 0x1ef   :  { %v5271_v5 = vadd.f32 %v1488_v32, %v1487_v0  ;;  %1698 = vmatpush.bf16.msrb.mxu2 %v4707_v49  ;;  %1711 = vmatpush.bf16.msrb.mxu3 %v4710_v50  ;;  %v1476_v48 = vadd.f32 %v4230_v44, %v1475_v59  ;;  %vm1482_vm3 = vcmp.eq.f32.partialorder %v1481_v2, 8.507059e+37  ;;  %v6565_v32 = vld [vmem:[#allocation46_spill] sm:$0xff]  ;;  %v6569_v59 = vld [vmem:[#allocation56_spill] sm:$0xff]  ;;  %v6572_v2 = vld [vmem:[#allocation59_spill] sm:$0xff] }
 0x1f0   :  { %v6568_v0 = vld [vmem:[#allocation50_spill] sm:$0xff] }
 0x1f1   :  { %4233 = vtanh.f32 %v5271_v5  ;;  %v1480_v33 = vsel %vm1479_vm2, %v4230_v44, %v1476_v48  ;;  %v6555_v44 = vld [vmem:[#allocation24_spill] sm:$0xff]  ;;  %v6570_v48 = vld [vmem:[#allocation57_spill] sm:$0xff] }
 0x1f2   :  { %1673 = vmatpush.bf16.msrb.mxu0 %v4712_v51  ;;  %1686 = vmatpush.bf16.msrb.mxu1 %v4715_v55  ;;  %v1485_v42 = vsel %vm1482_vm3, %v1484_v53, %v1480_v33  ;;  %v6573_v33 = vld [vmem:[#allocation60_spill] sm:$0xff]  ;;  %v6574_v53 = vld [vmem:[#allocation61_spill] sm:$0xff] }
 0x1f3   :  { %1699 = vmatpush.bf16.msrb.mxu2 %v4718_v61  ;;  %1712 = vmatpush.bf16.msrb.mxu3 %v4722_v62 }
 0x1f6   :  { %1674 = vmatpush.bf16.msrb.mxu0 %v4724_v63  ;;  %1687 = vmatpush.bf16.msrb.mxu1 %v4727_v3 }
 0x1f7   :  { %v4234_v17 = vpop.eup %4233  ;;  %1700 = vmatpush.bf16.msrb.mxu2 %v4730_v9  ;;  %1713 = vmatpush.bf16.msrb.mxu3 %v4734_v11 }
 0x1f8   :  { %v1491_v54 = vmul.f32 %v4234_v17, %v1485_v42  ;;  %v6575_v17 = vld [vmem:[#allocation62_spill] sm:$0xff]  ;;  %v6576_v42 = vld [vmem:[#allocation63_spill] sm:$0xff] }
 0x1fa   :  { %v1492_v26 = vpack.c.bf16 %v1491_v54, %v1491_v54  ;;  %1675 = vmatpush.bf16.msrb.mxu0 %v4736_v12  ;;  %1688 = vmatpush.bf16.msrb.mxu1 %v4739_v16  ;;  %v6577_v54 = vld [vmem:[#allocation67_spill] sm:$0xff] }
 0x1fb   :  { %1701 = vmatpush.bf16.msrb.mxu2 %v4742_v23  ;;  %1714 = vmatpush.bf16.msrb.mxu3 %v4746_v24 }
 0x1fc   :  { %1554 = vmatmul.bf16.vlgmr.msra.gmra.mxu0 %v1492_v26  ;;  %1567 = vmatmul.bf16.vlgmr.msra.gmra.mxu1 %v1492_v26 }
 0x1fd   :  { %1580 = vmatmul.bf16.vlgmr.msra.gmra.mxu2 %v1492_v26  ;;  %1593 = vmatmul.bf16.vlgmr.msra.gmra.mxu3 %v1492_v26 }
 0x1fe   :  { %1676 = vmatpush.bf16.msrb.mxu0 %v4748_v25  ;;  %1689 = vmatpush.bf16.msrb.mxu1 %v4751_v30 }
 0x1ff   :  { %1702 = vmatpush.bf16.msrb.mxu2 %v4754_v36  ;;  %1715 = vmatpush.bf16.msrb.mxu3 %v6553_v28 }
 0x202   :  { %1677 = vmatpush.bf16.msrb.mxu0 %v4760_v39  ;;  %1690 = vmatpush.bf16.msrb.mxu1 %v6554_v34 }
 0x203   :  { %1703 = vmatpush.bf16.msrb.mxu2 %v6555_v44  ;;  %1716 = vmatpush.bf16.msrb.mxu3 %v6556_v13 }
 0x206   :  { %1678 = vmatpush.bf16.msrb.mxu0 %v6557_v47  ;;  %1691 = vmatpush.bf16.msrb.mxu1 %v4773_v56 }
 0x207   :  { %1704 = vmatpush.bf16.msrb.mxu2 %v4784_v8  ;;  %1717 = vmatpush.bf16.msrb.mxu3 %v4780_v6 }
 0x20a   :  { %1679 = vmatpush.bf16.msrb.mxu0 %v4782_v7  ;;  %1692 = vmatpush.bf16.msrb.mxu1 %v4787_v14 }
 0x20b   :  { %1705 = vmatpush.bf16.msrb.mxu2 %v4790_v20  ;;  %1718 = vmatpush.bf16.msrb.mxu3 %v4794_v21 }
 0x20d   :  { %1680 = vmatmul.bf16.vlgmr.msrb.gmra.mxu0 %v1492_v26  ;;  %1693 = vmatmul.bf16.vlgmr.msrb.gmra.mxu1 %v1492_v26 }
 0x20e   :  { %1793 = vmatpush.bf16.msra.mxu0 %v4807_v41  ;;  %1806 = vmatpush.bf16.msra.mxu1 %v4809_v46 }
 0x20f   :  { %1706 = vmatmul.bf16.vlgmr.msrb.gmra.mxu2 %v1492_v26  ;;  %1719 = vmatmul.bf16.vlgmr.msrb.gmra.mxu3 %v1492_v26  ;;  %v6578_v26 = vld [vmem:[#allocation69_spill] sm:$0xff] }
 0x210   :  { %1819 = vmatpush.bf16.msra.mxu2 %v4811_v52  ;;  %1832 = vmatpush.bf16.msra.mxu3 %v4814_v58 }
 0x212   :  { %1794 = vmatpush.bf16.msra.mxu0 %v4827_v10  ;;  %1807 = vmatpush.bf16.msra.mxu1 %v4831_v19 }
 0x214   :  { %1820 = vmatpush.bf16.msra.mxu2 %v4833_v22  ;;  %1833 = vmatpush.bf16.msra.mxu3 %v6491_v45 }
 0x216   :  { %1795 = vmatpush.bf16.msra.mxu0 %v6492_v1  ;;  %1808 = vmatpush.bf16.msra.mxu1 %v6558_v35 }
 0x218   :  { %1821 = vmatpush.bf16.msra.mxu2 %v6559_v27  ;;  %1834 = vmatpush.bf16.msra.mxu3 %v6560_v15 }
 0x21a   :  { %1796 = vmatpush.bf16.msra.mxu0 %v6561_v37  ;;  %1809 = vmatpush.bf16.msra.mxu1 %v6562_v4  ;;  %v6613_v4 = vld [vmem:[#allocation118_spill] sm:$0xff]  ;;  %v6614_v37 = vld [vmem:[#allocation119_spill] sm:$0xff] }
 0x21c   :  { %1822 = vmatpush.bf16.msra.mxu2 %v6563_v57  ;;  %1835 = vmatpush.bf16.msra.mxu3 %v6564_v18 }
 0x21e   :  { %1797 = vmatpush.bf16.msra.mxu0 %v6565_v32  ;;  %1810 = vmatpush.bf16.msra.mxu1 %v6566_v60 }
 0x220   :  { %1823 = vmatpush.bf16.msra.mxu2 %v6567_v29  ;;  %1836 = vmatpush.bf16.msra.mxu3 %v6568_v0  ;;  %v6579_v0 = vld [vmem:[#allocation72_spill] sm:$0xff] }
 0x222   :  { %1798 = vmatpush.bf16.msra.mxu0 %v6569_v59  ;;  %1811 = vmatpush.bf16.msra.mxu1 %v6570_v48  ;;  %v6580_v59 = vld [vmem:[#allocation73_spill] sm:$0xff]  ;;  %v6581_v48 = vld [vmem:[#allocation70_spill] sm:$0xff] }
 0x224   :  { %1824 = vmatpush.bf16.msra.mxu2 %v6571_v31  ;;  %1837 = vmatpush.bf16.msra.mxu3 %v6572_v2  ;;  %v6582_v31 = vld [vmem:[#allocation71_spill] sm:$0xff]  ;;  %v6583_v2 = vld [vmem:[#allocation74_spill] sm:$0xff] }
 0x226   :  { %1799 = vmatpush.bf16.msra.mxu0 %v6573_v33  ;;  %1812 = vmatpush.bf16.msra.mxu1 %v6574_v53  ;;  %v6584_v33 = vld [vmem:[#allocation75_spill] sm:$0xff]  ;;  %v6585_v53 = vld [vmem:[#allocation76_spill] sm:$0xff] }
 0x228   :  { %1825 = vmatpush.bf16.msra.mxu2 %v6575_v17  ;;  %1838 = vmatpush.bf16.msra.mxu3 %v6576_v42  ;;  %v6586_v17 = vld [vmem:[#allocation79_spill] sm:$0xff]  ;;  %v6587_v42 = vld [vmem:[#allocation80_spill] sm:$0xff] }
 0x22a   :  { %1800 = vmatpush.bf16.msra.mxu0 %v6577_v54  ;;  %1813 = vmatpush.bf16.msra.mxu1 %v6578_v26  ;;  %v6588_v54 = vld [vmem:[#allocation83_spill] sm:$0xff]  ;;  %v6589_v26 = vld [vmem:[#allocation84_spill] sm:$0xff] }
 0x22c   :  { %1826 = vmatpush.bf16.msra.mxu2 %v6581_v48  ;;  %1839 = vmatpush.bf16.msra.mxu3 %v6582_v31  ;;  %v6592_v48 = vld [vmem:[#allocation87_spill] sm:$0xff]  ;;  %v6593_v31 = vld [vmem:[#allocation89_spill] sm:$0xff] }
 0x22e   :  { %1845 = vmatpush.bf16.msrb.mxu0 %v6579_v0  ;;  %1858 = vmatpush.bf16.msrb.mxu1 %v6580_v59  ;;  %v6590_v0 = vld [vmem:[#allocation85_spill] sm:$0xff]  ;;  %v6591_v59 = vld [vmem:[#allocation86_spill] sm:$0xff] }
 0x230   :  { %1871 = vmatpush.bf16.msrb.mxu2 %v6583_v2  ;;  %1884 = vmatpush.bf16.msrb.mxu3 %v6584_v33  ;;  %v6594_v2 = vld [vmem:[#allocation91_spill] sm:$0xff]  ;;  %v6595_v33 = vld [vmem:[#allocation92_spill] sm:$0xff] }
 0x232   :  { %1846 = vmatpush.bf16.msrb.mxu0 %v6585_v53  ;;  %1859 = vmatpush.bf16.msrb.mxu1 %v6586_v17  ;;  %v6596_v53 = vld [vmem:[#allocation94_spill] sm:$0xff]  ;;  %v6597_v17 = vld [vmem:[#allocation96_spill] sm:$0xff] }
 0x234   :  { %1872 = vmatpush.bf16.msrb.mxu2 %v6587_v42  ;;  %1885 = vmatpush.bf16.msrb.mxu3 %v6588_v54  ;;  %v6598_v42 = vld [vmem:[#allocation97_spill] sm:$0xff]  ;;  %v6599_v54 = vld [vmem:[#allocation98_spill] sm:$0xff] }
 0x236   :  { %1847 = vmatpush.bf16.msrb.mxu0 %v6589_v26  ;;  %1860 = vmatpush.bf16.msrb.mxu1 %v6590_v0  ;;  %v6600_v26 = vld [vmem:[#allocation99_spill] sm:$0xff]  ;;  %v6601_v0 = vld [vmem:[#allocation100_spill] sm:$0xff] }
 0x238   :  { %1873 = vmatpush.bf16.msrb.mxu2 %v6591_v59  ;;  %1886 = vmatpush.bf16.msrb.mxu3 %v6592_v48  ;;  %v6602_v59 = vld [vmem:[#allocation103_spill] sm:$0xff]  ;;  %v6603_v48 = vld [vmem:[#allocation104_spill] sm:$0xff] }
 0x23a   :  { %1848 = vmatpush.bf16.msrb.mxu0 %v6593_v31  ;;  %1861 = vmatpush.bf16.msrb.mxu1 %v6594_v2  ;;  %v6604_v31 = vld [vmem:[#allocation107_spill] sm:$0xff]  ;;  %v6605_v2 = vld [vmem:[#allocation108_spill] sm:$0xff] }
 0x23c   :  { %1874 = vmatpush.bf16.msrb.mxu2 %v6595_v33  ;;  %1887 = vmatpush.bf16.msrb.mxu3 %v6596_v53  ;;  %v6606_v33 = vld [vmem:[#allocation109_spill] sm:$0xff]  ;;  %v6607_v53 = vld [vmem:[#allocation110_spill] sm:$0xff] }
 0x23e   :  { %1849 = vmatpush.bf16.msrb.mxu0 %v6597_v17  ;;  %1862 = vmatpush.bf16.msrb.mxu1 %v6598_v42  ;;  %v6608_v17 = vld [vmem:[#allocation111_spill] sm:$0xff]  ;;  %v6609_v42 = vld [vmem:[#allocation113_spill] sm:$0xff] }
 0x240   :  { %1875 = vmatpush.bf16.msrb.mxu2 %v6599_v54  ;;  %1888 = vmatpush.bf16.msrb.mxu3 %v6600_v26  ;;  %v6610_v54 = vld [vmem:[#allocation115_spill] sm:$0xff]  ;;  %v6611_v26 = vld [vmem:[#allocation116_spill] sm:$0xff] }
 0x242   :  { %1850 = vmatpush.bf16.msrb.mxu0 %v6601_v0  ;;  %1863 = vmatpush.bf16.msrb.mxu1 %v6602_v59  ;;  %v6612_v0 = vld [vmem:[#allocation117_spill] sm:$0xff] }
 0x244   :  { %1876 = vmatpush.bf16.msrb.mxu2 %v6603_v48  ;;  %1889 = vmatpush.bf16.msrb.mxu3 %v6604_v31 }
 0x246   :  { %1851 = vmatpush.bf16.msrb.mxu0 %v6605_v2  ;;  %1864 = vmatpush.bf16.msrb.mxu1 %v6606_v33 }
 0x248   :  { %1877 = vmatpush.bf16.msrb.mxu2 %v6607_v53  ;;  %1890 = vmatpush.bf16.msrb.mxu3 %v6608_v17 }
 0x24a   :  { %1852 = vmatpush.bf16.msrb.mxu0 %v6609_v42  ;;  %1865 = vmatpush.bf16.msrb.mxu1 %v6610_v54 }
 0x24c   :  { %1878 = vmatpush.bf16.msrb.mxu2 %v6611_v26  ;;  %1891 = vmatpush.bf16.msrb.mxu3 %v6612_v0 }
 0x269   :  { %v1503_v59 = vpop.f32.mrf.mxu0  ;;  %v1516_v48 = vpop.f32.mrf.mxu1 }
 0x270   :  { %v1529_v29 = vpop.f32.mrf.mxu2  ;;  %v1542_v31 = vpop.f32.mrf.mxu3 }
 0x271   :  { %v1505_v60 = vpop.f32.mrf.mxu0  ;;  %v1518_v2 = vpop.f32.mrf.mxu1 }
 0x272   :  { %v6615_v2 = vld [vmem:[#allocation120_spill] sm:$0xff] }
 0x278   :  { %v1531_v32 = vpop.f32.mrf.mxu2  ;;  %v1544_v33 = vpop.f32.mrf.mxu3 }
 0x279   :  { %v1555_v18 = vpop.f32.mrf.mxu0  ;;  %v1568_v53 = vpop.f32.mrf.mxu1 }
 0x27a   :  { %v1556_v57 = vadd.f32 %v1555_v18, %v1503_v59  ;;  %v1569_v17 = vadd.f32 %v1568_v53, %v1516_v48 }
 0x27c   :  { %v1598_v42 = vadd.f32 %v1556_v57, %v6613_v4  ;;  %v1599_v54 = vadd.f32 %v1569_v17, %v6614_v37 }
 0x27e   :  { %v4008_v15 = vmul.f32 -1.442695, %v1598_v42  ;;  %v4009_v26 = vmul.f32 -1.442695, %v1599_v54  ;;  %v6616_v42 = vld [vmem:[#allocation40_spill] sm:$0xff] }
 0x280   :  { %4235 = vpow2.f32 %v4008_v15  ;;  %v1581_v0 = vpop.f32.mrf.mxu2  ;;  %v1594_v27 = vpop.f32.mrf.mxu3 }
 0x281   :  { %4237 = vpow2.f32 %v4009_v26  ;;  %v1595_v35 = vadd.f32 %v1594_v27, %v1542_v31  ;;  %v1557_v1 = vpop.f32.mrf.mxu0  ;;  %v1570_v60 = vpop.f32.mrf.mxu1  ;;  %v1582_v17 = vadd.f32 %v1581_v0, %v1529_v29  ;;  %v6617_v27 = vld [vmem:[#allocation42_spill] sm:$0xff] }
 0x283   :  { %v1601_v32 = vadd.f32 %v1595_v35, %v6615_v2 }
 0x285   :  { %v4010_v33 = vmul.f32 -1.442695, %v1601_v32 }
 0x286   :  { %v4236_v45 = vpop.eup %4235 }
 0x287   :  { %v4238_v22 = vpop.eup %4237  ;;  %v1608_v18 = vadd.f32 1.0, %v4236_v45  ;;  %4239 = vpow2.f32 %v4010_v33  ;;  %v6618_v45 = vld [vmem:[#allocation26_spill] sm:$0xff] }
 0x288   :  { %v1609_v59 = vadd.f32 1.0, %v4238_v22  ;;  %v1583_v57 = vpop.f32.mrf.mxu2  ;;  %v1596_v48 = vpop.f32.mrf.mxu3  ;;  %v1600_v33 = vadd.f32 %v1582_v17, %v6618_v45 }
 0x289   :  { %4241 = vrcp.f32 %v1608_v18  ;;  %v1621_v2 = vand.u32 2147483648, %v1608_v18  ;;  %vm1615_vm6 = vweird.f32 %v1608_v18 }
 0x28a   :  { %4243 = vrcp.f32 %v1609_v59  ;;  %v1681_v53 = vpop.f32.mrf.mxu0  ;;  %v1694_v15 = vpop.f32.mrf.mxu1  ;;  %v1636_v37 = vand.u32 2147483648, %v1609_v59  ;;  %vm1630_vm7 = vweird.f32 %v1609_v59 }
 0x28b   :  { %v1724_v54 = vadd.f32 %v1681_v53, %v6616_v42  ;;  %v1725_v1 = vadd.f32 %v1694_v15, %v6617_v27  ;;  %v6619_v42 = vld [vmem:[#allocation54_spill] sm:$0xff] }
 0x28d   :  { %v4240_v31 = vpop.eup %4239  ;;  %v4011_v26 = vmul.f32 -1.442695, %v1724_v54  ;;  %v4012_v35 = vmul.f32 -1.442695, %v1725_v1 }
 0x28e   :  { %v5376_v60 = vadd.f32 1.0, %v4240_v31  ;;  %v1619_v31 = vand.u32 2147483647, %v1608_v18 }
 0x28f   :  { %v4242_v32 = vpop.eup %4241  ;;  %4245 = vpow2.f32 %v4011_v26 }
 0x290   :  { %v4244_v22 = vpop.eup %4243  ;;  %v1611_v57 = vmul.f32 %v4242_v32, %v1608_v18  ;;  %4247 = vrcp.f32 %v5376_v60  ;;  %vm1616_vm4 = vweird.f32 %v4242_v32  ;;  %vm1620_vm9 = vcmp.eq.f32.partialorder %v1619_v31, 8.507059e+37 }
 0x291   :  { %v1626_v48 = vmul.f32 %v4244_v22, %v1609_v59  ;;  %4249 = vpow2.f32 %v4012_v35  ;;  %vm1631_vm5 = vweird.f32 %v4244_v22  ;;  %v1634_v35 = vand.u32 2147483647, %v1609_v59  ;;  %vm1617_vm8 = vmor %vm1615_vm6, %vm1616_vm4 }
 0x292   :  { %v1707_v29 = vpop.f32.mrf.mxu2  ;;  %v1720_v0 = vpop.f32.mrf.mxu3  ;;  %v1612_v53 = vsub.f32 1.0, %v1611_v57  ;;  %4251 = vtanh.f32 %v1600_v33  ;;  %v1622_v33 = vor.u32 1.1754944e-38, %v1621_v2  ;;  %vm1632_vm10 = vmor %vm1630_vm7, %vm1631_vm5  ;;  %vm1650_vm13 = vweird.f32 %v5376_v60 }
 0x293   :  { %v1727_v15 = vadd.f32 %v1720_v0, %v6619_v42  ;;  %v1683_v27 = vpop.f32.mrf.mxu0  ;;  %v1696_v54 = vpop.f32.mrf.mxu1  ;;  %v1627_v1 = vsub.f32 1.0, %v1626_v48  ;;  %vm1635_vm11 = vcmp.eq.f32.partialorder %v1634_v35, 8.507059e+37 }
 0x294   :  { %v1613_v17 = vmul.f32 %v4242_v32, %v1612_v53 }
 0x295   :  { %v4013_v26 = vmul.f32 -1.442695, %v1727_v15  ;;  %v4246_v45 = vpop.eup %4245  ;;  %v1628_v4 = vmul.f32 %v4244_v22, %v1627_v1  ;;  %v1637_v15 = vor.u32 1.1754944e-38, %v1636_v37 }
 0x296   :  { %v5381_v19 = vpop.eup %4247  ;;  %v1614_v57 = vadd.f32 %v4242_v32, %v1613_v17  ;;  %v5383_v0 = vadd.f32 1.0, %v4246_v45 }
 0x297   :  { %4253 = vpow2.f32 %v4013_v26  ;;  %v4250_v48 = vpop.eup %4249  ;;  %v1629_v42 = vadd.f32 %v4244_v22, %v1628_v4  ;;  %v1646_v53 = vmul.f32 %v5381_v19, %v5376_v60  ;;  %vm1651_vm12 = vweird.f32 %v5381_v19 }
 0x298   :  { %v1618_v27 = vsel %vm1617_vm8, %v4242_v32, %v1614_v57  ;;  %4255 = vrcp.f32 %v5383_v0  ;;  %v5388_v18 = vadd.f32 1.0, %v4250_v48  ;;  %v4252_v59 = vpop.eup %4251  ;;  %vm5407_vm14 = vmor %vm1650_vm13, %vm1651_vm12  ;;  %vm1741_vm0 = vweird.f32 %v5383_v0 }
 0x299   :  { %v1623_v54 = vsel %vm1620_vm9, %v1622_v33, %v1618_v27  ;;  %v1633_v45 = vsel %vm1632_vm10, %v4244_v22, %v1629_v42  ;;  %v1647_v1 = vsub.f32 1.0, %v1646_v53  ;;  %v6620_v33 = vld [vmem:[#allocation52_spill] sm:$0xff]  ;;  %v1656_v42 = vand.u32 2147483648, %v5376_v60 }
 0x29a   :  { %v1709_v17 = vpop.f32.mrf.mxu2  ;;  %v1722_v26 = vpop.f32.mrf.mxu3  ;;  %v1638_v31 = vsel %vm1635_vm11, %v1637_v15, %v1633_v45  ;;  %v1661_v2 = vmul.f32 %v4252_v59, %v1623_v54  ;;  %4257 = vrcp.f32 %v5388_v18  ;;  %v1726_v22 = vadd.f32 %v1707_v29, %v6620_v33 }
 0x29b   :  { %v1660_v4 = vmul.f32 %v1638_v31, %v5241_v40  ;;  %v1648_v37 = vmul.f32 %v5381_v19, %v1647_v1  ;;  %v1747_v59 = vand.u32 2147483648, %v5383_v0  ;;  %v1657_v45 = vor.u32 1.1754944e-38, %v1656_v42 }
 0x29c   :  { %v1762_v26 = vand.u32 2147483648, %v5388_v18  ;;  %v1760_v31 = vand.u32 2147483647, %v5388_v18  ;;  %vm1756_vm3 = vweird.f32 %v5388_v18 }
 0x29d   :  { %v4254_v10 = vpop.eup %4253  ;;  %v5393_v32 = vadd.f32 %v1661_v2, %v1660_v4  ;;  %v1649_v35 = vadd.f32 %v5381_v19, %v1648_v37 }
 0x29e   :  { %v5395_v57 = vadd.f32 1.0, %v4254_v10  ;;  %v4256_v48 = vpop.eup %4255  ;;  %v1654_v10 = vand.u32 2147483647, %v5376_v60  ;;  %v1745_v60 = vand.u32 2147483647, %v5383_v0  ;;  %vm1761_vm7 = vcmp.eq.f32.partialorder %v1760_v31, 8.507059e+37 }
 0x29f   :  { %4259 = vtanh.f32 %v5393_v32  ;;  %v1737_v40 = vmul.f32 %v4256_v48, %v5383_v0  ;;  %v1653_v54 = vsel %vm5407_vm14, %v5381_v19, %v1649_v35  ;;  %vm1742_vm15 = vweird.f32 %v4256_v48 }
 0x2a0   :  { %v4258_v53 = vpop.eup %4257  ;;  %4261 = vrcp.f32 %v5395_v57  ;;  %vm1655_vm1 = vcmp.eq.f32.partialorder %v1654_v10, 8.507059e+37  ;;  %vm1743_vm4 = vmor %vm1741_vm0, %vm1742_vm15  ;;  %v1748_v19 = vor.u32 1.1754944e-38, %v1747_v59  ;;  %vm1746_vm5 = vcmp.eq.f32.partialorder %v1745_v60, 8.507059e+37 }
 0x2a1   :  { %v1738_v15 = vsub.f32 1.0, %v1737_v40  ;;  %v1752_v29 = vmul.f32 %v4258_v53, %v5388_v18  ;;  %4263 = vtanh.f32 %v1726_v22  ;;  %vm1757_vm2 = vweird.f32 %v4258_v53 }
 0x2a2   :  { %v1658_v33 = vsel %vm1655_vm1, %v1657_v45, %v1653_v54  ;;  %vm1758_vm6 = vmor %vm1756_vm3, %vm1757_vm2  ;;  %v1782_v60 = vand.u32 2147483648, %v5395_v57  ;;  %vm1776_vm9 = vweird.f32 %v5395_v57 }
 0x2a3   :  { %v1753_v1 = vsub.f32 1.0, %v1752_v29  ;;  %v1739_v17 = vmul.f32 %v4256_v48, %v1738_v15  ;;  %v1763_v29 = vor.u32 1.1754944e-38, %v1762_v26 }
 0x2a4   :  { %v1783_v31 = vor.u32 1.1754944e-38, %v1782_v60  ;;  %v6641_v60 = vld [vmem:[#allocation58_spill] sm:$0xff] }
 0x2a5   :  { %v4260_v2 = vpop.eup %4259  ;;  %v1754_v4 = vmul.f32 %v4258_v53, %v1753_v1  ;;  %v1740_v37 = vadd.f32 %v4256_v48, %v1739_v17 }
 0x2a6   :  { %v4262_v22 = vpop.eup %4261  ;;  %v1664_v35 = vmul.f32 %v4260_v2, %v1658_v33  ;;  %v6623_v33 = vld [vmem:[#allocation28_spill] sm:$0xff] }
 0x2a7   :  { %v1744_v42 = vsel %vm1743_vm4, %v4256_v48, %v1740_v37  ;;  %v1755_v40 = vadd.f32 %v4258_v53, %v1754_v4  ;;  %v1772_v15 = vmul.f32 %v4262_v22, %v5395_v57  ;;  %v4264_v0 = vpop.eup %4263  ;;  %vm1777_vm8 = vweird.f32 %v4262_v22 }
 0x2a8   :  { %v1749_v10 = vsel %vm1746_vm5, %v1748_v19, %v1744_v42  ;;  %v1792_v27 = vpack.c.bf16 %v1664_v35, %v1664_v35  ;;  %vm1778_vm10 = vmor %vm1776_vm9, %vm1777_vm8  ;;  %v6625_v19 = vld [vmem:[#allocation30_spill] sm:$0xff]  ;;  %v6626_v35 = vld [vmem:[#allocation31_spill] sm:$0xff] }
 0x2a9   :  { %v1759_v1 = vsel %vm1758_vm6, %v4258_v53, %v1755_v40  ;;  %v1787_v17 = vmul.f32 %v4264_v0, %v1749_v10  ;;  %v1773_v54 = vsub.f32 1.0, %v1772_v15  ;;  %v6627_v42 = vld [vmem:[#allocation32_spill] sm:$0xff]  ;;  %v6628_v40 = vld [vmem:[#allocation33_spill] sm:$0xff]  ;;  %v6629_v15 = vld [vmem:[#allocation34_spill] sm:$0xff] }
 0x2aa   :  { %v1764_v45 = vsel %vm1761_vm7, %v1763_v29, %v1759_v1  ;;  %1801 = vmatmul.bf16.vlgmr.msra.gmra.mxu0 %v1792_v27  ;;  %1814 = vmatmul.bf16.vlgmr.msra.gmra.mxu1 %v1792_v27  ;;  %v6630_v0 = vld [vmem:[#allocation35_spill] sm:$0xff]  ;;  %v6631_v29 = vld [vmem:[#allocation41_spill] sm:$0xff] }
 0x2ab   :  { %v1786_v18 = vmul.f32 %v1764_v45, %v5271_v5  ;;  %v1774_v59 = vmul.f32 %v4262_v22, %v1773_v54  ;;  %1827 = vmatmul.bf16.vlgmr.msra.gmra.mxu2 %v1792_v27  ;;  %1840 = vmatmul.bf16.vlgmr.msra.gmra.mxu3 %v1792_v27  ;;  %v1780_v5 = vand.u32 2147483647, %v5395_v57  ;;  %v6632_v10 = vld [vmem:[#allocation43_spill] sm:$0xff]  ;;  %v6633_v27 = vld [vmem:[#allocation44_spill] sm:$0xff]  ;;  %v6634_v1 = vld [vmem:[#allocation45_spill] sm:$0xff] }
 0x2ac   :  { %1971 = vmatpush.bf16.msra.mxu0 %v4703_v38  ;;  %1984 = vmatpush.bf16.msra.mxu1 %v4705_v43  ;;  %v6636_v54 = vld [vmem:[#allocation47_spill] sm:$0xff]  ;;  %v6637_v45 = vld [vmem:[#allocation48_spill] sm:$0xff] }
 0x2ad   :  { %v5424_v48 = vadd.f32 %v1787_v17, %v1786_v18  ;;  %1997 = vmatpush.bf16.msra.mxu2 %v4707_v49  ;;  %2010 = vmatpush.bf16.msra.mxu3 %v4710_v50  ;;  %v1775_v53 = vadd.f32 %v4262_v22, %v1774_v59  ;;  %vm1781_vm11 = vcmp.eq.f32.partialorder %v1780_v5, 8.507059e+37  ;;  %v6635_v17 = vld [vmem:[#allocation46_spill] sm:$0xff]  ;;  %v6639_v59 = vld [vmem:[#allocation56_spill] sm:$0xff]  ;;  %v6642_v5 = vld [vmem:[#allocation59_spill] sm:$0xff] }
 0x2ae   :  { %v6638_v18 = vld [vmem:[#allocation50_spill] sm:$0xff] }
 0x2af   :  { %4265 = vtanh.f32 %v5424_v48  ;;  %v1779_v26 = vsel %vm1778_vm10, %v4262_v22, %v1775_v53  ;;  %v6624_v22 = vld [vmem:[#allocation29_spill] sm:$0xff] }
 0x2b0   :  { %1972 = vmatpush.bf16.msra.mxu0 %v4712_v51  ;;  %1985 = vmatpush.bf16.msra.mxu1 %v4715_v55  ;;  %v1784_v4 = vsel %vm1781_vm11, %v1783_v31, %v1779_v26  ;;  %v6640_v53 = vld [vmem:[#allocation57_spill] sm:$0xff]  ;;  %v6643_v26 = vld [vmem:[#allocation60_spill] sm:$0xff] }
 0x2b1   :  { %1998 = vmatpush.bf16.msra.mxu2 %v4718_v61  ;;  %2011 = vmatpush.bf16.msra.mxu3 %v4722_v62  ;;  %v6644_v31 = vld [vmem:[#allocation61_spill] sm:$0xff] }
 0x2b4   :  { %1973 = vmatpush.bf16.msra.mxu0 %v4724_v63  ;;  %1986 = vmatpush.bf16.msra.mxu1 %v4727_v3 }
 0x2b5   :  { %v4266_v2 = vpop.eup %4265  ;;  %1999 = vmatpush.bf16.msra.mxu2 %v4730_v9  ;;  %2012 = vmatpush.bf16.msra.mxu3 %v4734_v11 }
 0x2b6   :  { %v1790_v57 = vmul.f32 %v4266_v2, %v1784_v4  ;;  %v6645_v2 = vld [vmem:[#allocation62_spill] sm:$0xff]  ;;  %v6646_v4 = vld [vmem:[#allocation63_spill] sm:$0xff] }
 0x2b8   :  { %v1791_v37 = vpack.c.bf16 %v1790_v57, %v1790_v57  ;;  %1974 = vmatpush.bf16.msra.mxu0 %v4736_v12  ;;  %1987 = vmatpush.bf16.msra.mxu1 %v4739_v16  ;;  %v6647_v57 = vld [vmem:[#allocation67_spill] sm:$0xff] }
 0x2b9   :  { %2000 = vmatpush.bf16.msra.mxu2 %v4742_v23  ;;  %2013 = vmatpush.bf16.msra.mxu3 %v4746_v24 }
 0x2ba   :  { %1853 = vmatmul.bf16.vlgmr.msrb.gmra.mxu0 %v1791_v37  ;;  %1866 = vmatmul.bf16.vlgmr.msrb.gmra.mxu1 %v1791_v37 }
 0x2bb   :  { %1879 = vmatmul.bf16.vlgmr.msrb.gmra.mxu2 %v1791_v37  ;;  %1892 = vmatmul.bf16.vlgmr.msrb.gmra.mxu3 %v1791_v37 }
 0x2bc   :  { %1975 = vmatpush.bf16.msra.mxu0 %v4748_v25  ;;  %1988 = vmatpush.bf16.msra.mxu1 %v4751_v30 }
 0x2bd   :  { %2001 = vmatpush.bf16.msra.mxu2 %v4754_v36  ;;  %2014 = vmatpush.bf16.msra.mxu3 %v6553_v28 }
 0x2c0   :  { %1976 = vmatpush.bf16.msra.mxu0 %v4760_v39  ;;  %1989 = vmatpush.bf16.msra.mxu1 %v6554_v34 }
 0x2c1   :  { %2002 = vmatpush.bf16.msra.mxu2 %v6555_v44  ;;  %2015 = vmatpush.bf16.msra.mxu3 %v6556_v13 }
 0x2c4   :  { %1977 = vmatpush.bf16.msra.mxu0 %v6557_v47  ;;  %1990 = vmatpush.bf16.msra.mxu1 %v4773_v56 }
 0x2c5   :  { %2003 = vmatpush.bf16.msra.mxu2 %v4784_v8  ;;  %2016 = vmatpush.bf16.msra.mxu3 %v4780_v6 }
 0x2c8   :  { %1978 = vmatpush.bf16.msra.mxu0 %v4782_v7  ;;  %1991 = vmatpush.bf16.msra.mxu1 %v4787_v14 }
 0x2c9   :  { %2004 = vmatpush.bf16.msra.mxu2 %v4790_v20  ;;  %2017 = vmatpush.bf16.msra.mxu3 %v4794_v21 }
 0x2cb   :  { %1979 = vmatmul.bf16.vlgmr.msra.gmra.mxu0 %v1791_v37  ;;  %1992 = vmatmul.bf16.vlgmr.msra.gmra.mxu1 %v1791_v37 }
 0x2cc   :  { %2092 = vmatpush.bf16.msrb.mxu0 %v4807_v41  ;;  %2105 = vmatpush.bf16.msrb.mxu1 %v4809_v46 }
 0x2cd   :  { %2005 = vmatmul.bf16.vlgmr.msra.gmra.mxu2 %v1791_v37  ;;  %2018 = vmatmul.bf16.vlgmr.msra.gmra.mxu3 %v1791_v37  ;;  %v6648_v37 = vld [vmem:[#allocation69_spill] sm:$0xff] }
 0x2ce   :  { %2118 = vmatpush.bf16.msrb.mxu2 %v4811_v52  ;;  %2131 = vmatpush.bf16.msrb.mxu3 %v4814_v58 }
 0x2d0   :  { %2093 = vmatpush.bf16.msrb.mxu0 %v6623_v33  ;;  %2106 = vmatpush.bf16.msrb.mxu1 %v6624_v22  ;;  %v6694_v33 = vld [vmem:[#allocation64_spill] sm:$0xff] }
 0x2d2   :  { %2119 = vmatpush.bf16.msrb.mxu2 %v6625_v19  ;;  %2132 = vmatpush.bf16.msrb.mxu3 %v6626_v35 }
 0x2d4   :  { %2094 = vmatpush.bf16.msrb.mxu0 %v6627_v42  ;;  %2107 = vmatpush.bf16.msrb.mxu1 %v6628_v40 }
 0x2d6   :  { %2120 = vmatpush.bf16.msrb.mxu2 %v6629_v15  ;;  %2133 = vmatpush.bf16.msrb.mxu3 %v6630_v0 }
 0x2d8   :  { %2095 = vmatpush.bf16.msrb.mxu0 %v6631_v29  ;;  %2108 = vmatpush.bf16.msrb.mxu1 %v6632_v10  ;;  %v6683_v10 = vld [vmem:[#allocation118_spill] sm:$0xff]  ;;  %v6684_v29 = vld [vmem:[#allocation119_spill] sm:$0xff] }
 0x2da   :  { %2121 = vmatpush.bf16.msrb.mxu2 %v6633_v27  ;;  %2134 = vmatpush.bf16.msrb.mxu3 %v6634_v1 }
 0x2dc   :  { %2096 = vmatpush.bf16.msrb.mxu0 %v6635_v17  ;;  %2109 = vmatpush.bf16.msrb.mxu1 %v6636_v54 }
 0x2de   :  { %2122 = vmatpush.bf16.msrb.mxu2 %v6637_v45  ;;  %2135 = vmatpush.bf16.msrb.mxu3 %v6638_v18  ;;  %v6649_v18 = vld [vmem:[#allocation72_spill] sm:$0xff] }
 0x2e0   :  { %2097 = vmatpush.bf16.msrb.mxu0 %v6639_v59  ;;  %2110 = vmatpush.bf16.msrb.mxu1 %v6640_v53  ;;  %v6650_v59 = vld [vmem:[#allocation73_spill] sm:$0xff]  ;;  %v6651_v53 = vld [vmem:[#allocation70_spill] sm:$0xff] }
 0x2e2   :  { %2123 = vmatpush.bf16.msrb.mxu2 %v6641_v60  ;;  %2136 = vmatpush.bf16.msrb.mxu3 %v6642_v5  ;;  %v6652_v60 = vld [vmem:[#allocation71_spill] sm:$0xff]  ;;  %v6653_v5 = vld [vmem:[#allocation74_spill] sm:$0xff] }
 0x2e4   :  { %2098 = vmatpush.bf16.msrb.mxu0 %v6643_v26  ;;  %2111 = vmatpush.bf16.msrb.mxu1 %v6644_v31  ;;  %v6654_v26 = vld [vmem:[#allocation75_spill] sm:$0xff]  ;;  %v6655_v31 = vld [vmem:[#allocation76_spill] sm:$0xff] }
 0x2e6   :  { %2124 = vmatpush.bf16.msrb.mxu2 %v6645_v2  ;;  %2137 = vmatpush.bf16.msrb.mxu3 %v6646_v4  ;;  %v6656_v2 = vld [vmem:[#allocation79_spill] sm:$0xff]  ;;  %v6657_v4 = vld [vmem:[#allocation80_spill] sm:$0xff] }
 0x2e8   :  { %2099 = vmatpush.bf16.msrb.mxu0 %v6647_v57  ;;  %2112 = vmatpush.bf16.msrb.mxu1 %v6648_v37  ;;  %v6658_v57 = vld [vmem:[#allocation83_spill] sm:$0xff]  ;;  %v6659_v37 = vld [vmem:[#allocation84_spill] sm:$0xff] }
 0x2ea   :  { %2125 = vmatpush.bf16.msrb.mxu2 %v6651_v53  ;;  %2138 = vmatpush.bf16.msrb.mxu3 %v6652_v60  ;;  %v6662_v53 = vld [vmem:[#allocation87_spill] sm:$0xff]  ;;  %v6663_v60 = vld [vmem:[#allocation89_spill] sm:$0xff] }
 0x2ec   :  { %2144 = vmatpush.bf16.msra.mxu0 %v6649_v18  ;;  %2157 = vmatpush.bf16.msra.mxu1 %v6650_v59  ;;  %v6660_v18 = vld [vmem:[#allocation85_spill] sm:$0xff]  ;;  %v6661_v59 = vld [vmem:[#allocation86_spill] sm:$0xff] }
 0x2ee   :  { %2170 = vmatpush.bf16.msra.mxu2 %v6653_v5  ;;  %2183 = vmatpush.bf16.msra.mxu3 %v6654_v26  ;;  %v6664_v5 = vld [vmem:[#allocation91_spill] sm:$0xff]  ;;  %v6665_v26 = vld [vmem:[#allocation92_spill] sm:$0xff] }
 0x2f0   :  { %2145 = vmatpush.bf16.msra.mxu0 %v6655_v31  ;;  %2158 = vmatpush.bf16.msra.mxu1 %v6656_v2  ;;  %v6666_v31 = vld [vmem:[#allocation94_spill] sm:$0xff]  ;;  %v6667_v2 = vld [vmem:[#allocation96_spill] sm:$0xff] }
 0x2f2   :  { %2171 = vmatpush.bf16.msra.mxu2 %v6657_v4  ;;  %2184 = vmatpush.bf16.msra.mxu3 %v6658_v57  ;;  %v6668_v4 = vld [vmem:[#allocation97_spill] sm:$0xff]  ;;  %v6669_v57 = vld [vmem:[#allocation98_spill] sm:$0xff] }
 0x2f4   :  { %2146 = vmatpush.bf16.msra.mxu0 %v6659_v37  ;;  %2159 = vmatpush.bf16.msra.mxu1 %v6660_v18  ;;  %v6670_v37 = vld [vmem:[#allocation99_spill] sm:$0xff]  ;;  %v6671_v18 = vld [vmem:[#allocation100_spill] sm:$0xff] }
 0x2f6   :  { %2172 = vmatpush.bf16.msra.mxu2 %v6661_v59  ;;  %2185 = vmatpush.bf16.msra.mxu3 %v6662_v53  ;;  %v6672_v59 = vld [vmem:[#allocation103_spill] sm:$0xff]  ;;  %v6673_v53 = vld [vmem:[#allocation104_spill] sm:$0xff] }
 0x2f8   :  { %2147 = vmatpush.bf16.msra.mxu0 %v6663_v60  ;;  %2160 = vmatpush.bf16.msra.mxu1 %v6664_v5  ;;  %v6674_v60 = vld [vmem:[#allocation107_spill] sm:$0xff]  ;;  %v6675_v5 = vld [vmem:[#allocation108_spill] sm:$0xff] }
 0x2fa   :  { %2173 = vmatpush.bf16.msra.mxu2 %v6665_v26  ;;  %2186 = vmatpush.bf16.msra.mxu3 %v6666_v31  ;;  %v6676_v26 = vld [vmem:[#allocation109_spill] sm:$0xff]  ;;  %v6677_v31 = vld [vmem:[#allocation110_spill] sm:$0xff] }
 0x2fc   :  { %2148 = vmatpush.bf16.msra.mxu0 %v6667_v2  ;;  %2161 = vmatpush.bf16.msra.mxu1 %v6668_v4  ;;  %v6678_v2 = vld [vmem:[#allocation111_spill] sm:$0xff]  ;;  %v6679_v4 = vld [vmem:[#allocation113_spill] sm:$0xff] }
 0x2fe   :  { %2174 = vmatpush.bf16.msra.mxu2 %v6669_v57  ;;  %2187 = vmatpush.bf16.msra.mxu3 %v6670_v37  ;;  %v6680_v57 = vld [vmem:[#allocation115_spill] sm:$0xff]  ;;  %v6681_v37 = vld [vmem:[#allocation116_spill] sm:$0xff] }
 0x300   :  { %2149 = vmatpush.bf16.msra.mxu0 %v6671_v18  ;;  %2162 = vmatpush.bf16.msra.mxu1 %v6672_v59  ;;  %v6682_v18 = vld [vmem:[#allocation117_spill] sm:$0xff] }
 0x302   :  { %2175 = vmatpush.bf16.msra.mxu2 %v6673_v53  ;;  %2188 = vmatpush.bf16.msra.mxu3 %v6674_v60 }
 0x304   :  { %2150 = vmatpush.bf16.msra.mxu0 %v6675_v5  ;;  %2163 = vmatpush.bf16.msra.mxu1 %v6676_v26 }
 0x306   :  { %2176 = vmatpush.bf16.msra.mxu2 %v6677_v31  ;;  %2189 = vmatpush.bf16.msra.mxu3 %v6678_v2 }
 0x308   :  { %2151 = vmatpush.bf16.msra.mxu0 %v6679_v4  ;;  %2164 = vmatpush.bf16.msra.mxu1 %v6680_v57 }
 0x30a   :  { %2177 = vmatpush.bf16.msra.mxu2 %v6681_v37  ;;  %2190 = vmatpush.bf16.msra.mxu3 %v6682_v18 }
 0x327   :  { %v1802_v59 = vpop.f32.mrf.mxu0  ;;  %v1815_v53 = vpop.f32.mrf.mxu1 }
 0x32e   :  { %v1828_v45 = vpop.f32.mrf.mxu2  ;;  %v1841_v60 = vpop.f32.mrf.mxu3 }
 0x32f   :  { %v1804_v54 = vpop.f32.mrf.mxu0  ;;  %v1817_v5 = vpop.f32.mrf.mxu1 }
 0x330   :  { %v6685_v5 = vld [vmem:[#allocation120_spill] sm:$0xff] }
 0x336   :  { %v1830_v17 = vpop.f32.mrf.mxu2  ;;  %v1843_v26 = vpop.f32.mrf.mxu3 }
 0x337   :  { %v1854_v1 = vpop.f32.mrf.mxu0  ;;  %v1867_v31 = vpop.f32.mrf.mxu1 }
 0x338   :  { %v1855_v27 = vadd.f32 %v1854_v1, %v1802_v59  ;;  %v1868_v2 = vadd.f32 %v1867_v31, %v1815_v53  ;;  %v6686_v31 = vld [vmem:[#allocation36_spill] sm:$0xff] }
 0x33a   :  { %v1897_v4 = vadd.f32 %v1855_v27, %v6683_v10  ;;  %v1898_v57 = vadd.f32 %v1868_v2, %v6684_v29  ;;  %v6687_v2 = vld [vmem:[#allocation53_spill] sm:$0xff] }
 0x33c   :  { %v4014_v0 = vmul.f32 -1.442695, %v1897_v4  ;;  %v4015_v37 = vmul.f32 -1.442695, %v1898_v57  ;;  %v6688_v4 = vld [vmem:[#allocation37_spill] sm:$0xff]  ;;  %v6689_v57 = vld [vmem:[#allocation55_spill] sm:$0xff] }
 0x33e   :  { %4267 = vpow2.f32 %v4014_v0  ;;  %v1880_v18 = vpop.f32.mrf.mxu2  ;;  %v1893_v15 = vpop.f32.mrf.mxu3  ;;  %v351_v0 = vadd.f32 %v6687_v2, %v6686_v31  ;;  %v6691_v31 = vld [vmem:[#allocation51_spill] sm:$0xff] }
 0x33f   :  { %4269 = vpow2.f32 %v4015_v37  ;;  %v1894_v40 = vadd.f32 %v1893_v15, %v1841_v60  ;;  %v1856_v42 = vpop.f32.mrf.mxu0  ;;  %v1869_v54 = vpop.f32.mrf.mxu1  ;;  %v380_v37 = vadd.f32 %v6689_v57, %v6688_v4  ;;  %v1881_v15 = vadd.f32 %v1880_v18, %v1828_v45  ;;  %v6692_v57 = vld [vmem:[#allocation65_spill] sm:$0xff] }
 0x340   :  { %v438_v4 = vadd.f32 %v6692_v57, %v6691_v31 }
 0x341   :  { %v1900_v17 = vadd.f32 %v1894_v40, %v6685_v5 }
 0x343   :  { %v4016_v26 = vmul.f32 -1.442695, %v1900_v17 }
 0x344   :  { %v4268_v35 = vpop.eup %4267 }
 0x345   :  { %v4270_v19 = vpop.eup %4269  ;;  %v1907_v1 = vadd.f32 1.0, %v4268_v35  ;;  %4271 = vpow2.f32 %v4016_v26 }
 0x346   :  { %v5527_v59 = vadd.f32 1.0, %v4270_v19  ;;  %v1882_v27 = vpop.f32.mrf.mxu2  ;;  %v1895_v53 = vpop.f32.mrf.mxu3 }
 0x347   :  { %4273 = vrcp.f32 %v1907_v1  ;;  %v6690_v53 = vld [vmem:[#allocation26_spill] sm:$0xff]  ;;  %vm1914_vm14 = vweird.f32 %v1907_v1 }
 0x348   :  { %4275 = vrcp.f32 %v5527_v59  ;;  %v1980_v42 = vpop.f32.mrf.mxu0  ;;  %v1993_v40 = vpop.f32.mrf.mxu1  ;;  %v1899_v5 = vadd.f32 %v1881_v15, %v6690_v53  ;;  %v1920_v15 = vand.u32 2147483648, %v1907_v1  ;;  %vm1929_vm15 = vweird.f32 %v5527_v59 }
 0x349   :  { %v2023_v60 = vadd.f32 %v1980_v42, %v351_v0  ;;  %v2024_v54 = vadd.f32 %v1993_v40, %v380_v37 }
 0x34b   :  { %v4272_v35 = vpop.eup %4271  ;;  %v4017_v17 = vmul.f32 -1.442695, %v2023_v60  ;;  %v4018_v19 = vmul.f32 -1.442695, %v2024_v54 }
 0x34c   :  { %v5534_v26 = vadd.f32 1.0, %v4272_v35  ;;  %v1918_v35 = vand.u32 2147483647, %v1907_v1 }
 0x34d   :  { %v4274_v27 = vpop.eup %4273  ;;  %4277 = vpow2.f32 %v4017_v17  ;;  %v1935_v17 = vand.u32 2147483648, %v5527_v59 }
 0x34e   :  { %v4276_v2 = vpop.eup %4275  ;;  %v1910_v29 = vmul.f32 %v4274_v27, %v1907_v1  ;;  %4279 = vrcp.f32 %v5534_v26  ;;  %vm1915_vm12 = vweird.f32 %v4274_v27  ;;  %vm1919_vm1 = vcmp.eq.f32.partialorder %v1918_v35, 8.507059e+37 }
 0x34f   :  { %v1925_v45 = vmul.f32 %v4276_v2, %v5527_v59  ;;  %4281 = vpow2.f32 %v4018_v19  ;;  %vm1930_vm13 = vweird.f32 %v4276_v2  ;;  %v1933_v19 = vand.u32 2147483647, %v5527_v59  ;;  %vm1916_vm0 = vmor %vm1914_vm14, %vm1915_vm12 }
 0x350   :  { %v2006_v18 = vpop.f32.mrf.mxu2  ;;  %v2019_v0 = vpop.f32.mrf.mxu3  ;;  %v1911_v37 = vsub.f32 1.0, %v1910_v29  ;;  %4283 = vtanh.f32 %v1899_v5  ;;  %vm1931_vm2 = vmor %vm1929_vm15, %vm1930_vm13  ;;  %v1936_v1 = vor.u32 1.1754944e-38, %v1935_v17  ;;  %vm1949_vm5 = vweird.f32 %v5534_v26 }
 0x351   :  { %v2026_v42 = vadd.f32 %v2019_v0, %v438_v4  ;;  %v1982_v40 = vpop.f32.mrf.mxu0  ;;  %v1995_v60 = vpop.f32.mrf.mxu1  ;;  %v1926_v54 = vsub.f32 1.0, %v1925_v45  ;;  %v1921_v45 = vor.u32 1.1754944e-38, %v1920_v15  ;;  %vm1934_vm3 = vcmp.eq.f32.partialorder %v1933_v19, 8.507059e+37 }
 0x352   :  { %v1912_v53 = vmul.f32 %v4274_v27, %v1911_v37  ;;  %v1955_v19 = vand.u32 2147483648, %v5534_v26 }
 0x353   :  { %v4019_v57 = vmul.f32 -1.442695, %v2026_v42  ;;  %v4278_v31 = vpop.eup %4277  ;;  %v1927_v10 = vmul.f32 %v4276_v2, %v1926_v54 }
 0x354   :  { %v5543_v22 = vpop.eup %4279  ;;  %v1913_v29 = vadd.f32 %v4274_v27, %v1912_v53  ;;  %v5546_v4 = vadd.f32 1.0, %v4278_v31 }
 0x355   :  { %4285 = vpow2.f32 %v4019_v57  ;;  %v4282_v5 = vpop.eup %4281  ;;  %v1928_v0 = vadd.f32 %v4276_v2, %v1927_v10  ;;  %v1945_v37 = vmul.f32 %v5543_v22, %v5534_v26  ;;  %vm1950_vm4 = vweird.f32 %v5543_v22 }
 0x356   :  { %v1917_v42 = vsel %vm1916_vm0, %v4274_v27, %v1913_v29  ;;  %4287 = vrcp.f32 %v5546_v4  ;;  %v5551_v40 = vadd.f32 1.0, %v4282_v5  ;;  %v4284_v59 = vpop.eup %4283  ;;  %v6693_v29 = vld [vmem:[#allocation49_spill] sm:$0xff]  ;;  %vm5571_vm6 = vmor %vm1949_vm5, %vm1950_vm4  ;;  %vm2040_vm8 = vweird.f32 %v5546_v4 }
 0x357   :  { %v1922_v53 = vsel %vm1919_vm1, %v1921_v45, %v1917_v42  ;;  %v1932_v31 = vsel %vm1931_vm2, %v4276_v2, %v1928_v0  ;;  %v1946_v60 = vsub.f32 1.0, %v1945_v37  ;;  %v409_v5 = vadd.f32 %v6694_v33, %v6693_v29  ;;  %v6723_v29 = vld [vmem:[#allocation69_spill] sm:$0xff] }
 0x358   :  { %v2008_v54 = vpop.f32.mrf.mxu2  ;;  %v2021_v57 = vpop.f32.mrf.mxu3  ;;  %v1937_v35 = vsel %vm1934_vm3, %v1936_v1, %v1932_v31  ;;  %v1960_v15 = vmul.f32 %v4284_v59, %v1922_v53  ;;  %4289 = vrcp.f32 %v5551_v40  ;;  %v1953_v33 = vand.u32 2147483647, %v5534_v26 }
 0x359   :  { %v1959_v10 = vmul.f32 %v1937_v35, %v5393_v32  ;;  %v1947_v17 = vmul.f32 %v5543_v22, %v1946_v60  ;;  %v2025_v0 = vadd.f32 %v2006_v18, %v409_v5  ;;  %v2046_v53 = vand.u32 2147483648, %v5546_v4 }
 0x35a   :  { %v1956_v60 = vor.u32 1.1754944e-38, %v1955_v19  ;;  %v2044_v26 = vand.u32 2147483647, %v5546_v4  ;;  %v2061_v35 = vand.u32 2147483648, %v5551_v40  ;;  %vm1954_vm9 = vcmp.eq.f32.partialorder %v1953_v33, 8.507059e+37 }
 0x35b   :  { %v4286_v27 = vpop.eup %4285  ;;  %v5558_v58 = vadd.f32 %v1960_v15, %v1959_v10  ;;  %v1948_v37 = vadd.f32 %v5543_v22, %v1947_v17  ;;  %v2059_v15 = vand.u32 2147483647, %v5551_v40  ;;  %vm2055_vm11 = vweird.f32 %v5551_v40 }
 0x35c   :  { %v5560_v45 = vadd.f32 1.0, %v4286_v27  ;;  %v4288_v2 = vpop.eup %4287  ;;  %vm2045_vm13 = vcmp.eq.f32.partialorder %v2044_v26, 8.507059e+37 }
 0x35d   :  { %4291 = vtanh.f32 %v5558_v58  ;;  %v2036_v32 = vmul.f32 %v4288_v2, %v5546_v4  ;;  %v1952_v31 = vsel %vm5571_vm6, %v5543_v22, %v1948_v37  ;;  %vm2041_vm7 = vweird.f32 %v4288_v2 }
 0x35e   :  { %v4290_v1 = vpop.eup %4289  ;;  %4293 = vrcp.f32 %v5560_v45  ;;  %v1957_v5 = vsel %vm1954_vm9, %v1956_v60, %v1952_v31  ;;  %vm2042_vm12 = vmor %vm2040_vm8, %vm2041_vm7  ;;  %v2047_v22 = vor.u32 1.1754944e-38, %v2046_v53  ;;  %vm2060_vm15 = vcmp.eq.f32.partialorder %v2059_v15, 8.507059e+37 }
 0x35f   :  { %v2037_v42 = vsub.f32 1.0, %v2036_v32  ;;  %v2051_v59 = vmul.f32 %v4290_v1, %v5551_v40  ;;  %4295 = vtanh.f32 %v2025_v0  ;;  %vm2056_vm10 = vweird.f32 %v4290_v1 }
 0x360   :  { %vm2057_vm14 = vmor %vm2055_vm11, %vm2056_vm10  ;;  %v2081_v26 = vand.u32 2147483648, %v5560_v45  ;;  %vm2075_vm1 = vweird.f32 %v5560_v45 }
 0x361   :  { %v2052_v54 = vsub.f32 1.0, %v2051_v59  ;;  %v2038_v57 = vmul.f32 %v4288_v2, %v2037_v42  ;;  %v2062_v59 = vor.u32 1.1754944e-38, %v2061_v35 }
 0x362   :  { %v2082_v15 = vor.u32 1.1754944e-38, %v2081_v26  ;;  %v6715_v26 = vld [vmem:[#allocation57_spill] sm:$0xff] }
 0x363   :  { %v4292_v10 = vpop.eup %4291  ;;  %v2053_v17 = vmul.f32 %v4290_v1, %v2052_v54  ;;  %v2039_v27 = vadd.f32 %v4288_v2, %v2038_v57 }
 0x364   :  { %v4294_v0 = vpop.eup %4293  ;;  %v1963_v19 = vmul.f32 %v4292_v10, %v1957_v5  ;;  %v6697_v5 = vld [vmem:[#allocation25_spill] sm:$0xff] }
 0x365   :  { %v2043_v37 = vsel %vm2042_vm12, %v4288_v2, %v2039_v27  ;;  %v2054_v32 = vadd.f32 %v4290_v1, %v2053_v17  ;;  %v2071_v42 = vmul.f32 %v4294_v0, %v5560_v45  ;;  %v4296_v4 = vpop.eup %4295  ;;  %vm2076_vm0 = vweird.f32 %v4294_v0 }
 0x366   :  { %v2048_v33 = vsel %vm2045_vm13, %v2047_v22, %v2043_v37  ;;  %v2091_v18 = vpack.c.bf16 %v1963_v19, %v1963_v19  ;;  %vm2077_vm2 = vmor %vm2075_vm1, %vm2076_vm0  ;;  %v6699_v22 = vld [vmem:[#allocation29_spill] sm:$0xff]  ;;  %v6700_v19 = vld [vmem:[#allocation30_spill] sm:$0xff] }
 0x367   :  { %v2058_v54 = vsel %vm2057_vm14, %v4290_v1, %v2054_v32  ;;  %v2086_v57 = vmul.f32 %v4296_v4, %v2048_v33  ;;  %v2072_v31 = vsub.f32 1.0, %v2071_v42  ;;  %v6701_v37 = vld [vmem:[#allocation31_spill] sm:$0xff]  ;;  %v6702_v32 = vld [vmem:[#allocation32_spill] sm:$0xff]  ;;  %v6703_v42 = vld [vmem:[#allocation33_spill] sm:$0xff] }
 0x368   :  { %v2063_v60 = vsel %vm2060_vm15, %v2062_v59, %v2058_v54  ;;  %2100 = vmatmul.bf16.vlgmr.msrb.gmra.mxu0 %v2091_v18  ;;  %2113 = vmatmul.bf16.vlgmr.msrb.gmra.mxu1 %v2091_v18  ;;  %v6704_v4 = vld [vmem:[#allocation34_spill] sm:$0xff]  ;;  %v6705_v59 = vld [vmem:[#allocation35_spill] sm:$0xff]  ;;  %v6706_v33 = vld [vmem:[#allocation41_spill] sm:$0xff] }
 0x369   :  { %v2085_v40 = vmul.f32 %v2063_v60, %v5424_v48  ;;  %v2073_v53 = vmul.f32 %v4294_v0, %v2072_v31  ;;  %2126 = vmatmul.bf16.vlgmr.msrb.gmra.mxu2 %v2091_v18  ;;  %2139 = vmatmul.bf16.vlgmr.msrb.gmra.mxu3 %v2091_v18  ;;  %v2079_v48 = vand.u32 2147483647, %v5560_v45  ;;  %v6707_v18 = vld [vmem:[#allocation43_spill] sm:$0xff]  ;;  %v6708_v54 = vld [vmem:[#allocation44_spill] sm:$0xff]  ;;  %v6710_v31 = vld [vmem:[#allocation46_spill] sm:$0xff] }
 0x36a   :  { %2270 = vmatpush.bf16.msrb.mxu0 %v4703_v38  ;;  %2283 = vmatpush.bf16.msrb.mxu1 %v4705_v43  ;;  %v6711_v60 = vld [vmem:[#allocation47_spill] sm:$0xff] }
 0x36b   :  { %v5588_v2 = vadd.f32 %v2086_v57, %v2085_v40  ;;  %2296 = vmatpush.bf16.msrb.mxu2 %v4707_v49  ;;  %2309 = vmatpush.bf16.msrb.mxu3 %v4710_v50  ;;  %v2074_v1 = vadd.f32 %v4294_v0, %v2073_v53  ;;  %vm2080_vm3 = vcmp.eq.f32.partialorder %v2079_v48, 8.507059e+37  ;;  %v6709_v57 = vld [vmem:[#allocation45_spill] sm:$0xff]  ;;  %v6712_v40 = vld [vmem:[#allocation48_spill] sm:$0xff]  ;;  %v6713_v53 = vld [vmem:[#allocation50_spill] sm:$0xff] }
 0x36c   :  { %v6716_v48 = vld [vmem:[#allocation58_spill] sm:$0xff] }
 0x36d   :  { %4297 = vtanh.f32 %v5588_v2  ;;  %v2078_v35 = vsel %vm2077_vm2, %v4294_v0, %v2074_v1  ;;  %v6698_v0 = vld [vmem:[#allocation28_spill] sm:$0xff] }
 0x36e   :  { %2271 = vmatpush.bf16.msrb.mxu0 %v4712_v51  ;;  %2284 = vmatpush.bf16.msrb.mxu1 %v4715_v55  ;;  %v2083_v17 = vsel %vm2080_vm3, %v2082_v15, %v2078_v35  ;;  %v6714_v1 = vld [vmem:[#allocation56_spill] sm:$0xff]  ;;  %v6717_v35 = vld [vmem:[#allocation59_spill] sm:$0xff] }
 0x36f   :  { %2297 = vmatpush.bf16.msrb.mxu2 %v4718_v61  ;;  %2310 = vmatpush.bf16.msrb.mxu3 %v4722_v62  ;;  %v6718_v15 = vld [vmem:[#allocation60_spill] sm:$0xff] }
 0x372   :  { %2272 = vmatpush.bf16.msrb.mxu0 %v4724_v63  ;;  %2285 = vmatpush.bf16.msrb.mxu1 %v4727_v3 }
 0x373   :  { %v4298_v10 = vpop.eup %4297  ;;  %2298 = vmatpush.bf16.msrb.mxu2 %v4730_v9  ;;  %2311 = vmatpush.bf16.msrb.mxu3 %v4734_v11 }
 0x374   :  { %v2089_v45 = vmul.f32 %v4298_v10, %v2083_v17  ;;  %v6719_v10 = vld [vmem:[#allocation61_spill] sm:$0xff]  ;;  %v6720_v17 = vld [vmem:[#allocation62_spill] sm:$0xff] }
 0x376   :  { %v2090_v27 = vpack.c.bf16 %v2089_v45, %v2089_v45  ;;  %2273 = vmatpush.bf16.msrb.mxu0 %v4736_v12  ;;  %2286 = vmatpush.bf16.msrb.mxu1 %v4739_v16  ;;  %v6721_v45 = vld [vmem:[#allocation63_spill] sm:$0xff] }
 0x377   :  { %2299 = vmatpush.bf16.msrb.mxu2 %v4742_v23  ;;  %2312 = vmatpush.bf16.msrb.mxu3 %v4746_v24 }
 0x378   :  { %2152 = vmatmul.bf16.vlgmr.msra.gmra.mxu0 %v2090_v27  ;;  %2165 = vmatmul.bf16.vlgmr.msra.gmra.mxu1 %v2090_v27 }
 0x379   :  { %2178 = vmatmul.bf16.vlgmr.msra.gmra.mxu2 %v2090_v27  ;;  %2191 = vmatmul.bf16.vlgmr.msra.gmra.mxu3 %v2090_v27 }
 0x37a   :  { %2274 = vmatpush.bf16.msrb.mxu0 %v4748_v25  ;;  %2287 = vmatpush.bf16.msrb.mxu1 %v4751_v30 }
 0x37b   :  { %2300 = vmatpush.bf16.msrb.mxu2 %v4754_v36  ;;  %2313 = vmatpush.bf16.msrb.mxu3 %v6553_v28 }
 0x37e   :  { %2275 = vmatpush.bf16.msrb.mxu0 %v4760_v39  ;;  %2288 = vmatpush.bf16.msrb.mxu1 %v6554_v34 }
 0x37f   :  { %2301 = vmatpush.bf16.msrb.mxu2 %v6555_v44  ;;  %2314 = vmatpush.bf16.msrb.mxu3 %v6556_v13 }
 0x382   :  { %2276 = vmatpush.bf16.msrb.mxu0 %v6557_v47  ;;  %2289 = vmatpush.bf16.msrb.mxu1 %v4773_v56 }
 0x383   :  { %2302 = vmatpush.bf16.msrb.mxu2 %v4784_v8  ;;  %2315 = vmatpush.bf16.msrb.mxu3 %v4780_v6 }
 0x386   :  { %2277 = vmatpush.bf16.msrb.mxu0 %v4782_v7  ;;  %2290 = vmatpush.bf16.msrb.mxu1 %v4787_v14 }
 0x387   :  { %2303 = vmatpush.bf16.msrb.mxu2 %v4790_v20  ;;  %2316 = vmatpush.bf16.msrb.mxu3 %v4794_v21 }
 0x389   :  { %2278 = vmatmul.bf16.vlgmr.msrb.gmra.mxu0 %v2090_v27  ;;  %2291 = vmatmul.bf16.vlgmr.msrb.gmra.mxu1 %v2090_v27 }
 0x38a   :  { %2391 = vmatpush.bf16.msra.mxu0 %v4807_v41  ;;  %2404 = vmatpush.bf16.msra.mxu1 %v4809_v46 }
 0x38b   :  { %2304 = vmatmul.bf16.vlgmr.msrb.gmra.mxu2 %v2090_v27  ;;  %2317 = vmatmul.bf16.vlgmr.msrb.gmra.mxu3 %v2090_v27  ;;  %v6722_v27 = vld [vmem:[#allocation67_spill] sm:$0xff] }
 0x38c   :  { %2417 = vmatpush.bf16.msra.mxu2 %v4811_v52  ;;  %2430 = vmatpush.bf16.msra.mxu3 %v6697_v5 }
 0x38e   :  { %2392 = vmatpush.bf16.msra.mxu0 %v6698_v0  ;;  %2405 = vmatpush.bf16.msra.mxu1 %v6699_v22 }
 0x390   :  { %2418 = vmatpush.bf16.msra.mxu2 %v6700_v19  ;;  %2431 = vmatpush.bf16.msra.mxu3 %v6701_v37 }
 0x392   :  { %2393 = vmatpush.bf16.msra.mxu0 %v6702_v32  ;;  %2406 = vmatpush.bf16.msra.mxu1 %v6703_v42 }
 0x394   :  { %2419 = vmatpush.bf16.msra.mxu2 %v6704_v4  ;;  %2432 = vmatpush.bf16.msra.mxu3 %v6705_v59 }
 0x396   :  { %2394 = vmatpush.bf16.msra.mxu0 %v6706_v33  ;;  %2407 = vmatpush.bf16.msra.mxu1 %v6707_v18  ;;  %v6758_v18 = vld [vmem:[#allocation118_spill] sm:$0xff]  ;;  %v6759_v33 = vld [vmem:[#allocation119_spill] sm:$0xff] }
 0x398   :  { %2420 = vmatpush.bf16.msra.mxu2 %v6708_v54  ;;  %2433 = vmatpush.bf16.msra.mxu3 %v6709_v57 }
 0x39a   :  { %2395 = vmatpush.bf16.msra.mxu0 %v6710_v31  ;;  %2408 = vmatpush.bf16.msra.mxu1 %v6711_v60 }
 0x39c   :  { %2421 = vmatpush.bf16.msra.mxu2 %v6712_v40  ;;  %2434 = vmatpush.bf16.msra.mxu3 %v6713_v53  ;;  %v6724_v53 = vld [vmem:[#allocation72_spill] sm:$0xff] }
 0x39e   :  { %2396 = vmatpush.bf16.msra.mxu0 %v6714_v1  ;;  %2409 = vmatpush.bf16.msra.mxu1 %v6715_v26  ;;  %v6725_v1 = vld [vmem:[#allocation73_spill] sm:$0xff]  ;;  %v6726_v26 = vld [vmem:[#allocation70_spill] sm:$0xff] }
 0x3a0   :  { %2422 = vmatpush.bf16.msra.mxu2 %v6716_v48  ;;  %2435 = vmatpush.bf16.msra.mxu3 %v6717_v35  ;;  %v6727_v48 = vld [vmem:[#allocation71_spill] sm:$0xff]  ;;  %v6728_v35 = vld [vmem:[#allocation74_spill] sm:$0xff] }
 0x3a2   :  { %2397 = vmatpush.bf16.msra.mxu0 %v6718_v15  ;;  %2410 = vmatpush.bf16.msra.mxu1 %v6719_v10  ;;  %v6729_v15 = vld [vmem:[#allocation75_spill] sm:$0xff]  ;;  %v6730_v10 = vld [vmem:[#allocation76_spill] sm:$0xff] }
 0x3a4   :  { %2423 = vmatpush.bf16.msra.mxu2 %v6720_v17  ;;  %2436 = vmatpush.bf16.msra.mxu3 %v6721_v45  ;;  %v6731_v17 = vld [vmem:[#allocation79_spill] sm:$0xff]  ;;  %v6732_v45 = vld [vmem:[#allocation80_spill] sm:$0xff] }
 0x3a6   :  { %2398 = vmatpush.bf16.msra.mxu0 %v6722_v27  ;;  %2411 = vmatpush.bf16.msra.mxu1 %v6723_v29  ;;  %v6733_v27 = vld [vmem:[#allocation83_spill] sm:$0xff]  ;;  %v6734_v29 = vld [vmem:[#allocation84_spill] sm:$0xff] }
 0x3a8   :  { %2424 = vmatpush.bf16.msra.mxu2 %v6726_v26  ;;  %2437 = vmatpush.bf16.msra.mxu3 %v6727_v48  ;;  %v6737_v26 = vld [vmem:[#allocation87_spill] sm:$0xff]  ;;  %v6738_v48 = vld [vmem:[#allocation89_spill] sm:$0xff] }
 0x3aa   :  { %2443 = vmatpush.bf16.msrb.mxu0 %v6724_v53  ;;  %2456 = vmatpush.bf16.msrb.mxu1 %v6725_v1  ;;  %v6735_v53 = vld [vmem:[#allocation85_spill] sm:$0xff]  ;;  %v6736_v1 = vld [vmem:[#allocation86_spill] sm:$0xff] }
 0x3ac   :  { %2469 = vmatpush.bf16.msrb.mxu2 %v6728_v35  ;;  %2482 = vmatpush.bf16.msrb.mxu3 %v6729_v15  ;;  %v6739_v35 = vld [vmem:[#allocation91_spill] sm:$0xff]  ;;  %v6740_v15 = vld [vmem:[#allocation92_spill] sm:$0xff] }
 0x3ae   :  { %2444 = vmatpush.bf16.msrb.mxu0 %v6730_v10  ;;  %2457 = vmatpush.bf16.msrb.mxu1 %v6731_v17  ;;  %v6741_v10 = vld [vmem:[#allocation94_spill] sm:$0xff]  ;;  %v6742_v17 = vld [vmem:[#allocation96_spill] sm:$0xff] }
 0x3b0   :  { %2470 = vmatpush.bf16.msrb.mxu2 %v6732_v45  ;;  %2483 = vmatpush.bf16.msrb.mxu3 %v6733_v27  ;;  %v6743_v45 = vld [vmem:[#allocation97_spill] sm:$0xff]  ;;  %v6744_v27 = vld [vmem:[#allocation98_spill] sm:$0xff] }
 0x3b2   :  { %2445 = vmatpush.bf16.msrb.mxu0 %v6734_v29  ;;  %2458 = vmatpush.bf16.msrb.mxu1 %v6735_v53  ;;  %v6745_v29 = vld [vmem:[#allocation99_spill] sm:$0xff]  ;;  %v6746_v53 = vld [vmem:[#allocation100_spill] sm:$0xff] }
 0x3b4   :  { %2471 = vmatpush.bf16.msrb.mxu2 %v6736_v1  ;;  %2484 = vmatpush.bf16.msrb.mxu3 %v6737_v26  ;;  %v6747_v1 = vld [vmem:[#allocation103_spill] sm:$0xff]  ;;  %v6748_v26 = vld [vmem:[#allocation104_spill] sm:$0xff] }
 0x3b6   :  { %2446 = vmatpush.bf16.msrb.mxu0 %v6738_v48  ;;  %2459 = vmatpush.bf16.msrb.mxu1 %v6739_v35  ;;  %v6749_v48 = vld [vmem:[#allocation107_spill] sm:$0xff]  ;;  %v6750_v35 = vld [vmem:[#allocation108_spill] sm:$0xff] }
 0x3b8   :  { %2472 = vmatpush.bf16.msrb.mxu2 %v6740_v15  ;;  %2485 = vmatpush.bf16.msrb.mxu3 %v6741_v10  ;;  %v6751_v15 = vld [vmem:[#allocation109_spill] sm:$0xff]  ;;  %v6752_v10 = vld [vmem:[#allocation110_spill] sm:$0xff] }
 0x3ba   :  { %2447 = vmatpush.bf16.msrb.mxu0 %v6742_v17  ;;  %2460 = vmatpush.bf16.msrb.mxu1 %v6743_v45  ;;  %v6753_v17 = vld [vmem:[#allocation111_spill] sm:$0xff]  ;;  %v6754_v45 = vld [vmem:[#allocation113_spill] sm:$0xff] }
 0x3bc   :  { %2473 = vmatpush.bf16.msrb.mxu2 %v6744_v27  ;;  %2486 = vmatpush.bf16.msrb.mxu3 %v6745_v29  ;;  %v6755_v27 = vld [vmem:[#allocation115_spill] sm:$0xff]  ;;  %v6756_v29 = vld [vmem:[#allocation116_spill] sm:$0xff] }
 0x3be   :  { %2448 = vmatpush.bf16.msrb.mxu0 %v6746_v53  ;;  %2461 = vmatpush.bf16.msrb.mxu1 %v6747_v1  ;;  %v6757_v53 = vld [vmem:[#allocation117_spill] sm:$0xff] }
 0x3c0   :  { %2474 = vmatpush.bf16.msrb.mxu2 %v6748_v26  ;;  %2487 = vmatpush.bf16.msrb.mxu3 %v6749_v48 }
 0x3c2   :  { %2449 = vmatpush.bf16.msrb.mxu0 %v6750_v35  ;;  %2462 = vmatpush.bf16.msrb.mxu1 %v6751_v15 }
 0x3c4   :  { %2475 = vmatpush.bf16.msrb.mxu2 %v6752_v10  ;;  %2488 = vmatpush.bf16.msrb.mxu3 %v6753_v17 }
 0x3c6   :  { %2450 = vmatpush.bf16.msrb.mxu0 %v6754_v45  ;;  %2463 = vmatpush.bf16.msrb.mxu1 %v6755_v27 }
 0x3c8   :  { %2476 = vmatpush.bf16.msrb.mxu2 %v6756_v29  ;;  %2489 = vmatpush.bf16.msrb.mxu3 %v6757_v53 }
 0x3e5   :  { %v2101_v1 = vpop.f32.mrf.mxu0  ;;  %v2114_v26 = vpop.f32.mrf.mxu1 }
 0x3ec   :  { %v2127_v40 = vpop.f32.mrf.mxu2  ;;  %v2140_v48 = vpop.f32.mrf.mxu3 }
 0x3ed   :  { %v2103_v60 = vpop.f32.mrf.mxu0  ;;  %v2116_v35 = vpop.f32.mrf.mxu1 }
 0x3ee   :  { %v6760_v35 = vld [vmem:[#allocation120_spill] sm:$0xff] }
 0x3f4   :  { %v2129_v31 = vpop.f32.mrf.mxu2  ;;  %v2142_v15 = vpop.f32.mrf.mxu3 }
 0x3f5   :  { %v2153_v57 = vpop.f32.mrf.mxu0  ;;  %v2166_v10 = vpop.f32.mrf.mxu1 }
 0x3f6   :  { %v2154_v54 = vadd.f32 %v2153_v57, %v2101_v1  ;;  %v2167_v17 = vadd.f32 %v2166_v10, %v2114_v26 }
 0x3f8   :  { %v2196_v45 = vadd.f32 %v2154_v54, %v6758_v18  ;;  %v2197_v27 = vadd.f32 %v2167_v17, %v6759_v33 }
 0x3fa   :  { %v4020_v59 = vmul.f32 -1.442695, %v2196_v45  ;;  %v4021_v29 = vmul.f32 -1.442695, %v2197_v27  ;;  %v6761_v45 = vld [vmem:[#allocation66_spill] sm:$0xff] }
 0x3fc   :  { %4299 = vpow2.f32 %v4020_v59  ;;  %v2179_v53 = vpop.f32.mrf.mxu2  ;;  %v2192_v4 = vpop.f32.mrf.mxu3 }
 0x3fd   :  { %4301 = vpow2.f32 %v4021_v29  ;;  %v2193_v42 = vadd.f32 %v2192_v4, %v2140_v48  ;;  %v2155_v32 = vpop.f32.mrf.mxu0  ;;  %v2168_v60 = vpop.f32.mrf.mxu1  ;;  %v2180_v17 = vadd.f32 %v2179_v53, %v2127_v40  ;;  %v6762_v4 = vld [vmem:[#allocation68_spill] sm:$0xff] }
 0x3ff   :  { %v2199_v31 = vadd.f32 %v2193_v42, %v6760_v35 }
 0x401   :  { %v4022_v15 = vmul.f32 -1.442695, %v2199_v31 }
 0x402   :  { %v4300_v37 = vpop.eup %4299 }
 0x403   :  { %v4302_v19 = vpop.eup %4301  ;;  %v2206_v57 = vadd.f32 1.0, %v4300_v37  ;;  %4303 = vpow2.f32 %v4022_v15  ;;  %v6763_v37 = vld [vmem:[#allocation26_spill] sm:$0xff] }
 0x404   :  { %v2207_v1 = vadd.f32 1.0, %v4302_v19  ;;  %v2181_v54 = vpop.f32.mrf.mxu2  ;;  %v2194_v26 = vpop.f32.mrf.mxu3  ;;  %v2198_v15 = vadd.f32 %v2180_v17, %v6763_v37 }
 0x405   :  { %4305 = vrcp.f32 %v2206_v57  ;;  %v2219_v35 = vand.u32 2147483648, %v2206_v57  ;;  %vm2213_vm6 = vweird.f32 %v2206_v57 }
 0x406   :  { %4307 = vrcp.f32 %v2207_v1  ;;  %v2279_v10 = vpop.f32.mrf.mxu0  ;;  %v2292_v59 = vpop.f32.mrf.mxu1  ;;  %v2234_v33 = vand.u32 2147483648, %v2207_v1  ;;  %vm2228_vm7 = vweird.f32 %v2207_v1 }
 0x407   :  { %v2322_v29 = vadd.f32 %v2279_v10, %v6761_v45  ;;  %v2323_v32 = vadd.f32 %v2292_v59, %v6762_v4  ;;  %v6764_v45 = vld [vmem:[#allocation81_spill] sm:$0xff] }
 0x409   :  { %v4304_v48 = vpop.eup %4303  ;;  %v4023_v27 = vmul.f32 -1.442695, %v2322_v29  ;;  %v4024_v42 = vmul.f32 -1.442695, %v2323_v32 }
 0x40a   :  { %v5693_v60 = vadd.f32 1.0, %v4304_v48  ;;  %v2217_v48 = vand.u32 2147483647, %v2206_v57 }
 0x40b   :  { %v4306_v31 = vpop.eup %4305  ;;  %4309 = vpow2.f32 %v4023_v27 }
 0x40c   :  { %v4308_v19 = vpop.eup %4307  ;;  %v2209_v54 = vmul.f32 %v4306_v31, %v2206_v57  ;;  %4311 = vrcp.f32 %v5693_v60  ;;  %vm2214_vm4 = vweird.f32 %v4306_v31  ;;  %vm2218_vm9 = vcmp.eq.f32.partialorder %v2217_v48, 8.507059e+37 }
 0x40d   :  { %v2224_v26 = vmul.f32 %v4308_v19, %v2207_v1  ;;  %4313 = vpow2.f32 %v4024_v42  ;;  %vm2229_vm5 = vweird.f32 %v4308_v19  ;;  %v2232_v42 = vand.u32 2147483647, %v2207_v1  ;;  %vm2215_vm8 = vmor %vm2213_vm6, %vm2214_vm4 }
 0x40e   :  { %v2305_v40 = vpop.f32.mrf.mxu2  ;;  %v2318_v53 = vpop.f32.mrf.mxu3  ;;  %v2210_v10 = vsub.f32 1.0, %v2209_v54  ;;  %4315 = vtanh.f32 %v2198_v15  ;;  %v2220_v15 = vor.u32 1.1754944e-38, %v2219_v35  ;;  %vm2230_vm10 = vmor %vm2228_vm7, %vm2229_vm5  ;;  %vm2248_vm13 = vweird.f32 %v5693_v60 }
 0x40f   :  { %v2325_v59 = vadd.f32 %v2318_v53, %v6764_v45  ;;  %v2281_v4 = vpop.f32.mrf.mxu0  ;;  %v2294_v29 = vpop.f32.mrf.mxu1  ;;  %v2225_v32 = vsub.f32 1.0, %v2224_v26  ;;  %vm2233_vm11 = vcmp.eq.f32.partialorder %v2232_v42, 8.507059e+37  ;;  %v6765_v42 = vld [vmem:[#allocation77_spill] sm:$0xff] }
 0x410   :  { %v2211_v17 = vmul.f32 %v4306_v31, %v2210_v10 }
 0x411   :  { %v4025_v27 = vmul.f32 -1.442695, %v2325_v59  ;;  %v4310_v37 = vpop.eup %4309  ;;  %v2226_v18 = vmul.f32 %v4308_v19, %v2225_v32  ;;  %v2235_v59 = vor.u32 1.1754944e-38, %v2234_v33 }
 0x412   :  { %v5698_v22 = vpop.eup %4311  ;;  %v2212_v54 = vadd.f32 %v4306_v31, %v2211_v17  ;;  %v5700_v53 = vadd.f32 1.0, %v4310_v37 }
 0x413   :  { %4317 = vpow2.f32 %v4025_v27  ;;  %v4314_v26 = vpop.eup %4313  ;;  %v2227_v45 = vadd.f32 %v4308_v19, %v2226_v18  ;;  %v2244_v10 = vmul.f32 %v5698_v22, %v5693_v60  ;;  %vm2249_vm12 = vweird.f32 %v5698_v22 }
 0x414   :  { %v2216_v4 = vsel %vm2215_vm8, %v4306_v31, %v2212_v54  ;;  %4319 = vrcp.f32 %v5700_v53  ;;  %v5705_v57 = vadd.f32 1.0, %v4314_v26  ;;  %v4316_v1 = vpop.eup %4315  ;;  %vm5724_vm14 = vmor %vm2248_vm13, %vm2249_vm12  ;;  %vm2339_vm0 = vweird.f32 %v5700_v53 }
 0x415   :  { %v2221_v29 = vsel %vm2218_vm9, %v2220_v15, %v2216_v4  ;;  %v2231_v37 = vsel %vm2230_vm10, %v4308_v19, %v2227_v45  ;;  %v2245_v32 = vsub.f32 1.0, %v2244_v10  ;;  %v2254_v19 = vand.u32 2147483648, %v5693_v60 }
 0x416   :  { %v2307_v17 = vpop.f32.mrf.mxu2  ;;  %v2320_v27 = vpop.f32.mrf.mxu3  ;;  %v2236_v48 = vsel %vm2233_vm11, %v2235_v59, %v2231_v37  ;;  %v2259_v35 = vmul.f32 %v4316_v1, %v2221_v29  ;;  %4321 = vrcp.f32 %v5705_v57  ;;  %v2324_v15 = vadd.f32 %v2305_v40, %v6765_v42 }
 0x417   :  { %v2258_v18 = vmul.f32 %v2236_v48, %v5558_v58  ;;  %v2246_v33 = vmul.f32 %v5698_v22, %v2245_v32  ;;  %v2252_v59 = vand.u32 2147483647, %v5693_v60  ;;  %v2345_v29 = vand.u32 2147483648, %v5700_v53 }
 0x418   :  { %v2255_v32 = vor.u32 1.1754944e-38, %v2254_v19  ;;  %v2343_v60 = vand.u32 2147483647, %v5700_v53  ;;  %v2360_v48 = vand.u32 2147483648, %v5705_v57  ;;  %vm2354_vm3 = vweird.f32 %v5705_v57 }
 0x419   :  { %v4318_v31 = vpop.eup %4317  ;;  %v5710_v54 = vadd.f32 %v2259_v35, %v2258_v18  ;;  %v2247_v45 = vadd.f32 %v5698_v22, %v2246_v33  ;;  %v2358_v35 = vand.u32 2147483647, %v5705_v57  ;;  %vm2253_vm1 = vcmp.eq.f32.partialorder %v2252_v59, 8.507059e+37 }
 0x41a   :  { %v5712_v26 = vadd.f32 1.0, %v4318_v31  ;;  %v4320_v0 = vpop.eup %4319  ;;  %vm2344_vm5 = vcmp.eq.f32.partialorder %v2343_v60, 8.507059e+37 }
 0x41b   :  { %4323 = vtanh.f32 %v5710_v54  ;;  %v2335_v58 = vmul.f32 %v4320_v0, %v5700_v53  ;;  %v2251_v37 = vsel %vm5724_vm14, %v5698_v22, %v2247_v45  ;;  %vm2340_vm15 = vweird.f32 %v4320_v0 }
 0x41c   :  { %v4322_v10 = vpop.eup %4321  ;;  %4325 = vrcp.f32 %v5712_v26  ;;  %v2256_v42 = vsel %vm2253_vm1, %v2255_v32, %v2251_v37  ;;  %vm2341_vm4 = vmor %vm2339_vm0, %vm2340_vm15  ;;  %v2346_v22 = vor.u32 1.1754944e-38, %v2345_v29  ;;  %vm2359_vm7 = vcmp.eq.f32.partialorder %v2358_v35, 8.507059e+37 }
 0x41d   :  { %v2336_v4 = vsub.f32 1.0, %v2335_v58  ;;  %v2350_v1 = vmul.f32 %v4322_v10, %v5705_v57  ;;  %4327 = vtanh.f32 %v2324_v15  ;;  %vm2355_vm2 = vweird.f32 %v4322_v10 }
 0x41e   :  { %vm2356_vm6 = vmor %vm2354_vm3, %vm2355_vm2  ;;  %v2380_v60 = vand.u32 2147483648, %v5712_v26  ;;  %vm2374_vm9 = vweird.f32 %v5712_v26 }
 0x41f   :  { %v2351_v17 = vsub.f32 1.0, %v2350_v1  ;;  %v2337_v27 = vmul.f32 %v4320_v0, %v2336_v4  ;;  %v2361_v1 = vor.u32 1.1754944e-38, %v2360_v48 }
 0x420   :  { %v2381_v35 = vor.u32 1.1754944e-38, %v2380_v60  ;;  %v6786_v60 = vld [vmem:[#allocation58_spill] sm:$0xff] }
 0x421   :  { %v4324_v18 = vpop.eup %4323  ;;  %v2352_v33 = vmul.f32 %v4322_v10, %v2351_v17  ;;  %v2338_v31 = vadd.f32 %v4320_v0, %v2337_v27 }
 0x422   :  { %v4326_v15 = vpop.eup %4325  ;;  %v2262_v19 = vmul.f32 %v4324_v18, %v2256_v42  ;;  %v6768_v42 = vld [vmem:[#allocation28_spill] sm:$0xff] }
 0x423   :  { %v2342_v45 = vsel %vm2341_vm4, %v4320_v0, %v2338_v31  ;;  %v2353_v58 = vadd.f32 %v4322_v10, %v2352_v33  ;;  %v2370_v4 = vmul.f32 %v4326_v15, %v5712_v26  ;;  %v4328_v53 = vpop.eup %4327  ;;  %vm2375_vm8 = vweird.f32 %v4326_v15 }
 0x424   :  { %v2347_v59 = vsel %vm2344_vm5, %v2346_v22, %v2342_v45  ;;  %v2390_v40 = vpack.c.bf16 %v2262_v19, %v2262_v19  ;;  %vm2376_vm10 = vmor %vm2374_vm9, %vm2375_vm8  ;;  %v6770_v22 = vld [vmem:[#allocation30_spill] sm:$0xff]  ;;  %v6771_v19 = vld [vmem:[#allocation31_spill] sm:$0xff] }
 0x425   :  { %v2357_v17 = vsel %vm2356_vm6, %v4322_v10, %v2353_v58  ;;  %v2385_v27 = vmul.f32 %v4328_v53, %v2347_v59  ;;  %v2371_v37 = vsub.f32 1.0, %v2370_v4  ;;  %v6772_v45 = vld [vmem:[#allocation32_spill] sm:$0xff]  ;;  %v6773_v58 = vld [vmem:[#allocation33_spill] sm:$0xff]  ;;  %v6774_v4 = vld [vmem:[#allocation34_spill] sm:$0xff] }
 0x426   :  { %v2362_v32 = vsel %vm2359_vm7, %v2361_v1, %v2357_v17  ;;  %2399 = vmatmul.bf16.vlgmr.msra.gmra.mxu0 %v2390_v40  ;;  %2412 = vmatmul.bf16.vlgmr.msra.gmra.mxu1 %v2390_v40  ;;  %v6775_v53 = vld [vmem:[#allocation35_spill] sm:$0xff]  ;;  %v6776_v1 = vld [vmem:[#allocation41_spill] sm:$0xff] }
 0x427   :  { %v2384_v57 = vmul.f32 %v2362_v32, %v5588_v2  ;;  %v2372_v29 = vmul.f32 %v4326_v15, %v2371_v37  ;;  %2425 = vmatmul.bf16.vlgmr.msra.gmra.mxu2 %v2390_v40  ;;  %2438 = vmatmul.bf16.vlgmr.msra.gmra.mxu3 %v2390_v40  ;;  %v2378_v2 = vand.u32 2147483647, %v5712_v26  ;;  %v6777_v59 = vld [vmem:[#allocation43_spill] sm:$0xff]  ;;  %v6778_v40 = vld [vmem:[#allocation44_spill] sm:$0xff]  ;;  %v6779_v17 = vld [vmem:[#allocation45_spill] sm:$0xff] }
 0x428   :  { %2569 = vmatpush.bf16.msra.mxu0 %v4703_v38  ;;  %2582 = vmatpush.bf16.msra.mxu1 %v4705_v43  ;;  %v6781_v37 = vld [vmem:[#allocation47_spill] sm:$0xff]  ;;  %v6782_v32 = vld [vmem:[#allocation48_spill] sm:$0xff] }
 0x429   :  { %v5741_v0 = vadd.f32 %v2385_v27, %v2384_v57  ;;  %2595 = vmatpush.bf16.msra.mxu2 %v4707_v49  ;;  %2608 = vmatpush.bf16.msra.mxu3 %v4710_v50  ;;  %v2373_v10 = vadd.f32 %v4326_v15, %v2372_v29  ;;  %vm2379_vm11 = vcmp.eq.f32.partialorder %v2378_v2, 8.507059e+37  ;;  %v6780_v27 = vld [vmem:[#allocation46_spill] sm:$0xff]  ;;  %v6784_v29 = vld [vmem:[#allocation56_spill] sm:$0xff]  ;;  %v6787_v2 = vld [vmem:[#allocation59_spill] sm:$0xff] }
 0x42a   :  { %v6783_v57 = vld [vmem:[#allocation50_spill] sm:$0xff] }
 0x42b   :  { %4329 = vtanh.f32 %v5741_v0  ;;  %v2377_v48 = vsel %vm2376_vm10, %v4326_v15, %v2373_v10  ;;  %v6769_v15 = vld [vmem:[#allocation29_spill] sm:$0xff] }
 0x42c   :  { %2570 = vmatpush.bf16.msra.mxu0 %v4712_v51  ;;  %2583 = vmatpush.bf16.msra.mxu1 %v4715_v55  ;;  %v2382_v33 = vsel %vm2379_vm11, %v2381_v35, %v2377_v48  ;;  %v6785_v10 = vld [vmem:[#allocation57_spill] sm:$0xff]  ;;  %v6788_v48 = vld [vmem:[#allocation60_spill] sm:$0xff] }
 0x42d   :  { %2596 = vmatpush.bf16.msra.mxu2 %v4718_v61  ;;  %2609 = vmatpush.bf16.msra.mxu3 %v4722_v62  ;;  %v6789_v35 = vld [vmem:[#allocation61_spill] sm:$0xff] }
 0x430   :  { %2571 = vmatpush.bf16.msra.mxu0 %v4724_v63  ;;  %2584 = vmatpush.bf16.msra.mxu1 %v4727_v3 }
 0x431   :  { %v4330_v18 = vpop.eup %4329  ;;  %2597 = vmatpush.bf16.msra.mxu2 %v4730_v9  ;;  %2610 = vmatpush.bf16.msra.mxu3 %v4734_v11 }
 0x432   :  { %v2388_v26 = vmul.f32 %v4330_v18, %v2382_v33  ;;  %v6790_v18 = vld [vmem:[#allocation62_spill] sm:$0xff]  ;;  %v6791_v33 = vld [vmem:[#allocation63_spill] sm:$0xff] }
 0x434   :  { %v2389_v31 = vpack.c.bf16 %v2388_v26, %v2388_v26  ;;  %2572 = vmatpush.bf16.msra.mxu0 %v4736_v12  ;;  %2585 = vmatpush.bf16.msra.mxu1 %v4739_v16  ;;  %v6792_v26 = vld [vmem:[#allocation67_spill] sm:$0xff] }
 0x435   :  { %2598 = vmatpush.bf16.msra.mxu2 %v4742_v23  ;;  %2611 = vmatpush.bf16.msra.mxu3 %v4746_v24 }
 0x436   :  { %2451 = vmatmul.bf16.vlgmr.msrb.gmra.mxu0 %v2389_v31  ;;  %2464 = vmatmul.bf16.vlgmr.msrb.gmra.mxu1 %v2389_v31 }
 0x437   :  { %2477 = vmatmul.bf16.vlgmr.msrb.gmra.mxu2 %v2389_v31  ;;  %2490 = vmatmul.bf16.vlgmr.msrb.gmra.mxu3 %v2389_v31 }
 0x438   :  { %2573 = vmatpush.bf16.msra.mxu0 %v4748_v25  ;;  %2586 = vmatpush.bf16.msra.mxu1 %v4751_v30 }
 0x439   :  { %2599 = vmatpush.bf16.msra.mxu2 %v4754_v36  ;;  %2612 = vmatpush.bf16.msra.mxu3 %v6553_v28 }
 0x43c   :  { %2574 = vmatpush.bf16.msra.mxu0 %v4760_v39  ;;  %2587 = vmatpush.bf16.msra.mxu1 %v6554_v34 }
 0x43d   :  { %2600 = vmatpush.bf16.msra.mxu2 %v6555_v44  ;;  %2613 = vmatpush.bf16.msra.mxu3 %v6556_v13 }
 0x440   :  { %2575 = vmatpush.bf16.msra.mxu0 %v6557_v47  ;;  %2588 = vmatpush.bf16.msra.mxu1 %v4773_v56 }
 0x441   :  { %2601 = vmatpush.bf16.msra.mxu2 %v4784_v8  ;;  %2614 = vmatpush.bf16.msra.mxu3 %v4780_v6 }
 0x444   :  { %2576 = vmatpush.bf16.msra.mxu0 %v4782_v7  ;;  %2589 = vmatpush.bf16.msra.mxu1 %v4787_v14 }
 0x445   :  { %2602 = vmatpush.bf16.msra.mxu2 %v4790_v20  ;;  %2615 = vmatpush.bf16.msra.mxu3 %v4794_v21 }
 0x447   :  { %2577 = vmatmul.bf16.vlgmr.msra.gmra.mxu0 %v2389_v31  ;;  %2590 = vmatmul.bf16.vlgmr.msra.gmra.mxu1 %v2389_v31 }
 0x448   :  { %2690 = vmatpush.bf16.msrb.mxu0 %v4807_v41  ;;  %2703 = vmatpush.bf16.msrb.mxu1 %v4809_v46 }
 0x449   :  { %2603 = vmatmul.bf16.vlgmr.msra.gmra.mxu2 %v2389_v31  ;;  %2616 = vmatmul.bf16.vlgmr.msra.gmra.mxu3 %v2389_v31  ;;  %v6793_v31 = vld [vmem:[#allocation69_spill] sm:$0xff] }
 0x44a   :  { %2716 = vmatpush.bf16.msrb.mxu2 %v4811_v52  ;;  %2729 = vmatpush.bf16.msrb.mxu3 %v6697_v5 }
 0x44c   :  { %2691 = vmatpush.bf16.msrb.mxu0 %v6768_v42  ;;  %2704 = vmatpush.bf16.msrb.mxu1 %v6769_v15  ;;  %v6839_v42 = vld [vmem:[#allocation88_spill] sm:$0xff] }
 0x44e   :  { %2717 = vmatpush.bf16.msrb.mxu2 %v6770_v22  ;;  %2730 = vmatpush.bf16.msrb.mxu3 %v6771_v19 }
 0x450   :  { %2692 = vmatpush.bf16.msrb.mxu0 %v6772_v45  ;;  %2705 = vmatpush.bf16.msrb.mxu1 %v6773_v58 }
 0x452   :  { %2718 = vmatpush.bf16.msrb.mxu2 %v6774_v4  ;;  %2731 = vmatpush.bf16.msrb.mxu3 %v6775_v53 }
 0x454   :  { %2693 = vmatpush.bf16.msrb.mxu0 %v6776_v1  ;;  %2706 = vmatpush.bf16.msrb.mxu1 %v6777_v59  ;;  %v6828_v59 = vld [vmem:[#allocation118_spill] sm:$0xff]  ;;  %v6829_v1 = vld [vmem:[#allocation119_spill] sm:$0xff] }
 0x456   :  { %2719 = vmatpush.bf16.msrb.mxu2 %v6778_v40  ;;  %2732 = vmatpush.bf16.msrb.mxu3 %v6779_v17 }
 0x458   :  { %2694 = vmatpush.bf16.msrb.mxu0 %v6780_v27  ;;  %2707 = vmatpush.bf16.msrb.mxu1 %v6781_v37 }
 0x45a   :  { %2720 = vmatpush.bf16.msrb.mxu2 %v6782_v32  ;;  %2733 = vmatpush.bf16.msrb.mxu3 %v6783_v57  ;;  %v6794_v57 = vld [vmem:[#allocation72_spill] sm:$0xff] }
 0x45c   :  { %2695 = vmatpush.bf16.msrb.mxu0 %v6784_v29  ;;  %2708 = vmatpush.bf16.msrb.mxu1 %v6785_v10  ;;  %v6795_v29 = vld [vmem:[#allocation73_spill] sm:$0xff]  ;;  %v6796_v10 = vld [vmem:[#allocation70_spill] sm:$0xff] }
 0x45e   :  { %2721 = vmatpush.bf16.msrb.mxu2 %v6786_v60  ;;  %2734 = vmatpush.bf16.msrb.mxu3 %v6787_v2  ;;  %v6797_v60 = vld [vmem:[#allocation71_spill] sm:$0xff]  ;;  %v6798_v2 = vld [vmem:[#allocation74_spill] sm:$0xff] }
 0x460   :  { %2696 = vmatpush.bf16.msrb.mxu0 %v6788_v48  ;;  %2709 = vmatpush.bf16.msrb.mxu1 %v6789_v35  ;;  %v6799_v48 = vld [vmem:[#allocation75_spill] sm:$0xff]  ;;  %v6800_v35 = vld [vmem:[#allocation76_spill] sm:$0xff] }
 0x462   :  { %2722 = vmatpush.bf16.msrb.mxu2 %v6790_v18  ;;  %2735 = vmatpush.bf16.msrb.mxu3 %v6791_v33  ;;  %v6801_v18 = vld [vmem:[#allocation79_spill] sm:$0xff]  ;;  %v6802_v33 = vld [vmem:[#allocation80_spill] sm:$0xff] }
 0x464   :  { %2697 = vmatpush.bf16.msrb.mxu0 %v6792_v26  ;;  %2710 = vmatpush.bf16.msrb.mxu1 %v6793_v31  ;;  %v6803_v26 = vld [vmem:[#allocation83_spill] sm:$0xff]  ;;  %v6804_v31 = vld [vmem:[#allocation84_spill] sm:$0xff] }
 0x466   :  { %2723 = vmatpush.bf16.msrb.mxu2 %v6796_v10  ;;  %2736 = vmatpush.bf16.msrb.mxu3 %v6797_v60  ;;  %v6807_v10 = vld [vmem:[#allocation87_spill] sm:$0xff]  ;;  %v6808_v60 = vld [vmem:[#allocation89_spill] sm:$0xff] }
 0x468   :  { %2742 = vmatpush.bf16.msra.mxu0 %v6794_v57  ;;  %2755 = vmatpush.bf16.msra.mxu1 %v6795_v29  ;;  %v6805_v57 = vld [vmem:[#allocation85_spill] sm:$0xff]  ;;  %v6806_v29 = vld [vmem:[#allocation86_spill] sm:$0xff] }
 0x46a   :  { %2768 = vmatpush.bf16.msra.mxu2 %v6798_v2  ;;  %2781 = vmatpush.bf16.msra.mxu3 %v6799_v48  ;;  %v6809_v2 = vld [vmem:[#allocation91_spill] sm:$0xff]  ;;  %v6810_v48 = vld [vmem:[#allocation92_spill] sm:$0xff] }
 0x46c   :  { %2743 = vmatpush.bf16.msra.mxu0 %v6800_v35  ;;  %2756 = vmatpush.bf16.msra.mxu1 %v6801_v18  ;;  %v6811_v35 = vld [vmem:[#allocation94_spill] sm:$0xff]  ;;  %v6812_v18 = vld [vmem:[#allocation96_spill] sm:$0xff] }
 0x46e   :  { %2769 = vmatpush.bf16.msra.mxu2 %v6802_v33  ;;  %2782 = vmatpush.bf16.msra.mxu3 %v6803_v26  ;;  %v6813_v33 = vld [vmem:[#allocation97_spill] sm:$0xff]  ;;  %v6814_v26 = vld [vmem:[#allocation98_spill] sm:$0xff] }
 0x470   :  { %2744 = vmatpush.bf16.msra.mxu0 %v6804_v31  ;;  %2757 = vmatpush.bf16.msra.mxu1 %v6805_v57  ;;  %v6815_v31 = vld [vmem:[#allocation99_spill] sm:$0xff]  ;;  %v6816_v57 = vld [vmem:[#allocation100_spill] sm:$0xff] }
 0x472   :  { %2770 = vmatpush.bf16.msra.mxu2 %v6806_v29  ;;  %2783 = vmatpush.bf16.msra.mxu3 %v6807_v10  ;;  %v6817_v29 = vld [vmem:[#allocation103_spill] sm:$0xff]  ;;  %v6818_v10 = vld [vmem:[#allocation104_spill] sm:$0xff] }
 0x474   :  { %2745 = vmatpush.bf16.msra.mxu0 %v6808_v60  ;;  %2758 = vmatpush.bf16.msra.mxu1 %v6809_v2  ;;  %v6819_v60 = vld [vmem:[#allocation107_spill] sm:$0xff]  ;;  %v6820_v2 = vld [vmem:[#allocation108_spill] sm:$0xff] }
 0x476   :  { %2771 = vmatpush.bf16.msra.mxu2 %v6810_v48  ;;  %2784 = vmatpush.bf16.msra.mxu3 %v6811_v35  ;;  %v6821_v48 = vld [vmem:[#allocation109_spill] sm:$0xff]  ;;  %v6822_v35 = vld [vmem:[#allocation110_spill] sm:$0xff] }
 0x478   :  { %2746 = vmatpush.bf16.msra.mxu0 %v6812_v18  ;;  %2759 = vmatpush.bf16.msra.mxu1 %v6813_v33  ;;  %v6823_v18 = vld [vmem:[#allocation111_spill] sm:$0xff]  ;;  %v6824_v33 = vld [vmem:[#allocation113_spill] sm:$0xff] }
 0x47a   :  { %2772 = vmatpush.bf16.msra.mxu2 %v6814_v26  ;;  %2785 = vmatpush.bf16.msra.mxu3 %v6815_v31  ;;  %v6825_v26 = vld [vmem:[#allocation115_spill] sm:$0xff]  ;;  %v6826_v31 = vld [vmem:[#allocation116_spill] sm:$0xff] }
 0x47c   :  { %2747 = vmatpush.bf16.msra.mxu0 %v6816_v57  ;;  %2760 = vmatpush.bf16.msra.mxu1 %v6817_v29  ;;  %v6827_v57 = vld [vmem:[#allocation117_spill] sm:$0xff] }
 0x47e   :  { %2773 = vmatpush.bf16.msra.mxu2 %v6818_v10  ;;  %2786 = vmatpush.bf16.msra.mxu3 %v6819_v60 }
 0x480   :  { %2748 = vmatpush.bf16.msra.mxu0 %v6820_v2  ;;  %2761 = vmatpush.bf16.msra.mxu1 %v6821_v48 }
 0x482   :  { %2774 = vmatpush.bf16.msra.mxu2 %v6822_v35  ;;  %2787 = vmatpush.bf16.msra.mxu3 %v6823_v18 }
 0x484   :  { %2749 = vmatpush.bf16.msra.mxu0 %v6824_v33  ;;  %2762 = vmatpush.bf16.msra.mxu1 %v6825_v26 }
 0x486   :  { %2775 = vmatpush.bf16.msra.mxu2 %v6826_v31  ;;  %2788 = vmatpush.bf16.msra.mxu3 %v6827_v57 }
 0x4a3   :  { %v2400_v29 = vpop.f32.mrf.mxu0  ;;  %v2413_v10 = vpop.f32.mrf.mxu1 }
 0x4aa   :  { %v2426_v32 = vpop.f32.mrf.mxu2  ;;  %v2439_v60 = vpop.f32.mrf.mxu3 }
 0x4ab   :  { %v2402_v37 = vpop.f32.mrf.mxu0  ;;  %v2415_v2 = vpop.f32.mrf.mxu1 }
 0x4ac   :  { %v6830_v2 = vld [vmem:[#allocation120_spill] sm:$0xff] }
 0x4b2   :  { %v2428_v27 = vpop.f32.mrf.mxu2  ;;  %v2441_v48 = vpop.f32.mrf.mxu3 }
 0x4b3   :  { %v2452_v17 = vpop.f32.mrf.mxu0  ;;  %v2465_v35 = vpop.f32.mrf.mxu1 }
 0x4b4   :  { %v2453_v40 = vadd.f32 %v2452_v17, %v2400_v29  ;;  %v2466_v18 = vadd.f32 %v2465_v35, %v2413_v10  ;;  %v6831_v35 = vld [vmem:[#allocation36_spill] sm:$0xff] }
 0x4b6   :  { %v2495_v33 = vadd.f32 %v2453_v40, %v6828_v59  ;;  %v2496_v26 = vadd.f32 %v2466_v18, %v6829_v1  ;;  %v6832_v18 = vld [vmem:[#allocation78_spill] sm:$0xff] }
 0x4b8   :  { %v4026_v53 = vmul.f32 -1.442695, %v2495_v33  ;;  %v4027_v31 = vmul.f32 -1.442695, %v2496_v26  ;;  %v6833_v33 = vld [vmem:[#allocation37_spill] sm:$0xff]  ;;  %v6834_v26 = vld [vmem:[#allocation82_spill] sm:$0xff] }
 0x4ba   :  { %4331 = vpow2.f32 %v4026_v53  ;;  %v2478_v57 = vpop.f32.mrf.mxu2  ;;  %v2491_v4 = vpop.f32.mrf.mxu3  ;;  %v356_v53 = vadd.f32 %v6832_v18, %v6831_v35  ;;  %v6836_v35 = vld [vmem:[#allocation51_spill] sm:$0xff] }
 0x4bb   :  { %4333 = vpow2.f32 %v4027_v31  ;;  %v2492_v58 = vadd.f32 %v2491_v4, %v2439_v60  ;;  %v2454_v45 = vpop.f32.mrf.mxu0  ;;  %v2467_v37 = vpop.f32.mrf.mxu1  ;;  %v385_v31 = vadd.f32 %v6834_v26, %v6833_v33  ;;  %v2479_v4 = vadd.f32 %v2478_v57, %v2426_v32  ;;  %v6837_v26 = vld [vmem:[#allocation90_spill] sm:$0xff] }
 0x4bc   :  { %v443_v33 = vadd.f32 %v6837_v26, %v6836_v35 }
 0x4bd   :  { %v2498_v27 = vadd.f32 %v2492_v58, %v6830_v2 }
 0x4bf   :  { %v4028_v48 = vmul.f32 -1.442695, %v2498_v27 }
 0x4c0   :  { %v4332_v19 = vpop.eup %4331 }
 0x4c1   :  { %v4334_v22 = vpop.eup %4333  ;;  %v2505_v17 = vadd.f32 1.0, %v4332_v19  ;;  %4335 = vpow2.f32 %v4028_v48 }
 0x4c2   :  { %v5844_v29 = vadd.f32 1.0, %v4334_v22  ;;  %v2480_v40 = vpop.f32.mrf.mxu2  ;;  %v2493_v10 = vpop.f32.mrf.mxu3 }
 0x4c3   :  { %4337 = vrcp.f32 %v2505_v17  ;;  %v6835_v10 = vld [vmem:[#allocation26_spill] sm:$0xff]  ;;  %vm2512_vm14 = vweird.f32 %v2505_v17 }
 0x4c4   :  { %4339 = vrcp.f32 %v5844_v29  ;;  %v2578_v45 = vpop.f32.mrf.mxu0  ;;  %v2591_v58 = vpop.f32.mrf.mxu1  ;;  %v2497_v2 = vadd.f32 %v2479_v4, %v6835_v10  ;;  %v2518_v4 = vand.u32 2147483648, %v2505_v17  ;;  %vm2527_vm15 = vweird.f32 %v5844_v29 }
 0x4c5   :  { %v2621_v60 = vadd.f32 %v2578_v45, %v356_v53  ;;  %v2622_v37 = vadd.f32 %v2591_v58, %v385_v31 }
 0x4c7   :  { %v4336_v19 = vpop.eup %4335  ;;  %v4029_v27 = vmul.f32 -1.442695, %v2621_v60  ;;  %v4030_v22 = vmul.f32 -1.442695, %v2622_v37 }
 0x4c8   :  { %v5851_v48 = vadd.f32 1.0, %v4336_v19  ;;  %v2516_v19 = vand.u32 2147483647, %v2505_v17 }
 0x4c9   :  { %v4338_v40 = vpop.eup %4337  ;;  %4341 = vpow2.f32 %v4029_v27  ;;  %v2533_v27 = vand.u32 2147483648, %v5844_v29 }
 0x4ca   :  { %v4340_v18 = vpop.eup %4339  ;;  %v2508_v1 = vmul.f32 %v4338_v40, %v2505_v17  ;;  %4343 = vrcp.f32 %v5851_v48  ;;  %vm2513_vm12 = vweird.f32 %v4338_v40  ;;  %vm2517_vm1 = vcmp.eq.f32.partialorder %v2516_v19, 8.507059e+37 }
 0x4cb   :  { %v2523_v32 = vmul.f32 %v4340_v18, %v5844_v29  ;;  %4345 = vpow2.f32 %v4030_v22  ;;  %vm2528_vm13 = vweird.f32 %v4340_v18  ;;  %v2531_v22 = vand.u32 2147483647, %v5844_v29  ;;  %vm2514_vm0 = vmor %vm2512_vm14, %vm2513_vm12 }
 0x4cc   :  { %v2604_v57 = vpop.f32.mrf.mxu2  ;;  %v2617_v53 = vpop.f32.mrf.mxu3  ;;  %v2509_v31 = vsub.f32 1.0, %v2508_v1  ;;  %4347 = vtanh.f32 %v2497_v2  ;;  %vm2529_vm2 = vmor %vm2527_vm15, %vm2528_vm13  ;;  %v2534_v17 = vor.u32 1.1754944e-38, %v2533_v27  ;;  %vm2547_vm5 = vweird.f32 %v5851_v48 }
 0x4cd   :  { %v2624_v45 = vadd.f32 %v2617_v53, %v443_v33  ;;  %v2580_v58 = vpop.f32.mrf.mxu0  ;;  %v2593_v60 = vpop.f32.mrf.mxu1  ;;  %v2524_v37 = vsub.f32 1.0, %v2523_v32  ;;  %v2519_v32 = vor.u32 1.1754944e-38, %v2518_v4  ;;  %vm2532_vm3 = vcmp.eq.f32.partialorder %v2531_v22, 8.507059e+37 }
 0x4ce   :  { %v2510_v10 = vmul.f32 %v4338_v40, %v2509_v31  ;;  %v2553_v22 = vand.u32 2147483648, %v5851_v48 }
 0x4cf   :  { %v4031_v26 = vmul.f32 -1.442695, %v2624_v45  ;;  %v4342_v35 = vpop.eup %4341  ;;  %v2525_v59 = vmul.f32 %v4340_v18, %v2524_v37 }
 0x4d0   :  { %v5860_v15 = vpop.eup %4343  ;;  %v2511_v1 = vadd.f32 %v4338_v40, %v2510_v10  ;;  %v5863_v33 = vadd.f32 1.0, %v4342_v35 }
 0x4d1   :  { %4349 = vpow2.f32 %v4031_v26  ;;  %v4346_v2 = vpop.eup %4345  ;;  %v2526_v53 = vadd.f32 %v4340_v18, %v2525_v59  ;;  %v2543_v31 = vmul.f32 %v5860_v15, %v5851_v48  ;;  %vm2548_vm4 = vweird.f32 %v5860_v15 }
 0x4d2   :  { %v2515_v45 = vsel %vm2514_vm0, %v4338_v40, %v2511_v1  ;;  %4351 = vrcp.f32 %v5863_v33  ;;  %v5868_v58 = vadd.f32 1.0, %v4346_v2  ;;  %v4348_v29 = vpop.eup %4347  ;;  %v6838_v1 = vld [vmem:[#allocation49_spill] sm:$0xff]  ;;  %vm5888_vm6 = vmor %vm2547_vm5, %vm2548_vm4  ;;  %vm2638_vm8 = vweird.f32 %v5863_v33 }
 0x4d3   :  { %v2520_v10 = vsel %vm2517_vm1, %v2519_v32, %v2515_v45  ;;  %v2530_v35 = vsel %vm2529_vm2, %v4340_v18, %v2526_v53  ;;  %v2544_v60 = vsub.f32 1.0, %v2543_v31  ;;  %v414_v2 = vadd.f32 %v6839_v42, %v6838_v1  ;;  %v6868_v1 = vld [vmem:[#allocation69_spill] sm:$0xff] }
 0x4d4   :  { %v2606_v37 = vpop.f32.mrf.mxu2  ;;  %v2619_v26 = vpop.f32.mrf.mxu3  ;;  %v2535_v19 = vsel %vm2532_vm3, %v2534_v17, %v2530_v35  ;;  %v2558_v4 = vmul.f32 %v4348_v29, %v2520_v10  ;;  %4353 = vrcp.f32 %v5868_v58  ;;  %v2551_v42 = vand.u32 2147483647, %v5851_v48 }
 0x4d5   :  { %v2557_v59 = vmul.f32 %v2535_v19, %v5710_v54  ;;  %v2545_v27 = vmul.f32 %v5860_v15, %v2544_v60  ;;  %v2623_v53 = vadd.f32 %v2604_v57, %v414_v2  ;;  %v2644_v10 = vand.u32 2147483648, %v5863_v33 }
 0x4d6   :  { %v2554_v60 = vor.u32 1.1754944e-38, %v2553_v22  ;;  %v2642_v48 = vand.u32 2147483647, %v5863_v33  ;;  %v2659_v19 = vand.u32 2147483648, %v5868_v58  ;;  %vm2552_vm9 = vcmp.eq.f32.partialorder %v2551_v42, 8.507059e+37 }
 0x4d7   :  { %v4350_v40 = vpop.eup %4349  ;;  %v5875_v5 = vadd.f32 %v2558_v4, %v2557_v59  ;;  %v2546_v31 = vadd.f32 %v5860_v15, %v2545_v27  ;;  %v2657_v4 = vand.u32 2147483647, %v5868_v58  ;;  %vm2653_vm11 = vweird.f32 %v5868_v58 }
 0x4d8   :  { %v5877_v32 = vadd.f32 1.0, %v4350_v40  ;;  %v4352_v18 = vpop.eup %4351  ;;  %vm2643_vm13 = vcmp.eq.f32.partialorder %v2642_v48, 8.507059e+37 }
 0x4d9   :  { %4355 = vtanh.f32 %v5875_v5  ;;  %v2634_v54 = vmul.f32 %v4352_v18, %v5863_v33  ;;  %v2550_v35 = vsel %vm5888_vm6, %v5860_v15, %v2546_v31  ;;  %vm2639_vm7 = vweird.f32 %v4352_v18 }
 0x4da   :  { %v4354_v17 = vpop.eup %4353  ;;  %4357 = vrcp.f32 %v5877_v32  ;;  %v2555_v2 = vsel %vm2552_vm9, %v2554_v60, %v2550_v35  ;;  %vm2640_vm12 = vmor %vm2638_vm8, %vm2639_vm7  ;;  %v2645_v15 = vor.u32 1.1754944e-38, %v2644_v10  ;;  %vm2658_vm15 = vcmp.eq.f32.partialorder %v2657_v4, 8.507059e+37 }
 0x4db   :  { %v2635_v45 = vsub.f32 1.0, %v2634_v54  ;;  %v2649_v29 = vmul.f32 %v4354_v17, %v5868_v58  ;;  %4359 = vtanh.f32 %v2623_v53  ;;  %vm2654_vm10 = vweird.f32 %v4354_v17 }
 0x4dc   :  { %vm2655_vm14 = vmor %vm2653_vm11, %vm2654_vm10  ;;  %v2679_v48 = vand.u32 2147483648, %v5877_v32  ;;  %vm2673_vm1 = vweird.f32 %v5877_v32 }
 0x4dd   :  { %v2650_v37 = vsub.f32 1.0, %v2649_v29  ;;  %v2636_v26 = vmul.f32 %v4352_v18, %v2635_v45  ;;  %v2660_v29 = vor.u32 1.1754944e-38, %v2659_v19 }
 0x4de   :  { %v2680_v4 = vor.u32 1.1754944e-38, %v2679_v48  ;;  %v6860_v48 = vld [vmem:[#allocation57_spill] sm:$0xff] }
 0x4df   :  { %v4356_v59 = vpop.eup %4355  ;;  %v2651_v27 = vmul.f32 %v4354_v17, %v2650_v37  ;;  %v2637_v40 = vadd.f32 %v4352_v18, %v2636_v26 }
 0x4e0   :  { %v4358_v53 = vpop.eup %4357  ;;  %v2561_v22 = vmul.f32 %v4356_v59, %v2555_v2  ;;  %v6842_v2 = vld [vmem:[#allocation25_spill] sm:$0xff] }
 0x4e1   :  { %v2641_v31 = vsel %vm2640_vm12, %v4352_v18, %v2637_v40  ;;  %v2652_v54 = vadd.f32 %v4354_v17, %v2651_v27  ;;  %v2669_v45 = vmul.f32 %v4358_v53, %v5877_v32  ;;  %v4360_v33 = vpop.eup %4359  ;;  %vm2674_vm0 = vweird.f32 %v4358_v53 }
 0x4e2   :  { %v2646_v42 = vsel %vm2643_vm13, %v2645_v15, %v2641_v31  ;;  %v2689_v57 = vpack.c.bf16 %v2561_v22, %v2561_v22  ;;  %vm2675_vm2 = vmor %vm2673_vm1, %vm2674_vm0  ;;  %v6844_v15 = vld [vmem:[#allocation29_spill] sm:$0xff]  ;;  %v6845_v22 = vld [vmem:[#allocation30_spill] sm:$0xff] }
 0x4e3   :  { %v2656_v37 = vsel %vm2655_vm14, %v4354_v17, %v2652_v54  ;;  %v2684_v26 = vmul.f32 %v4360_v33, %v2646_v42  ;;  %v2670_v35 = vsub.f32 1.0, %v2669_v45  ;;  %v6846_v31 = vld [vmem:[#allocation31_spill] sm:$0xff]  ;;  %v6847_v54 = vld [vmem:[#allocation32_spill] sm:$0xff]  ;;  %v6848_v45 = vld [vmem:[#allocation33_spill] sm:$0xff] }
 0x4e4   :  { %v2661_v60 = vsel %vm2658_vm15, %v2660_v29, %v2656_v37  ;;  %2698 = vmatmul.bf16.vlgmr.msrb.gmra.mxu0 %v2689_v57  ;;  %2711 = vmatmul.bf16.vlgmr.msrb.gmra.mxu1 %v2689_v57  ;;  %v6849_v33 = vld [vmem:[#allocation34_spill] sm:$0xff]  ;;  %v6850_v29 = vld [vmem:[#allocation35_spill] sm:$0xff]  ;;  %v6851_v42 = vld [vmem:[#allocation41_spill] sm:$0xff] }
 0x4e5   :  { %v2683_v58 = vmul.f32 %v2661_v60, %v5741_v0  ;;  %v2671_v10 = vmul.f32 %v4358_v53, %v2670_v35  ;;  %2724 = vmatmul.bf16.vlgmr.msrb.gmra.mxu2 %v2689_v57  ;;  %2737 = vmatmul.bf16.vlgmr.msrb.gmra.mxu3 %v2689_v57  ;;  %v2677_v0 = vand.u32 2147483647, %v5877_v32  ;;  %v6852_v57 = vld [vmem:[#allocation43_spill] sm:$0xff]  ;;  %v6853_v37 = vld [vmem:[#allocation44_spill] sm:$0xff]  ;;  %v6855_v35 = vld [vmem:[#allocation46_spill] sm:$0xff] }
 0x4e6   :  { %2868 = vmatpush.bf16.msrb.mxu0 %v4703_v38  ;;  %2881 = vmatpush.bf16.msrb.mxu1 %v4705_v43  ;;  %v6856_v60 = vld [vmem:[#allocation47_spill] sm:$0xff] }
 0x4e7   :  { %v5905_v18 = vadd.f32 %v2684_v26, %v2683_v58  ;;  %2894 = vmatpush.bf16.msrb.mxu2 %v4707_v49  ;;  %2907 = vmatpush.bf16.msrb.mxu3 %v4710_v50  ;;  %v2672_v17 = vadd.f32 %v4358_v53, %v2671_v10  ;;  %vm2678_vm3 = vcmp.eq.f32.partialorder %v2677_v0, 8.507059e+37  ;;  %v6854_v26 = vld [vmem:[#allocation45_spill] sm:$0xff]  ;;  %v6857_v58 = vld [vmem:[#allocation48_spill] sm:$0xff]  ;;  %v6858_v10 = vld [vmem:[#allocation50_spill] sm:$0xff] }
 0x4e8   :  { %v6861_v0 = vld [vmem:[#allocation58_spill] sm:$0xff] }
 0x4e9   :  { %4361 = vtanh.f32 %v5905_v18  ;;  %v2676_v19 = vsel %vm2675_vm2, %v4358_v53, %v2672_v17  ;;  %v6843_v53 = vld [vmem:[#allocation28_spill] sm:$0xff] }
 0x4ea   :  { %2869 = vmatpush.bf16.msrb.mxu0 %v4712_v51  ;;  %2882 = vmatpush.bf16.msrb.mxu1 %v4715_v55  ;;  %v2681_v27 = vsel %vm2678_vm3, %v2680_v4, %v2676_v19  ;;  %v6859_v17 = vld [vmem:[#allocation56_spill] sm:$0xff]  ;;  %v6862_v19 = vld [vmem:[#allocation59_spill] sm:$0xff] }
 0x4eb   :  { %2895 = vmatpush.bf16.msrb.mxu2 %v4718_v61  ;;  %2908 = vmatpush.bf16.msrb.mxu3 %v4722_v62  ;;  %v6863_v4 = vld [vmem:[#allocation60_spill] sm:$0xff] }
 0x4ee   :  { %2870 = vmatpush.bf16.msrb.mxu0 %v4724_v63  ;;  %2883 = vmatpush.bf16.msrb.mxu1 %v4727_v3 }
 0x4ef   :  { %v4362_v59 = vpop.eup %4361  ;;  %2896 = vmatpush.bf16.msrb.mxu2 %v4730_v9  ;;  %2909 = vmatpush.bf16.msrb.mxu3 %v4734_v11 }
 0x4f0   :  { %v2687_v32 = vmul.f32 %v4362_v59, %v2681_v27  ;;  %v6864_v59 = vld [vmem:[#allocation61_spill] sm:$0xff]  ;;  %v6865_v27 = vld [vmem:[#allocation62_spill] sm:$0xff] }
 0x4f2   :  { %v2688_v40 = vpack.c.bf16 %v2687_v32, %v2687_v32  ;;  %2871 = vmatpush.bf16.msrb.mxu0 %v4736_v12  ;;  %2884 = vmatpush.bf16.msrb.mxu1 %v4739_v16  ;;  %v6866_v32 = vld [vmem:[#allocation63_spill] sm:$0xff] }
 0x4f3   :  { %2897 = vmatpush.bf16.msrb.mxu2 %v4742_v23  ;;  %2910 = vmatpush.bf16.msrb.mxu3 %v4746_v24 }
 0x4f4   :  { %2750 = vmatmul.bf16.vlgmr.msra.gmra.mxu0 %v2688_v40  ;;  %2763 = vmatmul.bf16.vlgmr.msra.gmra.mxu1 %v2688_v40 }
 0x4f5   :  { %2776 = vmatmul.bf16.vlgmr.msra.gmra.mxu2 %v2688_v40  ;;  %2789 = vmatmul.bf16.vlgmr.msra.gmra.mxu3 %v2688_v40 }
 0x4f6   :  { %2872 = vmatpush.bf16.msrb.mxu0 %v4748_v25  ;;  %2885 = vmatpush.bf16.msrb.mxu1 %v4751_v30 }
 0x4f7   :  { %2898 = vmatpush.bf16.msrb.mxu2 %v4754_v36  ;;  %2911 = vmatpush.bf16.msrb.mxu3 %v6553_v28 }
 0x4fa   :  { %2873 = vmatpush.bf16.msrb.mxu0 %v4760_v39  ;;  %2886 = vmatpush.bf16.msrb.mxu1 %v6554_v34 }
 0x4fb   :  { %2899 = vmatpush.bf16.msrb.mxu2 %v6555_v44  ;;  %2912 = vmatpush.bf16.msrb.mxu3 %v6556_v13 }
 0x4fe   :  { %2874 = vmatpush.bf16.msrb.mxu0 %v6557_v47  ;;  %2887 = vmatpush.bf16.msrb.mxu1 %v4773_v56 }
 0x4ff   :  { %2900 = vmatpush.bf16.msrb.mxu2 %v4784_v8  ;;  %2913 = vmatpush.bf16.msrb.mxu3 %v4780_v6 }
 0x502   :  { %2875 = vmatpush.bf16.msrb.mxu0 %v4782_v7  ;;  %2888 = vmatpush.bf16.msrb.mxu1 %v4787_v14 }
 0x503   :  { %2901 = vmatpush.bf16.msrb.mxu2 %v4790_v20  ;;  %2914 = vmatpush.bf16.msrb.mxu3 %v4794_v21 }
 0x505   :  { %2876 = vmatmul.bf16.vlgmr.msrb.gmra.mxu0 %v2688_v40  ;;  %2889 = vmatmul.bf16.vlgmr.msrb.gmra.mxu1 %v2688_v40 }
 0x506   :  { %2989 = vmatpush.bf16.msra.mxu0 %v4807_v41  ;;  %3002 = vmatpush.bf16.msra.mxu1 %v4809_v46 }
 0x507   :  { %2902 = vmatmul.bf16.vlgmr.msrb.gmra.mxu2 %v2688_v40  ;;  %2915 = vmatmul.bf16.vlgmr.msrb.gmra.mxu3 %v2688_v40  ;;  %v6867_v40 = vld [vmem:[#allocation67_spill] sm:$0xff] }
 0x508   :  { %3015 = vmatpush.bf16.msra.mxu2 %v4811_v52  ;;  %3028 = vmatpush.bf16.msra.mxu3 %v6842_v2 }
 0x50a   :  { %2990 = vmatpush.bf16.msra.mxu0 %v6843_v53  ;;  %3003 = vmatpush.bf16.msra.mxu1 %v6844_v15 }
 0x50c   :  { %3016 = vmatpush.bf16.msra.mxu2 %v6845_v22  ;;  %3029 = vmatpush.bf16.msra.mxu3 %v6846_v31 }
 0x50e   :  { %2991 = vmatpush.bf16.msra.mxu0 %v6847_v54  ;;  %3004 = vmatpush.bf16.msra.mxu1 %v6848_v45 }
 0x510   :  { %3017 = vmatpush.bf16.msra.mxu2 %v6849_v33  ;;  %3030 = vmatpush.bf16.msra.mxu3 %v6850_v29 }
 0x512   :  { %2992 = vmatpush.bf16.msra.mxu0 %v6851_v42  ;;  %3005 = vmatpush.bf16.msra.mxu1 %v6852_v57  ;;  %v6903_v57 = vld [vmem:[#allocation118_spill] sm:$0xff]  ;;  %v6904_v42 = vld [vmem:[#allocation119_spill] sm:$0xff] }
 0x514   :  { %3018 = vmatpush.bf16.msra.mxu2 %v6853_v37  ;;  %3031 = vmatpush.bf16.msra.mxu3 %v6854_v26 }
 0x516   :  { %2993 = vmatpush.bf16.msra.mxu0 %v6855_v35  ;;  %3006 = vmatpush.bf16.msra.mxu1 %v6856_v60 }
 0x518   :  { %3019 = vmatpush.bf16.msra.mxu2 %v6857_v58  ;;  %3032 = vmatpush.bf16.msra.mxu3 %v6858_v10  ;;  %v6869_v10 = vld [vmem:[#allocation72_spill] sm:$0xff] }
 0x51a   :  { %2994 = vmatpush.bf16.msra.mxu0 %v6859_v17  ;;  %3007 = vmatpush.bf16.msra.mxu1 %v6860_v48  ;;  %v6870_v17 = vld [vmem:[#allocation73_spill] sm:$0xff]  ;;  %v6871_v48 = vld [vmem:[#allocation70_spill] sm:$0xff] }
 0x51c   :  { %3020 = vmatpush.bf16.msra.mxu2 %v6861_v0  ;;  %3033 = vmatpush.bf16.msra.mxu3 %v6862_v19  ;;  %v6872_v0 = vld [vmem:[#allocation71_spill] sm:$0xff]  ;;  %v6873_v19 = vld [vmem:[#allocation74_spill] sm:$0xff] }
 0x51e   :  { %2995 = vmatpush.bf16.msra.mxu0 %v6863_v4  ;;  %3008 = vmatpush.bf16.msra.mxu1 %v6864_v59  ;;  %v6874_v4 = vld [vmem:[#allocation75_spill] sm:$0xff]  ;;  %v6875_v59 = vld [vmem:[#allocation76_spill] sm:$0xff] }
 0x520   :  { %3021 = vmatpush.bf16.msra.mxu2 %v6865_v27  ;;  %3034 = vmatpush.bf16.msra.mxu3 %v6866_v32  ;;  %v6876_v27 = vld [vmem:[#allocation79_spill] sm:$0xff]  ;;  %v6877_v32 = vld [vmem:[#allocation80_spill] sm:$0xff] }
 0x522   :  { %2996 = vmatpush.bf16.msra.mxu0 %v6867_v40  ;;  %3009 = vmatpush.bf16.msra.mxu1 %v6868_v1  ;;  %v6878_v40 = vld [vmem:[#allocation83_spill] sm:$0xff]  ;;  %v6879_v1 = vld [vmem:[#allocation84_spill] sm:$0xff] }
 0x524   :  { %3022 = vmatpush.bf16.msra.mxu2 %v6871_v48  ;;  %3035 = vmatpush.bf16.msra.mxu3 %v6872_v0  ;;  %v6882_v48 = vld [vmem:[#allocation87_spill] sm:$0xff]  ;;  %v6883_v0 = vld [vmem:[#allocation89_spill] sm:$0xff] }
 0x526   :  { %3041 = vmatpush.bf16.msrb.mxu0 %v6869_v10  ;;  %3054 = vmatpush.bf16.msrb.mxu1 %v6870_v17  ;;  %v6880_v10 = vld [vmem:[#allocation85_spill] sm:$0xff]  ;;  %v6881_v17 = vld [vmem:[#allocation86_spill] sm:$0xff] }
 0x528   :  { %3067 = vmatpush.bf16.msrb.mxu2 %v6873_v19  ;;  %3080 = vmatpush.bf16.msrb.mxu3 %v6874_v4  ;;  %v6884_v19 = vld [vmem:[#allocation91_spill] sm:$0xff]  ;;  %v6885_v4 = vld [vmem:[#allocation92_spill] sm:$0xff] }
 0x52a   :  { %3042 = vmatpush.bf16.msrb.mxu0 %v6875_v59  ;;  %3055 = vmatpush.bf16.msrb.mxu1 %v6876_v27  ;;  %v6886_v59 = vld [vmem:[#allocation94_spill] sm:$0xff]  ;;  %v6887_v27 = vld [vmem:[#allocation96_spill] sm:$0xff] }
 0x52c   :  { %3068 = vmatpush.bf16.msrb.mxu2 %v6877_v32  ;;  %3081 = vmatpush.bf16.msrb.mxu3 %v6878_v40  ;;  %v6888_v32 = vld [vmem:[#allocation97_spill] sm:$0xff]  ;;  %v6889_v40 = vld [vmem:[#allocation98_spill] sm:$0xff] }
 0x52e   :  { %3043 = vmatpush.bf16.msrb.mxu0 %v6879_v1  ;;  %3056 = vmatpush.bf16.msrb.mxu1 %v6880_v10  ;;  %v6890_v1 = vld [vmem:[#allocation99_spill] sm:$0xff]  ;;  %v6891_v10 = vld [vmem:[#allocation100_spill] sm:$0xff] }
 0x530   :  { %3069 = vmatpush.bf16.msrb.mxu2 %v6881_v17  ;;  %3082 = vmatpush.bf16.msrb.mxu3 %v6882_v48  ;;  %v6892_v17 = vld [vmem:[#allocation103_spill] sm:$0xff]  ;;  %v6893_v48 = vld [vmem:[#allocation104_spill] sm:$0xff] }
 0x532   :  { %3044 = vmatpush.bf16.msrb.mxu0 %v6883_v0  ;;  %3057 = vmatpush.bf16.msrb.mxu1 %v6884_v19  ;;  %v6894_v0 = vld [vmem:[#allocation107_spill] sm:$0xff]  ;;  %v6895_v19 = vld [vmem:[#allocation108_spill] sm:$0xff] }
 0x534   :  { %3070 = vmatpush.bf16.msrb.mxu2 %v6885_v4  ;;  %3083 = vmatpush.bf16.msrb.mxu3 %v6886_v59  ;;  %v6896_v4 = vld [vmem:[#allocation109_spill] sm:$0xff]  ;;  %v6897_v59 = vld [vmem:[#allocation110_spill] sm:$0xff] }
 0x536   :  { %3045 = vmatpush.bf16.msrb.mxu0 %v6887_v27  ;;  %3058 = vmatpush.bf16.msrb.mxu1 %v6888_v32  ;;  %v6898_v27 = vld [vmem:[#allocation111_spill] sm:$0xff]  ;;  %v6899_v32 = vld [vmem:[#allocation113_spill] sm:$0xff] }
 0x538   :  { %3071 = vmatpush.bf16.msrb.mxu2 %v6889_v40  ;;  %3084 = vmatpush.bf16.msrb.mxu3 %v6890_v1  ;;  %v6900_v40 = vld [vmem:[#allocation115_spill] sm:$0xff]  ;;  %v6901_v1 = vld [vmem:[#allocation116_spill] sm:$0xff] }
 0x53a   :  { %3046 = vmatpush.bf16.msrb.mxu0 %v6891_v10  ;;  %3059 = vmatpush.bf16.msrb.mxu1 %v6892_v17  ;;  %v6902_v10 = vld [vmem:[#allocation117_spill] sm:$0xff] }
 0x53c   :  { %3072 = vmatpush.bf16.msrb.mxu2 %v6893_v48  ;;  %3085 = vmatpush.bf16.msrb.mxu3 %v6894_v0 }
 0x53e   :  { %3047 = vmatpush.bf16.msrb.mxu0 %v6895_v19  ;;  %3060 = vmatpush.bf16.msrb.mxu1 %v6896_v4 }
 0x540   :  { %3073 = vmatpush.bf16.msrb.mxu2 %v6897_v59  ;;  %3086 = vmatpush.bf16.msrb.mxu3 %v6898_v27 }
 0x542   :  { %3048 = vmatpush.bf16.msrb.mxu0 %v6899_v32  ;;  %3061 = vmatpush.bf16.msrb.mxu1 %v6900_v40 }
 0x544   :  { %3074 = vmatpush.bf16.msrb.mxu2 %v6901_v1  ;;  %3087 = vmatpush.bf16.msrb.mxu3 %v6902_v10 }
 0x561   :  { %v2699_v17 = vpop.f32.mrf.mxu0  ;;  %v2712_v48 = vpop.f32.mrf.mxu1 }
 0x568   :  { %v2725_v58 = vpop.f32.mrf.mxu2  ;;  %v2738_v0 = vpop.f32.mrf.mxu3 }
 0x569   :  { %v2701_v60 = vpop.f32.mrf.mxu0  ;;  %v2714_v19 = vpop.f32.mrf.mxu1 }
 0x56a   :  { %v6905_v19 = vld [vmem:[#allocation120_spill] sm:$0xff] }
 0x570   :  { %v2727_v35 = vpop.f32.mrf.mxu2  ;;  %v2740_v4 = vpop.f32.mrf.mxu3 }
 0x571   :  { %v2751_v26 = vpop.f32.mrf.mxu0  ;;  %v2764_v59 = vpop.f32.mrf.mxu1 }
 0x572   :  { %v2752_v37 = vadd.f32 %v2751_v26, %v2699_v17  ;;  %v2765_v27 = vadd.f32 %v2764_v59, %v2712_v48 }
 0x574   :  { %v2794_v32 = vadd.f32 %v2752_v37, %v6903_v57  ;;  %v2795_v40 = vadd.f32 %v2765_v27, %v6904_v42 }
 0x576   :  { %v4032_v29 = vmul.f32 -1.442695, %v2794_v32  ;;  %v4033_v1 = vmul.f32 -1.442695, %v2795_v40  ;;  %v6906_v32 = vld [vmem:[#allocation93_spill] sm:$0xff] }
 0x578   :  { %4363 = vpow2.f32 %v4032_v29  ;;  %v2777_v10 = vpop.f32.mrf.mxu2  ;;  %v2790_v33 = vpop.f32.mrf.mxu3 }
 0x579   :  { %4365 = vpow2.f32 %v4033_v1  ;;  %v2791_v45 = vadd.f32 %v2790_v33, %v2738_v0  ;;  %v2753_v54 = vpop.f32.mrf.mxu0  ;;  %v2766_v60 = vpop.f32.mrf.mxu1  ;;  %v2778_v27 = vadd.f32 %v2777_v10, %v2725_v58  ;;  %v6907_v33 = vld [vmem:[#allocation95_spill] sm:$0xff] }
 0x57b   :  { %v2797_v35 = vadd.f32 %v2791_v45, %v6905_v19 }
 0x57d   :  { %v4034_v4 = vmul.f32 -1.442695, %v2797_v35 }
 0x57e   :  { %v4364_v31 = vpop.eup %4363 }
 0x57f   :  { %v4366_v22 = vpop.eup %4365  ;;  %v2804_v26 = vadd.f32 1.0, %v4364_v31  ;;  %4367 = vpow2.f32 %v4034_v4  ;;  %v6908_v31 = vld [vmem:[#allocation26_spill] sm:$0xff] }
 0x580   :  { %v2805_v17 = vadd.f32 1.0, %v4366_v22  ;;  %v2779_v37 = vpop.f32.mrf.mxu2  ;;  %v2792_v48 = vpop.f32.mrf.mxu3  ;;  %v2796_v4 = vadd.f32 %v2778_v27, %v6908_v31 }
 0x581   :  { %4369 = vrcp.f32 %v2804_v26  ;;  %v2817_v19 = vand.u32 2147483648, %v2804_v26  ;;  %vm2811_vm6 = vweird.f32 %v2804_v26 }
 0x582   :  { %4371 = vrcp.f32 %v2805_v17  ;;  %v2877_v59 = vpop.f32.mrf.mxu0  ;;  %v2890_v29 = vpop.f32.mrf.mxu1  ;;  %v2832_v42 = vand.u32 2147483648, %v2805_v17  ;;  %vm2826_vm7 = vweird.f32 %v2805_v17 }
 0x583   :  { %v2920_v1 = vadd.f32 %v2877_v59, %v6906_v32  ;;  %v2921_v54 = vadd.f32 %v2890_v29, %v6907_v33  ;;  %v6909_v32 = vld [vmem:[#allocation105_spill] sm:$0xff] }
 0x585   :  { %v4368_v0 = vpop.eup %4367  ;;  %v4035_v40 = vmul.f32 -1.442695, %v2920_v1  ;;  %v4036_v45 = vmul.f32 -1.442695, %v2921_v54 }
 0x586   :  { %v6010_v60 = vadd.f32 1.0, %v4368_v0  ;;  %v2815_v0 = vand.u32 2147483647, %v2804_v26 }
 0x587   :  { %v4370_v35 = vpop.eup %4369  ;;  %4373 = vpow2.f32 %v4035_v40 }
 0x588   :  { %v4372_v22 = vpop.eup %4371  ;;  %v2807_v37 = vmul.f32 %v4370_v35, %v2804_v26  ;;  %4375 = vrcp.f32 %v6010_v60  ;;  %vm2812_vm4 = vweird.f32 %v4370_v35  ;;  %vm2816_vm9 = vcmp.eq.f32.partialorder %v2815_v0, 8.507059e+37 }
 0x589   :  { %v2822_v48 = vmul.f32 %v4372_v22, %v2805_v17  ;;  %4377 = vpow2.f32 %v4036_v45  ;;  %vm2827_vm5 = vweird.f32 %v4372_v22  ;;  %v2830_v45 = vand.u32 2147483647, %v2805_v17  ;;  %vm2813_vm8 = vmor %vm2811_vm6, %vm2812_vm4 }
 0x58a   :  { %v2903_v58 = vpop.f32.mrf.mxu2  ;;  %v2916_v10 = vpop.f32.mrf.mxu3  ;;  %v2808_v59 = vsub.f32 1.0, %v2807_v37  ;;  %4379 = vtanh.f32 %v2796_v4  ;;  %v2818_v4 = vor.u32 1.1754944e-38, %v2817_v19  ;;  %vm2828_vm10 = vmor %vm2826_vm7, %vm2827_vm5  ;;  %vm2846_vm13 = vweird.f32 %v6010_v60 }
 0x58b   :  { %v2923_v29 = vadd.f32 %v2916_v10, %v6909_v32  ;;  %v2879_v33 = vpop.f32.mrf.mxu0  ;;  %v2892_v1 = vpop.f32.mrf.mxu1  ;;  %v2823_v54 = vsub.f32 1.0, %v2822_v48  ;;  %vm2831_vm11 = vcmp.eq.f32.partialorder %v2830_v45, 8.507059e+37  ;;  %v6910_v45 = vld [vmem:[#allocation101_spill] sm:$0xff] }
 0x58c   :  { %v2809_v27 = vmul.f32 %v4370_v35, %v2808_v59 }
 0x58d   :  { %v4037_v40 = vmul.f32 -1.442695, %v2923_v29  ;;  %v4374_v31 = vpop.eup %4373  ;;  %v2824_v57 = vmul.f32 %v4372_v22, %v2823_v54  ;;  %v2833_v29 = vor.u32 1.1754944e-38, %v2832_v42 }
 0x58e   :  { %v6015_v15 = vpop.eup %4375  ;;  %v2810_v37 = vadd.f32 %v4370_v35, %v2809_v27  ;;  %v6017_v10 = vadd.f32 1.0, %v4374_v31 }
 0x58f   :  { %4381 = vpow2.f32 %v4037_v40  ;;  %v4378_v48 = vpop.eup %4377  ;;  %v2825_v32 = vadd.f32 %v4372_v22, %v2824_v57  ;;  %v2842_v59 = vmul.f32 %v6015_v15, %v6010_v60  ;;  %vm2847_vm12 = vweird.f32 %v6015_v15 }
 0x590   :  { %v2814_v33 = vsel %vm2813_vm8, %v4370_v35, %v2810_v37  ;;  %4383 = vrcp.f32 %v6017_v10  ;;  %v6022_v26 = vadd.f32 1.0, %v4378_v48  ;;  %v4380_v17 = vpop.eup %4379  ;;  %vm6041_vm14 = vmor %vm2846_vm13, %vm2847_vm12  ;;  %vm2937_vm0 = vweird.f32 %v6017_v10 }
 0x591   :  { %v2819_v1 = vsel %vm2816_vm9, %v2818_v4, %v2814_v33  ;;  %v2829_v31 = vsel %vm2828_vm10, %v4372_v22, %v2825_v32  ;;  %v2843_v54 = vsub.f32 1.0, %v2842_v59  ;;  %v2852_v22 = vand.u32 2147483648, %v6010_v60 }
 0x592   :  { %v2905_v27 = vpop.f32.mrf.mxu2  ;;  %v2918_v40 = vpop.f32.mrf.mxu3  ;;  %v2834_v0 = vsel %vm2831_vm11, %v2833_v29, %v2829_v31  ;;  %v2857_v19 = vmul.f32 %v4380_v17, %v2819_v1  ;;  %4385 = vrcp.f32 %v6022_v26  ;;  %v2922_v4 = vadd.f32 %v2903_v58, %v6910_v45 }
 0x593   :  { %v2856_v57 = vmul.f32 %v2834_v0, %v5875_v5  ;;  %v2844_v42 = vmul.f32 %v6015_v15, %v2843_v54  ;;  %v2850_v29 = vand.u32 2147483647, %v6010_v60  ;;  %v2943_v1 = vand.u32 2147483648, %v6017_v10 }
 0x594   :  { %v2853_v54 = vor.u32 1.1754944e-38, %v2852_v22  ;;  %v2941_v60 = vand.u32 2147483647, %v6017_v10  ;;  %v2958_v0 = vand.u32 2147483648, %v6022_v26  ;;  %vm2952_vm3 = vweird.f32 %v6022_v26 }
 0x595   :  { %v4382_v35 = vpop.eup %4381  ;;  %v6027_v37 = vadd.f32 %v2857_v19, %v2856_v57  ;;  %v2845_v32 = vadd.f32 %v6015_v15, %v2844_v42  ;;  %v2956_v19 = vand.u32 2147483647, %v6022_v26  ;;  %vm2851_vm1 = vcmp.eq.f32.partialorder %v2850_v29, 8.507059e+37 }
 0x596   :  { %v6029_v48 = vadd.f32 1.0, %v4382_v35  ;;  %v4384_v53 = vpop.eup %4383  ;;  %vm2942_vm5 = vcmp.eq.f32.partialorder %v2941_v60, 8.507059e+37 }
 0x597   :  { %4387 = vtanh.f32 %v6027_v37  ;;  %v2933_v5 = vmul.f32 %v4384_v53, %v6017_v10  ;;  %v2849_v31 = vsel %vm6041_vm14, %v6015_v15, %v2845_v32  ;;  %vm2938_vm15 = vweird.f32 %v4384_v53 }
 0x598   :  { %v4386_v59 = vpop.eup %4385  ;;  %4389 = vrcp.f32 %v6029_v48  ;;  %v2854_v45 = vsel %vm2851_vm1, %v2853_v54, %v2849_v31  ;;  %vm2939_vm4 = vmor %vm2937_vm0, %vm2938_vm15  ;;  %v2944_v15 = vor.u32 1.1754944e-38, %v2943_v1  ;;  %vm2957_vm7 = vcmp.eq.f32.partialorder %v2956_v19, 8.507059e+37  ;;  %v6945_v19 = vld [vmem:[#allocation76_spill] sm:$0xff] }
 0x599   :  { %v2934_v33 = vsub.f32 1.0, %v2933_v5  ;;  %v2948_v17 = vmul.f32 %v4386_v59, %v6022_v26  ;;  %4391 = vtanh.f32 %v2922_v4  ;;  %vm2953_vm2 = vweird.f32 %v4386_v59 }
 0x59a   :  { %vm2954_vm6 = vmor %vm2952_vm3, %vm2953_vm2  ;;  %v2978_v60 = vand.u32 2147483648, %v6029_v48  ;;  %vm2972_vm9 = vweird.f32 %v6029_v48 }
 0x59b   :  { %v2949_v27 = vsub.f32 1.0, %v2948_v17  ;;  %v2935_v40 = vmul.f32 %v4384_v53, %v2934_v33  ;;  %v2959_v17 = vor.u32 1.1754944e-38, %v2958_v0  ;;  %v6944_v0 = vld [vmem:[#allocation75_spill] sm:$0xff] }
 0x59d   :  { %v4388_v57 = vpop.eup %4387  ;;  %v2950_v42 = vmul.f32 %v4386_v59, %v2949_v27  ;;  %v2936_v35 = vadd.f32 %v4384_v53, %v2935_v40 }
 0x59e   :  { %v4390_v4 = vpop.eup %4389  ;;  %v2860_v22 = vmul.f32 %v4388_v57, %v2854_v45  ;;  %v6946_v57 = vld [vmem:[#allocation79_spill] sm:$0xff]  ;;  %v6949_v45 = vld [vmem:[#allocation84_spill] sm:$0xff] }
 0x59f   :  { %v2940_v32 = vsel %vm2939_vm4, %v4384_v53, %v2936_v35  ;;  %v2951_v5 = vadd.f32 %v4386_v59, %v2950_v42  ;;  %v2968_v33 = vmul.f32 %v4390_v4, %v6029_v48  ;;  %v4392_v10 = vpop.eup %4391  ;;  %vm2973_vm8 = vweird.f32 %v4390_v4  ;;  %v6947_v42 = vld [vmem:[#allocation80_spill] sm:$0xff]  ;;  %v6948_v35 = vld [vmem:[#allocation83_spill] sm:$0xff] }
 0x5a0   :  { %v2945_v29 = vsel %vm2942_vm5, %v2944_v15, %v2940_v32  ;;  %v2988_v58 = vpack.c.bf16 %v2860_v22, %v2860_v22  ;;  %vm2974_vm10 = vmor %vm2972_vm9, %vm2973_vm8  ;;  %v6951_v15 = vld [vmem:[#allocation86_spill] sm:$0xff]  ;;  %v6952_v22 = vld [vmem:[#allocation87_spill] sm:$0xff] }
 0x5a1   :  { %v2955_v27 = vsel %vm2954_vm6, %v4386_v59, %v2951_v5  ;;  %v2983_v40 = vmul.f32 %v4392_v10, %v2945_v29  ;;  %v2969_v31 = vsub.f32 1.0, %v2968_v33  ;;  %v6953_v32 = vld [vmem:[#allocation89_spill] sm:$0xff]  ;;  %v6954_v5 = vld [vmem:[#allocation91_spill] sm:$0xff]  ;;  %v6955_v33 = vld [vmem:[#allocation92_spill] sm:$0xff] }
 0x5a2   :  { %v2960_v54 = vsel %vm2957_vm7, %v2959_v17, %v2955_v27  ;;  %2997 = vmatmul.bf16.vlgmr.msra.gmra.mxu0 %v2988_v58  ;;  %3010 = vmatmul.bf16.vlgmr.msra.gmra.mxu1 %v2988_v58  ;;  %v6956_v10 = vld [vmem:[#allocation94_spill] sm:$0xff]  ;;  %v6957_v17 = vld [vmem:[#allocation96_spill] sm:$0xff]  ;;  %v6958_v29 = vld [vmem:[#allocation97_spill] sm:$0xff] }
 0x5a3   :  { %v2982_v26 = vmul.f32 %v2960_v54, %v5905_v18  ;;  %v2970_v1 = vmul.f32 %v4390_v4, %v2969_v31  ;;  %3023 = vmatmul.bf16.vlgmr.msra.gmra.mxu2 %v2988_v58  ;;  %3036 = vmatmul.bf16.vlgmr.msra.gmra.mxu3 %v2988_v58  ;;  %v2976_v18 = vand.u32 2147483647, %v6029_v48  ;;  %v6943_v48 = vld [vmem:[#allocation74_spill] sm:$0xff]  ;;  %v6960_v27 = vld [vmem:[#allocation99_spill] sm:$0xff]  ;;  %v6963_v54 = vld [vmem:[#allocation104_spill] sm:$0xff] }
 0x5a4   :  { %3167 = vmatpush.bf16.msra.mxu0 %v4703_v38  ;;  %3180 = vmatpush.bf16.msra.mxu1 %v4705_v43  ;;  %v2979_v43 = vor.u32 1.1754944e-38, %v2978_v60  ;;  %v6959_v58 = vld [vmem:[#allocation98_spill] sm:$0xff]  ;;  %v6962_v31 = vld [vmem:[#allocation103_spill] sm:$0xff] }
 0x5a5   :  { %v6058_v53 = vadd.f32 %v2983_v40, %v2982_v26  ;;  %3193 = vmatpush.bf16.msra.mxu2 %v4707_v49  ;;  %3206 = vmatpush.bf16.msra.mxu3 %v4710_v50  ;;  %v2971_v59 = vadd.f32 %v4390_v4, %v2970_v1  ;;  %vm2977_vm11 = vcmp.eq.f32.partialorder %v2976_v18, 8.507059e+37  ;;  %v6961_v40 = vld [vmem:[#allocation100_spill] sm:$0xff]  ;;  %v6964_v26 = vld [vmem:[#allocation107_spill] sm:$0xff]  ;;  %v6967_v60 = vld [vmem:[#allocation110_spill] sm:$0xff] }
 0x5a6   :  { %v6965_v1 = vld [vmem:[#allocation108_spill] sm:$0xff]  ;;  %v6968_v18 = vld [vmem:[#allocation111_spill] sm:$0xff] }
 0x5a7   :  { %4393 = vtanh.f32 %v6058_v53  ;;  %v2975_v38 = vsel %vm2974_vm10, %v4390_v4, %v2971_v59  ;;  %v6950_v4 = vld [vmem:[#allocation85_spill] sm:$0xff] }
 0x5a8   :  { %3168 = vmatpush.bf16.msra.mxu0 %v4712_v51  ;;  %3181 = vmatpush.bf16.msra.mxu1 %v4715_v55  ;;  %v2980_v50 = vsel %vm2977_vm11, %v2979_v43, %v2975_v38  ;;  %v6966_v59 = vld [vmem:[#allocation109_spill] sm:$0xff]  ;;  %v6970_v43 = vld [vmem:[#allocation115_spill] sm:$0xff] }
 0x5a9   :  { %3194 = vmatpush.bf16.msra.mxu2 %v4718_v61  ;;  %3207 = vmatpush.bf16.msra.mxu3 %v4722_v62  ;;  %v6913_v61 = vld [vmem:[#allocation28_spill] sm:$0xff]  ;;  %v6914_v62 = vld [vmem:[#allocation29_spill] sm:$0xff] }
 0x5aa   :  { %v6969_v38 = vld [vmem:[#allocation113_spill] sm:$0xff] }
 0x5ac   :  { %3169 = vmatpush.bf16.msra.mxu0 %v4724_v63  ;;  %3182 = vmatpush.bf16.msra.mxu1 %v4727_v3  ;;  %v6915_v63 = vld [vmem:[#allocation30_spill] sm:$0xff]  ;;  %v6916_v3 = vld [vmem:[#allocation31_spill] sm:$0xff] }
 0x5ad   :  { %v4394_v49 = vpop.eup %4393  ;;  %3195 = vmatpush.bf16.msra.mxu2 %v4730_v9  ;;  %3208 = vmatpush.bf16.msra.mxu3 %v4734_v11  ;;  %v6917_v9 = vld [vmem:[#allocation32_spill] sm:$0xff]  ;;  %v6918_v11 = vld [vmem:[#allocation33_spill] sm:$0xff] }
 0x5ae   :  { %v2986_v51 = vmul.f32 %v4394_v49, %v2980_v50  ;;  %v6971_v49 = vld [vmem:[#allocation116_spill] sm:$0xff]  ;;  %v6972_v50 = vld [vmem:[#allocation117_spill] sm:$0xff] }
 0x5b0   :  { %v2987_v55 = vpack.c.bf16 %v2986_v51, %v2986_v51  ;;  %3170 = vmatpush.bf16.msra.mxu0 %v4736_v12  ;;  %3183 = vmatpush.bf16.msra.mxu1 %v4739_v16  ;;  %v6919_v12 = vld [vmem:[#allocation34_spill] sm:$0xff]  ;;  %v6920_v16 = vld [vmem:[#allocation35_spill] sm:$0xff] }
 0x5b1   :  { %3196 = vmatpush.bf16.msra.mxu2 %v4742_v23  ;;  %3209 = vmatpush.bf16.msra.mxu3 %v4746_v24  ;;  %v6921_v23 = vld [vmem:[#allocation41_spill] sm:$0xff]  ;;  %v6922_v24 = vld [vmem:[#allocation43_spill] sm:$0xff] }
 0x5b2   :  { %3049 = vmatmul.bf16.vlgmr.msrb.gmra.mxu0 %v2987_v55  ;;  %3062 = vmatmul.bf16.vlgmr.msrb.gmra.mxu1 %v2987_v55 }
 0x5b3   :  { %3075 = vmatmul.bf16.vlgmr.msrb.gmra.mxu2 %v2987_v55  ;;  %3088 = vmatmul.bf16.vlgmr.msrb.gmra.mxu3 %v2987_v55 }
 0x5b4   :  { %3171 = vmatpush.bf16.msra.mxu0 %v4748_v25  ;;  %3184 = vmatpush.bf16.msra.mxu1 %v4751_v30  ;;  %v6923_v25 = vld [vmem:[#allocation44_spill] sm:$0xff]  ;;  %v6924_v30 = vld [vmem:[#allocation45_spill] sm:$0xff] }
 0x5b5   :  { %3197 = vmatpush.bf16.msra.mxu2 %v4754_v36  ;;  %3210 = vmatpush.bf16.msra.mxu3 %v6553_v28  ;;  %v6925_v36 = vld [vmem:[#allocation46_spill] sm:$0xff]  ;;  %v6937_v28 = vld [vmem:[#allocation67_spill] sm:$0xff] }
 0x5b8   :  { %3172 = vmatpush.bf16.msra.mxu0 %v4760_v39  ;;  %3185 = vmatpush.bf16.msra.mxu1 %v6554_v34  ;;  %v6926_v39 = vld [vmem:[#allocation47_spill] sm:$0xff]  ;;  %v6938_v34 = vld [vmem:[#allocation69_spill] sm:$0xff] }
 0x5b9   :  { %3198 = vmatpush.bf16.msra.mxu2 %v6555_v44  ;;  %3211 = vmatpush.bf16.msra.mxu3 %v6556_v13  ;;  %v6939_v44 = vld [vmem:[#allocation72_spill] sm:$0xff]  ;;  %v6940_v13 = vld [vmem:[#allocation73_spill] sm:$0xff] }
 0x5bc   :  { %3173 = vmatpush.bf16.msra.mxu0 %v6557_v47  ;;  %3186 = vmatpush.bf16.msra.mxu1 %v4773_v56  ;;  %v6927_v56 = vld [vmem:[#allocation48_spill] sm:$0xff]  ;;  %v6941_v47 = vld [vmem:[#allocation70_spill] sm:$0xff] }
 0x5bd   :  { %3199 = vmatpush.bf16.msra.mxu2 %v4784_v8  ;;  %3212 = vmatpush.bf16.msra.mxu3 %v4780_v6  ;;  %v6928_v6 = vld [vmem:[#allocation50_spill] sm:$0xff]  ;;  %v6930_v8 = vld [vmem:[#allocation57_spill] sm:$0xff] }
 0x5c0   :  { %3174 = vmatpush.bf16.msra.mxu0 %v4782_v7  ;;  %3187 = vmatpush.bf16.msra.mxu1 %v4787_v14  ;;  %v6929_v7 = vld [vmem:[#allocation56_spill] sm:$0xff]  ;;  %v6931_v14 = vld [vmem:[#allocation58_spill] sm:$0xff] }
 0x5c1   :  { %3200 = vmatpush.bf16.msra.mxu2 %v4790_v20  ;;  %3213 = vmatpush.bf16.msra.mxu3 %v4794_v21  ;;  %v6932_v20 = vld [vmem:[#allocation59_spill] sm:$0xff]  ;;  %v6933_v21 = vld [vmem:[#allocation60_spill] sm:$0xff] }
 0x5c3   :  { %3175 = vmatmul.bf16.vlgmr.msra.gmra.mxu0 %v2987_v55  ;;  %3188 = vmatmul.bf16.vlgmr.msra.gmra.mxu1 %v2987_v55 }
 0x5c4   :  { %3288 = vmatpush.bf16.msrb.mxu0 %v4807_v41  ;;  %3301 = vmatpush.bf16.msrb.mxu1 %v4809_v46  ;;  %v6934_v41 = vld [vmem:[#allocation61_spill] sm:$0xff]  ;;  %v6935_v46 = vld [vmem:[#allocation62_spill] sm:$0xff] }
 0x5c5   :  { %3201 = vmatmul.bf16.vlgmr.msra.gmra.mxu2 %v2987_v55  ;;  %3214 = vmatmul.bf16.vlgmr.msra.gmra.mxu3 %v2987_v55 }
 0x5c6   :  { %3314 = vmatpush.bf16.msrb.mxu2 %v4811_v52  ;;  %3327 = vmatpush.bf16.msrb.mxu3 %v6842_v2  ;;  %v6936_v52 = vld [vmem:[#allocation63_spill] sm:$0xff] }
 0x5c7   :  { %v6942_v2 = vld [vmem:[#allocation71_spill] sm:$0xff] }
 0x5c8   :  { %3289 = vmatpush.bf16.msrb.mxu0 %v6913_v61  ;;  %3302 = vmatpush.bf16.msrb.mxu1 %v6914_v62 }
 0x5ca   :  { %3315 = vmatpush.bf16.msrb.mxu2 %v6915_v63  ;;  %3328 = vmatpush.bf16.msrb.mxu3 %v6916_v3 }
 0x5cc   :  { %3290 = vmatpush.bf16.msrb.mxu0 %v6917_v9  ;;  %3303 = vmatpush.bf16.msrb.mxu1 %v6918_v11 }
 0x5ce   :  { %3316 = vmatpush.bf16.msrb.mxu2 %v6919_v12  ;;  %3329 = vmatpush.bf16.msrb.mxu3 %v6920_v16 }
 0x5d0   :  { %3291 = vmatpush.bf16.msrb.mxu0 %v6921_v23  ;;  %3304 = vmatpush.bf16.msrb.mxu1 %v6922_v24 }
 0x5d2   :  { %3317 = vmatpush.bf16.msrb.mxu2 %v6923_v25  ;;  %3330 = vmatpush.bf16.msrb.mxu3 %v6924_v30  ;;  %v6973_v25 = vld [vmem:[#allocation118_spill] sm:$0xff] }
 0x5d4   :  { %3292 = vmatpush.bf16.msrb.mxu0 %v6925_v36  ;;  %3305 = vmatpush.bf16.msrb.mxu1 %v6926_v39  ;;  %v6974_v36 = vld [vmem:[#allocation119_spill] sm:$0xff] }
 0x5d6   :  { %3318 = vmatpush.bf16.msrb.mxu2 %v6927_v56  ;;  %3331 = vmatpush.bf16.msrb.mxu3 %v6928_v6 }
 0x5d8   :  { %3293 = vmatpush.bf16.msrb.mxu0 %v6929_v7  ;;  %3306 = vmatpush.bf16.msrb.mxu1 %v6930_v8 }
 0x5da   :  { %3319 = vmatpush.bf16.msrb.mxu2 %v6931_v14  ;;  %3332 = vmatpush.bf16.msrb.mxu3 %v6932_v20 }
 0x5dc   :  { %3294 = vmatpush.bf16.msrb.mxu0 %v6933_v21  ;;  %3307 = vmatpush.bf16.msrb.mxu1 %v6934_v41  ;;  %v6975_v41 = vld [vmem:[#allocation120_spill] sm:$0xff] }
 0x5de   :  { %3320 = vmatpush.bf16.msrb.mxu2 %v6935_v46  ;;  %3333 = vmatpush.bf16.msrb.mxu3 %v6936_v52 }
 0x5e0   :  { %3295 = vmatpush.bf16.msrb.mxu0 %v6937_v28  ;;  %3308 = vmatpush.bf16.msrb.mxu1 %v6938_v34 }
 0x5e2   :  { %3321 = vmatpush.bf16.msrb.mxu2 %v6941_v47  ;;  %3334 = vmatpush.bf16.msrb.mxu3 %v6942_v2 }
 0x5e4   :  { %3340 = vmatpush.bf16.msra.mxu0 %v6939_v44  ;;  %3353 = vmatpush.bf16.msra.mxu1 %v6940_v13 }
 0x5e6   :  { %3366 = vmatpush.bf16.msra.mxu2 %v6943_v48  ;;  %3379 = vmatpush.bf16.msra.mxu3 %v6944_v0  ;;  %v6976_v48 = vld [vmem:[#allocation36_spill] sm:$0xff]  ;;  %v6977_v0 = vld [vmem:[#allocation102_spill] sm:$0xff] }
 0x5e8   :  { %3341 = vmatpush.bf16.msra.mxu0 %v6945_v19  ;;  %3354 = vmatpush.bf16.msra.mxu1 %v6946_v57  ;;  %v361_v19 = vadd.f32 %v6977_v0, %v6976_v48  ;;  %v6978_v57 = vld [vmem:[#allocation37_spill] sm:$0xff] }
 0x5e9   :  { %v6983_v0 = vld [vmem:[#allocation49_spill] sm:$0xff] }
 0x5ea   :  { %3367 = vmatpush.bf16.msra.mxu2 %v6947_v42  ;;  %3380 = vmatpush.bf16.msra.mxu3 %v6948_v35  ;;  %v6979_v42 = vld [vmem:[#allocation106_spill] sm:$0xff] }
 0x5eb   :  { %v390_v35 = vadd.f32 %v6979_v42, %v6978_v57 }
 0x5ec   :  { %3342 = vmatpush.bf16.msra.mxu0 %v6949_v45  ;;  %3355 = vmatpush.bf16.msra.mxu1 %v6950_v4 }
 0x5ee   :  { %3368 = vmatpush.bf16.msra.mxu2 %v6951_v15  ;;  %3381 = vmatpush.bf16.msra.mxu3 %v6952_v22 }
 0x5f0   :  { %3343 = vmatpush.bf16.msra.mxu0 %v6953_v32  ;;  %3356 = vmatpush.bf16.msra.mxu1 %v6954_v5 }
 0x5f2   :  { %3369 = vmatpush.bf16.msra.mxu2 %v6955_v33  ;;  %3382 = vmatpush.bf16.msra.mxu3 %v6956_v10 }
 0x5f4   :  { %3344 = vmatpush.bf16.msra.mxu0 %v6957_v17  ;;  %3357 = vmatpush.bf16.msra.mxu1 %v6958_v29 }
 0x5f6   :  { %3370 = vmatpush.bf16.msra.mxu2 %v6959_v58  ;;  %3383 = vmatpush.bf16.msra.mxu3 %v6960_v27  ;;  %v6980_v58 = vld [vmem:[#allocation26_spill] sm:$0xff] }
 0x5f8   :  { %3345 = vmatpush.bf16.msra.mxu0 %v6961_v40  ;;  %3358 = vmatpush.bf16.msra.mxu1 %v6962_v31  ;;  %v6981_v31 = vld [vmem:[#allocation51_spill] sm:$0xff] }
 0x5fa   :  { %3371 = vmatpush.bf16.msra.mxu2 %v6963_v54  ;;  %3384 = vmatpush.bf16.msra.mxu3 %v6964_v26  ;;  %v6982_v54 = vld [vmem:[#allocation114_spill] sm:$0xff] }
 0x5fb   :  { %v448_v26 = vadd.f32 %v6982_v54, %v6981_v31 }
 0x5fc   :  { %3346 = vmatpush.bf16.msra.mxu0 %v6965_v1  ;;  %3359 = vmatpush.bf16.msra.mxu1 %v6966_v59 }
 0x5fe   :  { %3372 = vmatpush.bf16.msra.mxu2 %v6967_v60  ;;  %3385 = vmatpush.bf16.msra.mxu3 %v6968_v18 }
 0x600   :  { %3347 = vmatpush.bf16.msra.mxu0 %v6969_v38  ;;  %3360 = vmatpush.bf16.msra.mxu1 %v6970_v43 }
 0x602   :  { %3373 = vmatpush.bf16.msra.mxu2 %v6971_v49  ;;  %3386 = vmatpush.bf16.msra.mxu3 %v6972_v50 }
 0x61f   :  { %v2998_v51 = vpop.f32.mrf.mxu0  ;;  %v3011_v55 = vpop.f32.mrf.mxu1 }
 0x626   :  { %v3024_v61 = vpop.f32.mrf.mxu2  ;;  %v3037_v62 = vpop.f32.mrf.mxu3 }
 0x627   :  { %v3000_v63 = vpop.f32.mrf.mxu0  ;;  %v3013_v3 = vpop.f32.mrf.mxu1 }
 0x62e   :  { %v3026_v9 = vpop.f32.mrf.mxu2  ;;  %v3039_v11 = vpop.f32.mrf.mxu3 }
 0x62f   :  { %v3050_v12 = vpop.f32.mrf.mxu0  ;;  %v3063_v16 = vpop.f32.mrf.mxu1 }
 0x630   :  { %v3051_v23 = vadd.f32 %v3050_v12, %v2998_v51  ;;  %v3064_v24 = vadd.f32 %v3063_v16, %v3011_v55 }
 0x632   :  { %v3093_v30 = vadd.f32 %v3051_v23, %v6973_v25  ;;  %v3094_v39 = vadd.f32 %v3064_v24, %v6974_v36 }
 0x634   :  { %v4038_v56 = vmul.f32 -1.442695, %v3093_v30  ;;  %v4039_v6 = vmul.f32 -1.442695, %v3094_v39 }
 0x636   :  { %4395 = vpow2.f32 %v4038_v56  ;;  %v3076_v7 = vpop.f32.mrf.mxu2  ;;  %v3089_v8 = vpop.f32.mrf.mxu3 }
 0x637   :  { %4397 = vpow2.f32 %v4039_v6  ;;  %v3090_v14 = vadd.f32 %v3089_v8, %v3037_v62  ;;  %v3052_v20 = vpop.f32.mrf.mxu0  ;;  %v3065_v21 = vpop.f32.mrf.mxu1  ;;  %v3077_v15 = vadd.f32 %v3076_v7, %v3024_v61 }
 0x639   :  { %v3096_v46 = vadd.f32 %v3090_v14, %v6975_v41  ;;  %v3095_v27 = vadd.f32 %v3077_v15, %v6980_v58 }
 0x63b   :  { %v4040_v52 = vmul.f32 -1.442695, %v3096_v46 }
 0x63c   :  { %v4396_v28 = vpop.eup %4395 }
 0x63d   :  { %v4398_v34 = vpop.eup %4397  ;;  %v3103_v44 = vadd.f32 1.0, %v4396_v28  ;;  %4399 = vpow2.f32 %v4040_v52 }
 0x63e   :  { %v6161_v13 = vadd.f32 1.0, %v4398_v34  ;;  %v3078_v47 = vpop.f32.mrf.mxu2  ;;  %v3091_v2 = vpop.f32.mrf.mxu3 }
 0x63f   :  { %4401 = vrcp.f32 %v3103_v44  ;;  %v3114_v55 = vand.u32 2147483647, %v3103_v44  ;;  %v3116_v61 = vand.u32 2147483648, %v3103_v44  ;;  %vm3110_vm14 = vweird.f32 %v3103_v44 }
 0x640   :  { %4403 = vrcp.f32 %v6161_v13  ;;  %v3176_v45 = vpop.f32.mrf.mxu0  ;;  %v3189_v4 = vpop.f32.mrf.mxu1  ;;  %v3131_v62 = vand.u32 2147483648, %v6161_v13  ;;  %v3129_v12 = vand.u32 2147483647, %v6161_v13  ;;  %vm3125_vm15 = vweird.f32 %v6161_v13 }
 0x641   :  { %v3219_v22 = vadd.f32 %v3176_v45, %v361_v19  ;;  %v3220_v32 = vadd.f32 %v3189_v4, %v390_v35  ;;  %vm3115_vm1 = vcmp.eq.f32.partialorder %v3114_v55, 8.507059e+37  ;;  %v3117_v39 = vor.u32 1.1754944e-38, %v3116_v61  ;;  %v6984_v19 = vld [vmem:[#allocation112_spill] sm:$0xff] }
 0x642   :  { %v3132_v7 = vor.u32 1.1754944e-38, %v3131_v62  ;;  %vm3130_vm3 = vcmp.eq.f32.partialorder %v3129_v12, 8.507059e+37  ;;  %v419_v57 = vadd.f32 %v6984_v19, %v6983_v0 }
 0x643   :  { %v4400_v5 = vpop.eup %4399  ;;  %v4041_v33 = vmul.f32 -1.442695, %v3219_v22  ;;  %v4042_v10 = vmul.f32 -1.442695, %v3220_v32 }
 0x644   :  { %v6168_v17 = vadd.f32 1.0, %v4400_v5 }
 0x645   :  { %v4402_v29 = vpop.eup %4401  ;;  %4405 = vpow2.f32 %v4041_v33 }
 0x646   :  { %v4404_v40 = vpop.eup %4403  ;;  %v3106_v1 = vmul.f32 %v4402_v29, %v3103_v44  ;;  %4407 = vrcp.f32 %v6168_v17  ;;  %vm3111_vm12 = vweird.f32 %v4402_v29  ;;  %v3151_v4 = vand.u32 2147483648, %v6168_v17 }
 0x647   :  { %v3121_v59 = vmul.f32 %v4404_v40, %v6161_v13  ;;  %4409 = vpow2.f32 %v4042_v10  ;;  %vm3126_vm13 = vweird.f32 %v4404_v40  ;;  %vm3112_vm0 = vmor %vm3110_vm14, %vm3111_vm12  ;;  %vm3145_vm5 = vweird.f32 %v6168_v17 }
 0x648   :  { %v3202_v60 = vpop.f32.mrf.mxu2  ;;  %v3215_v18 = vpop.f32.mrf.mxu3  ;;  %v3107_v38 = vsub.f32 1.0, %v3106_v1  ;;  %4411 = vtanh.f32 %v3095_v27  ;;  %vm3127_vm2 = vmor %vm3125_vm15, %vm3126_vm13  ;;  %v3149_v5 = vand.u32 2147483647, %v6168_v17  ;;  %v3152_v31 = vor.u32 1.1754944e-38, %v3151_v4 }
 0x649   :  { %v3222_v43 = vadd.f32 %v3215_v18, %v448_v26  ;;  %v3178_v49 = vpop.f32.mrf.mxu0  ;;  %v3191_v50 = vpop.f32.mrf.mxu1  ;;  %v3122_v51 = vsub.f32 1.0, %v3121_v59  ;;  %v3221_v15 = vadd.f32 %v3202_v60, %v419_v57 }
 0x64a   :  { %v3108_v63 = vmul.f32 %v4402_v29, %v3107_v38  ;;  %vm3150_vm9 = vcmp.eq.f32.partialorder %v3149_v5, 8.507059e+37 }
 0x64b   :  { %v4043_v3 = vmul.f32 -1.442695, %v3222_v43  ;;  %v4406_v9 = vpop.eup %4405  ;;  %v3123_v11 = vmul.f32 %v4404_v40, %v3122_v51 }
 0x64c   :  { %v6177_v16 = vpop.eup %4407  ;;  %v3109_v23 = vadd.f32 %v4402_v29, %v3108_v63  ;;  %v6180_v24 = vadd.f32 1.0, %v4406_v9 }
 0x64d   :  { %4413 = vpow2.f32 %v4043_v3  ;;  %v4410_v30 = vpop.eup %4409  ;;  %v3124_v56 = vadd.f32 %v4404_v40, %v3123_v11  ;;  %v3141_v6 = vmul.f32 %v6177_v16, %v6168_v17  ;;  %vm3146_vm4 = vweird.f32 %v6177_v16 }
 0x64e   :  { %v3113_v8 = vsel %vm3112_vm0, %v4402_v29, %v3109_v23  ;;  %4415 = vrcp.f32 %v6180_v24  ;;  %v6185_v14 = vadd.f32 1.0, %v4410_v30  ;;  %v4412_v20 = vpop.eup %4411  ;;  %vm6205_vm6 = vmor %vm3145_vm5, %vm3146_vm4  ;;  %v3242_v27 = vand.u32 2147483648, %v6180_v24 }
 0x64f   :  { %v3118_v21 = vsel %vm3115_vm1, %v3117_v39, %v3113_v8  ;;  %v3128_v46 = vsel %vm3127_vm2, %v4404_v40, %v3124_v56  ;;  %v3142_v52 = vsub.f32 1.0, %v3141_v6  ;;  %v3240_v17 = vand.u32 2147483647, %v6180_v24 }
 0x650   :  { %v3204_v28 = vpop.f32.mrf.mxu2  ;;  %v3217_v34 = vpop.f32.mrf.mxu3  ;;  %v3133_v44 = vsel %vm3130_vm3, %v3132_v7, %v3128_v46  ;;  %v3156_v13 = vmul.f32 %v4412_v20, %v3118_v21  ;;  %4417 = vrcp.f32 %v6185_v14  ;;  %v3257_v1 = vand.u32 2147483648, %v6185_v14 }
 0x651   :  { %v3155_v47 = vmul.f32 %v3133_v44, %v6027_v37  ;;  %v3143_v2 = vmul.f32 %v6177_v16, %v3142_v52  ;;  %vm3236_vm8 = vweird.f32 %v6180_v24  ;;  %v3255_v59 = vand.u32 2147483647, %v6185_v14 }
 0x652   :  { %vm3251_vm11 = vweird.f32 %v6185_v14  ;;  %v3243_v50 = vor.u32 1.1754944e-38, %v3242_v27  ;;  %vm3241_vm13 = vcmp.eq.f32.partialorder %v3240_v17, 8.507059e+37  ;;  %v3258_v3 = vor.u32 1.1754944e-38, %v3257_v1 }
 0x653   :  { %v4414_v48 = vpop.eup %4413  ;;  %v6192_v42 = vadd.f32 %v3156_v13, %v3155_v47  ;;  %v3144_v22 = vadd.f32 %v6177_v16, %v3143_v2  ;;  %vm3256_vm15 = vcmp.eq.f32.partialorder %v3255_v59, 8.507059e+37 }
 0x654   :  { %v6194_v35 = vadd.f32 1.0, %v4414_v48  ;;  %v4416_v45 = vpop.eup %4415 }
 0x655   :  { %4419 = vtanh.f32 %v6192_v42  ;;  %v3232_v37 = vmul.f32 %v4416_v45, %v6180_v24  ;;  %v3148_v40 = vsel %vm6205_vm6, %v6177_v16, %v3144_v22  ;;  %vm3237_vm7 = vweird.f32 %v4416_v45 }
 0x656   :  { %v4418_v32 = vpop.eup %4417  ;;  %4421 = vrcp.f32 %v6194_v35  ;;  %v3153_v43 = vsel %vm3150_vm9, %v3152_v31, %v3148_v40  ;;  %vm3238_vm12 = vmor %vm3236_vm8, %vm3237_vm7  ;;  %v3277_v7 = vand.u32 2147483648, %v6194_v35  ;;  %vm3271_vm1 = vweird.f32 %v6194_v35 }
 0x657   :  { %v3233_v33 = vsub.f32 1.0, %v3232_v37  ;;  %v3247_v10 = vmul.f32 %v4418_v32, %v6185_v14  ;;  %4423 = vtanh.f32 %v3221_v15  ;;  %vm3252_vm10 = vweird.f32 %v4418_v32 }
 0x658   :  { %vm3253_vm14 = vmor %vm3251_vm11, %vm3252_vm10  ;;  %v3275_v8 = vand.u32 2147483647, %v6194_v35  ;;  %v3278_v20 = vor.u32 1.1754944e-38, %v3277_v7 }
 0x659   :  { %v3248_v54 = vsub.f32 1.0, %v3247_v10  ;;  %v3234_v26 = vmul.f32 %v4416_v45, %v3233_v33 }
 0x65a   :  { %vm3276_vm3 = vcmp.eq.f32.partialorder %v3275_v8, 8.507059e+37 }
 0x65b   :  { %v4420_v60 = vpop.eup %4419  ;;  %v3249_v18 = vmul.f32 %v4418_v32, %v3248_v54  ;;  %v3235_v38 = vadd.f32 %v4416_v45, %v3234_v26 }
 0x65c   :  { %v4422_v49 = vpop.eup %4421  ;;  %v3159_v51 = vmul.f32 %v4420_v60, %v3153_v43 }
 0x65d   :  { %v3239_v55 = vsel %vm3238_vm12, %v4416_v45, %v3235_v38  ;;  %v3250_v61 = vadd.f32 %v4418_v32, %v3249_v18  ;;  %v3267_v62 = vmul.f32 %v4422_v49, %v6194_v35  ;;  %v4424_v63 = vpop.eup %4423  ;;  %vm3272_vm0 = vweird.f32 %v4422_v49 }
 0x65e   :  { %v3244_v9 = vsel %vm3241_vm13, %v3243_v50, %v3239_v55  ;;  %v3287_v11 = vpack.c.bf16 %v3159_v51, %v3159_v51  ;;  %vm3273_vm2 = vmor %vm3271_vm1, %vm3272_vm0 }
 0x65f   :  { %v3254_v12 = vsel %vm3253_vm14, %v4418_v32, %v3250_v61  ;;  %v3282_v16 = vmul.f32 %v4424_v63, %v3244_v9  ;;  %v3268_v23 = vsub.f32 1.0, %v3267_v62 }
 0x660   :  { %v3259_v24 = vsel %vm3256_vm15, %v3258_v3, %v3254_v12  ;;  %3296 = vmatmul.bf16.vlgmr.msrb.gmra.mxu0 %v3287_v11  ;;  %3309 = vmatmul.bf16.vlgmr.msrb.gmra.mxu1 %v3287_v11 }
 0x661   :  { %v3281_v30 = vmul.f32 %v3259_v24, %v6058_v53  ;;  %v3269_v39 = vmul.f32 %v4422_v49, %v3268_v23  ;;  %3322 = vmatmul.bf16.vlgmr.msrb.gmra.mxu2 %v3287_v11  ;;  %3335 = vmatmul.bf16.vlgmr.msrb.gmra.mxu3 %v3287_v11 }
 0x663   :  { %v3283_v56 = vadd.f32 %v3282_v16, %v3281_v30  ;;  %v3270_v6 = vadd.f32 %v4422_v49, %v3269_v39 }
 0x665   :  { %4425 = vtanh.f32 %v3283_v56  ;;  %v3274_v14 = vsel %vm3273_vm2, %v4422_v49, %v3270_v6 }
 0x666   :  { %v3279_v46 = vsel %vm3276_vm3, %v3278_v20, %v3274_v14 }
 0x66b   :  { %v4426_v21 = vpop.eup %4425 }
 0x66c   :  { %v3285_v53 = vmul.f32 %v4426_v21, %v3279_v46 }
 0x66e   :  { %v3286_v52 = vpack.c.bf16 %v3285_v53, %v3285_v53 }
 0x670   :  { %3348 = vmatmul.bf16.vlgmr.msra.gmra.mxu0 %v3286_v52  ;;  %3361 = vmatmul.bf16.vlgmr.msra.gmra.mxu1 %v3286_v52 }
 0x671   :  { %3374 = vmatmul.bf16.vlgmr.msra.gmra.mxu2 %v3286_v52  ;;  %3387 = vmatmul.bf16.vlgmr.msra.gmra.mxu3 %v3286_v52 }
 0x6dd   :  { %v3297_v28 = vpop.f32.mrf.mxu0  ;;  %v3310_v34 = vpop.f32.mrf.mxu1 }
 0x6e4   :  { %v3323_v44 = vpop.f32.mrf.mxu2  ;;  %v3336_v13 = vpop.f32.mrf.mxu3 }
 0x6e5   :  { %v3299_v47 = vpop.f32.mrf.mxu0  ;;  %v3312_v2 = vpop.f32.mrf.mxu1 }
 0x6ec   :  { %v3325_v48 = vpop.f32.mrf.mxu2  ;;  %v3338_v0 = vpop.f32.mrf.mxu3 }
 0x6ed   :  { %v3349_v19 = vpop.f32.mrf.mxu0  ;;  %v3362_v57 = vpop.f32.mrf.mxu1 }
 0x6ee   :  { %v3350_v35 = vadd.f32 %v3349_v19, %v3297_v28  ;;  %v3363_v45 = vadd.f32 %v3362_v57, %v3310_v34 }
 0x6f0   :  { %v3392_v4 = vadd.f32 %v3350_v35, %v6973_v25  ;;  %v3393_v15 = vadd.f32 %v3363_v45, %v6974_v36 }
 0x6f2   :  { %v4044_v22 = vmul.f32 -1.442695, %v3392_v4  ;;  %v4045_v37 = vmul.f32 -1.442695, %v3393_v15 }
 0x6f4   :  { %4427 = vpow2.f32 %v4044_v22  ;;  %v3375_v32 = vpop.f32.mrf.mxu2  ;;  %v3388_v5 = vpop.f32.mrf.mxu3 }
 0x6f5   :  { %4429 = vpow2.f32 %v4045_v37  ;;  %v3389_v33 = vadd.f32 %v3388_v5, %v3336_v13  ;;  %v3351_v10 = vpop.f32.mrf.mxu0  ;;  %v3364_v29 = vpop.f32.mrf.mxu1  ;;  %v3376_v36 = vadd.f32 %v3375_v32, %v3323_v44 }
 0x6f7   :  { %v3395_v27 = vadd.f32 %v3389_v33, %v6975_v41  ;;  %v3394_v38 = vadd.f32 %v3376_v36, %v6980_v58 }
 0x6f9   :  { %v4046_v40 = vmul.f32 -1.442695, %v3395_v27 }
 0x6fa   :  { %v4428_v31 = vpop.eup %4427 }
 0x6fb   :  { %v4430_v54 = vpop.eup %4429  ;;  %v3402_v26 = vadd.f32 1.0, %v4428_v31  ;;  %4431 = vpow2.f32 %v4046_v40 }
 0x6fc   :  { %v3403_v17 = vadd.f32 1.0, %v4430_v54  ;;  %v3377_v25 = vpop.f32.mrf.mxu2  ;;  %v3390_v1 = vpop.f32.mrf.mxu3 }
 0x6fd   :  { %4433 = vrcp.f32 %v3402_v26  ;;  %v3415_v55 = vand.u32 2147483648, %v3402_v26  ;;  %v3413_v63 = vand.u32 2147483647, %v3402_v26  ;;  %vm3409_vm6 = vweird.f32 %v3402_v26 }
 0x6fe   :  { %4435 = vrcp.f32 %v3403_v17  ;;  %v3430_v61 = vand.u32 2147483648, %v3403_v17  ;;  %v3428_v9 = vand.u32 2147483647, %v3403_v17  ;;  %vm3424_vm7 = vweird.f32 %v3403_v17 }
 0x6ff   :  { %v3416_v58 = vor.u32 1.1754944e-38, %v3415_v55  ;;  %vm3414_vm10 = vcmp.eq.f32.partialorder %v3413_v63, 8.507059e+37 }
 0x700   :  { %v3431_v24 = vor.u32 1.1754944e-38, %v3430_v61  ;;  %vm3429_vm11 = vcmp.eq.f32.partialorder %v3428_v9, 8.507059e+37 }
 0x701   :  { %v4432_v59 = vpop.eup %4431 }
 0x702   :  { %v3438_v60 = vadd.f32 1.0, %v4432_v59 }
 0x703   :  { %v4434_v18 = vpop.eup %4433 }
 0x704   :  { %v4436_v43 = vpop.eup %4435  ;;  %v3405_v49 = vmul.f32 %v4434_v18, %v3402_v26  ;;  %4437 = vrcp.f32 %v3438_v60  ;;  %vm3410_vm4 = vweird.f32 %v4434_v18  ;;  %v3450_v52 = vand.u32 2147483648, %v3438_v60 }
 0x705   :  { %v3420_v41 = vmul.f32 %v4436_v43, %v3403_v17  ;;  %4439 = vtanh.f32 %v3394_v38  ;;  %vm3425_vm5 = vweird.f32 %v4436_v43  ;;  %vm3411_vm8 = vmor %vm3409_vm6, %vm3410_vm4  ;;  %vm3444_vm13 = vweird.f32 %v3438_v60 }
 0x706   :  { %v3406_v50 = vsub.f32 1.0, %v3405_v49  ;;  %vm3426_vm9 = vmor %vm3424_vm7, %vm3425_vm5  ;;  %v3448_v28 = vand.u32 2147483647, %v3438_v60  ;;  %v3451_v44 = vor.u32 1.1754944e-38, %v3450_v52 }
 0x707   :  { %v3421_v51 = vsub.f32 1.0, %v3420_v41 }
 0x708   :  { %v3407_v62 = vmul.f32 %v4434_v18, %v3406_v50  ;;  %vm3449_vm15 = vcmp.eq.f32.partialorder %v3448_v28, 8.507059e+37 }
 0x709   :  { %v3422_v3 = vmul.f32 %v4436_v43, %v3421_v51 }
 0x70a   :  { %v4438_v11 = vpop.eup %4437  ;;  %v3408_v12 = vadd.f32 %v4434_v18, %v3407_v62 }
 0x70b   :  { %v3423_v16 = vadd.f32 %v4436_v43, %v3422_v3  ;;  %v3440_v23 = vmul.f32 %v4438_v11, %v3438_v60  ;;  %v4440_v39 = vpop.eup %4439  ;;  %vm3445_vm12 = vweird.f32 %v4438_v11 }
 0x70c   :  { %v3412_v30 = vsel %vm3411_vm8, %v4434_v18, %v3408_v12  ;;  %vm3446_vm14 = vmor %vm3444_vm13, %vm3445_vm12 }
 0x70d   :  { %v3417_v56 = vsel %vm3414_vm10, %v3416_v58, %v3412_v30  ;;  %v3427_v6 = vsel %vm3426_vm9, %v4436_v43, %v3423_v16  ;;  %v3441_v7 = vsub.f32 1.0, %v3440_v23 }
 0x70e   :  { %v3432_v8 = vsel %vm3429_vm11, %v3431_v24, %v3427_v6  ;;  %v3455_v14 = vmul.f32 %v4440_v39, %v3417_v56 }
 0x70f   :  { %v3454_v20 = vmul.f32 %v3432_v8, %v6192_v42  ;;  %v3442_v21 = vmul.f32 %v4438_v11, %v3441_v7 }
 0x711   :  { %v3456_v46 = vadd.f32 %v3455_v14, %v3454_v20  ;;  %v3443_v53 = vadd.f32 %v4438_v11, %v3442_v21 }
 0x713   :  { %4441 = vtanh.f32 %v3456_v46  ;;  %v3447_v34 = vsel %vm3446_vm14, %v4438_v11, %v3443_v53 }
 0x714   :  { %v3452_v42 = vsel %vm3449_vm15, %v3451_v44, %v3447_v34 }
 0x719   :  { %v4442_v13 = vpop.eup %4441 }
 0x71a   :  { %v3458_v47 = vmul.f32 %v4442_v13, %v3452_v42 }
 0x71c   :  { %3459 = vst [vmem:[#allocation14] sm:$0xff] %v3458_v47 }
 0x71d   :  { %3470 = dma.vmem_to_hbm [thread:$0]  %s3466_s8, 128, %s3468_s11, [#allocation5]  }
 0x71e   :  { %4619 = dma.done.wait [#allocation5], 128  }
 0x71f   :  { %4620 = vsyncadd [#allocation5], 4294967168 }
 0x720   :  { %3475 = vsyncpa [#allocation4], 1 }
 0x721   :  { %3476 = vsyncpa [#allocation7], 1 }
 0x722   :  { %3477 = vsyncpa [#allocation10], 1 }
 0x723   :  { %3478 = vsyncpa [#allocation13], 1 }
 0x724   :  { %3479 = vsyncpa [#allocation5], 1 }

</bundles_post_ra>
